<compile_context>
chip_gen: v5e
topology: v5e:2x2
jax: 0.10.0
libtpu: 0.0.40
codegen_flags: <defaults>
</compile_context>

<pallas_src>
import functools

import jax
import jax.numpy as jnp
import numpy as np
from jax.experimental import pallas as pl
from jax.experimental.pallas import tpu as pltpu

_EPS = 1e-5                       # nn.BatchNorm2d default eps
_VMEM_LIMIT = 32 * 1024 * 1024    # scoped-VMEM budget: safe on v5e/v6e/v7x
_LANE = 128                       # channel padding -> lane-dense tiles


def _round_up(x, m):
    return (x + m - 1) // m * m


def _compiler_params():
    # 1-D pixel/image grid: independent tiles -> "parallel" (v7x megacore).
    return pltpu.CompilerParams(dimension_semantics=("parallel",),
                                vmem_limit_bytes=_VMEM_LIMIT)


# ----------------------------------------------------------------------------
# Pallas kernels
# ----------------------------------------------------------------------------
def _mm_moments_kernel(x_ref, w_ref, y_ref, mom_ref):
    """Pass 1 of a 1x1 conv: y = x @ w (f32 acc) + per-tile (sum, sumsq)."""
    y = jnp.dot(x_ref[...], w_ref[...], preferred_element_type=jnp.float32)
    y_ref[...] = y
    mom_ref[0, 0:1, :] = jnp.sum(y, axis=0, keepdims=True)
    mom_ref[0, 1:2, :] = jnp.sum(y * y, axis=0, keepdims=True)


def _conv3x3_moments_kernel(x_ref, w_ref, y_ref, mom_ref, *, stride, ho, wo, hq):
    """Pass 1 of the 3x3 conv: 9 shifted matmuls accumulated in f32 (no HBM
    im2col).  For stride 2 the input holds the 4 spatial-parity sub-images
    stacked along H so every tap is a contiguous, statically-sliced block."""
    cin = x_ref.shape[-1]
    cout = w_ref.shape[-1]
    acc = jnp.zeros((ho * wo, cout), jnp.float32)
    for kh in range(3):
        for kw in range(3):
            if stride == 1:
                sub, r0, c0 = 0, kh, kw
            else:
                sub = (kh % 2) * 2 + (kw % 2)
                r0, c0 = kh // 2, kw // 2
            xs = x_ref[0, sub * hq + r0:sub * hq + r0 + ho, c0:c0 + wo, :]
            acc = acc + jnp.dot(xs.reshape(ho * wo, cin), w_ref[kh, kw],
                                preferred_element_type=jnp.float32)
    y_ref[...] = acc.reshape(1, ho, wo, cout)
    mom_ref[0, 0:1, :] = jnp.sum(acc, axis=0, keepdims=True)
    mom_ref[0, 1:2, :] = jnp.sum(acc * acc, axis=0, keepdims=True)


def _bn_act_kernel(y_ref, scale_ref, shift_ref, o_ref, *, relu, valid_rows, tile_m):
    """Pass 2: y*scale + shift (+ReLU).  Rows beyond valid_rows are zeroed so
    M-padding never contaminates the next layer's batch statistics."""
    y = y_ref[...] * scale_ref[...] + shift_ref[...]
    if relu:
        y = jnp.maximum(y, 0.0)
    if valid_rows is not None:
        rows = pl.program_id(0) * tile_m + jax.lax.broadcasted_iota(
            jnp.int32, y.shape, 0)
        y = jnp.where(rows < valid_rows, y, 0.0)
    o_ref[...] = y.astype(o_ref.dtype)


def _bn_add_relu_kernel(y_ref, r_ref, s3_ref, b3_ref, ss_ref, bs_ref, o_ref):
    """Pass 2 of conv3 fused with the shortcut BN, residual add, final ReLU."""
    h = y_ref[...] * s3_ref[...] + b3_ref[...]
    r = r_ref[...].astype(jnp.float32) * ss_ref[...] + bs_ref[...]
    o_ref[...] = jnp.maximum(h + r, 0.0).astype(o_ref.dtype)


# ----------------------------------------------------------------------------
# pallas_call wrappers (tiled over the pixel dim / per image)
# ----------------------------------------------------------------------------
def _matmul_moments(x2d, w, tile_m):
    # TODO(synk): add a K grid axis ("arbitrary", f32 acc scratch) for very
    # large Cin (stage-4/5 1x1 convs) to stay inside v7x/v5e VMEM budgets.
    m, k = x2d.shape
    cout = w.shape[1]
    nt = m // tile_m
    return pl.pallas_call(
        _mm_moments_kernel,
        grid=(nt,),
        in_specs=[pl.BlockSpec((tile_m, k), lambda i: (i, 0)),
                  pl.BlockSpec((k, cout), lambda i: (0, 0))],
        out_specs=(pl.BlockSpec((tile_m, cout), lambda i: (i, 0)),
                   pl.BlockSpec((1, 2, cout), lambda i: (i, 0, 0))),
        out_shape=(jax.ShapeDtypeStruct((m, cout), jnp.float32),
                   jax.ShapeDtypeStruct((nt, 2, cout), jnp.float32)),
        compiler_params=_compiler_params(),
    )(x2d, w)


def _conv3x3_moments(xq, w2, stride, ho, wo, hq):
    n, sh, wq, cin = xq.shape
    cout = w2.shape[-1]
    return pl.pallas_call(
        functools.partial(_conv3x3_moments_kernel,
                          stride=stride, ho=ho, wo=wo, hq=hq),
        grid=(n,),
        in_specs=[pl.BlockSpec((1, sh, wq, cin), lambda i: (i, 0, 0, 0)),
                  pl.BlockSpec((3, 3, cin, cout), lambda i: (0, 0, 0, 0))],
        out_specs=(pl.BlockSpec((1, ho, wo, cout), lambda i: (i, 0, 0, 0)),
                   pl.BlockSpec((1, 2, cout), lambda i: (i, 0, 0))),
        out_shape=(jax.ShapeDtypeStruct((n, ho, wo, cout), jnp.float32),
                   jax.ShapeDtypeStruct((n, 2, cout), jnp.float32)),
        compiler_params=_compiler_params(),
    )(xq, w2)


def _bn_act(y, scale, shift, tile_m, *, relu, out_dtype, valid_rows=None):
    m, c = y.shape
    nt = m // tile_m
    return pl.pallas_call(
        functools.partial(_bn_act_kernel, relu=relu,
                          valid_rows=valid_rows, tile_m=tile_m),
        grid=(nt,),
        in_specs=[pl.BlockSpec((tile_m, c), lambda i: (i, 0)),
                  pl.BlockSpec((1, c), lambda i: (0, 0)),
                  pl.BlockSpec((1, c), lambda i: (0, 0))],
        out_specs=pl.BlockSpec((tile_m, c), lambda i: (i, 0)),
        out_shape=jax.ShapeDtypeStruct((m, c), out_dtype),
        compiler_params=_compiler_params(),
    )(y, scale, shift)


def _bn_add_relu(y3, res, s3, b3, ss, bs, tile_m, out_dtype):
    m, c = y3.shape
    nt = m // tile_m
    return pl.pallas_call(
        _bn_add_relu_kernel,
        grid=(nt,),
        in_specs=[pl.BlockSpec((tile_m, c), lambda i: (i, 0)),
                  pl.BlockSpec((tile_m, c), lambda i: (i, 0)),
                  pl.BlockSpec((1, c), lambda i: (0, 0)),
                  pl.BlockSpec((1, c), lambda i: (0, 0)),
                  pl.BlockSpec((1, c), lambda i: (0, 0)),
                  pl.BlockSpec((1, c), lambda i: (0, 0))],
        out_specs=pl.BlockSpec((tile_m, c), lambda i: (i, 0)),
        out_shape=jax.ShapeDtypeStruct((m, c), out_dtype),
        compiler_params=_compiler_params(),
    )(y3, res, s3, b3, ss, bs)


# ----------------------------------------------------------------------------
# Small JAX glue (per-channel BN finalize, spatial prep)
# ----------------------------------------------------------------------------
def _finalize_bn(mom, count, gamma, beta):
    """Reduce per-tile (sum, sumsq) partials and fold BN into (scale, shift)."""
    tot = jnp.sum(mom, axis=0)                       # (2, C) f32
    mean = tot[0] / count
    var = jnp.maximum(tot[1] / count - mean * mean, 0.0)
    scale = gamma * jax.lax.rsqrt(var + _EPS)
    shift = beta - mean * scale
    return scale[None, :], shift[None, :]


def _spatial_prep(x_nhwc, stride):
    """Zero-pad spatially by 1; for stride 2, decompose into the 4 spatial
    parity sub-images stacked along H so every 3x3 tap becomes a contiguous
    unit-stride slice inside the kernel (no strided VMEM access)."""
    n, h, w, c = x_nhwc.shape
    xp = jnp.pad(x_nhwc, ((0, 0), (1, 1), (1, 1), (0, 0)))
    if stride == 1:
        return xp, h + 2
    hp = _round_up(h + 2, 2)
    wp = _round_up(w + 2, 2)
    xp = jnp.pad(xp, ((0, 0), (0, hp - (h + 2)), (0, wp - (w + 2)), (0, 0)))
    subs = [xp[:, p::2, q::2, :] for p in (0, 1) for q in (0, 1)]
    return jnp.concatenate(subs, axis=1), hp // 2


# ----------------------------------------------------------------------------
# Parameters: PyTorch-layout init + kernel-layout preparation (hoisted)
# ----------------------------------------------------------------------------
def init_bottleneck(key, in_c, red_c, out_c, stride):
    has_sc = (stride != 1) or (in_c != 4 * red_c)
    ks = jax.random.split(key, 12)
    p = {
        "w1": 0.1 * jax.random.normal(ks[0], (red_c, in_c, 1, 1), jnp.float32),
        "g1": 1.0 + 0.1 * jax.random.normal(ks[1], (red_c,), jnp.float32),
        "b1": 0.1 * jax.random.normal(ks[2], (red_c,), jnp.float32),
        "w2": 0.1 * jax.random.normal(ks[3], (red_c, red_c, 3, 3), jnp.float32),
        "g2": 1.0 + 0.1 * jax.random.normal(ks[4], (red_c,), jnp.float32),
        "b2": 0.1 * jax.random.normal(ks[5], (red_c,), jnp.float32),
        "w3": 0.1 * jax.random.normal(ks[6], (out_c, red_c, 1, 1), jnp.float32),
        "g3": 1.0 + 0.1 * jax.random.normal(ks[7], (out_c,), jnp.float32),
        "b3": 0.1 * jax.random.normal(ks[8], (out_c,), jnp.float32),
    }
    if has_sc:
        p["ws"] = 0.1 * jax.random.normal(ks[9], (4 * red_c, in_c, 1, 1), jnp.float32)
        p["gs"] = 1.0 + 0.1 * jax.random.normal(ks[10], (4 * red_c,), jnp.float32)
        p["bs"] = 0.1 * jax.random.normal(ks[11], (4 * red_c,), jnp.float32)
    return p, has_sc


def prepare_params(params, has_shortcut, compute_dtype=jnp.float32):
    """Hoist weight transposes / channel padding / dtype casts out of the
    forward path.  Weights end up (K, Cout) lane-dense; BN params stay f32."""
    red_c, in_c = params["w1"].shape[:2]
    out_c = params["w3"].shape[0]
    cin_p = _round_up(in_c, _LANE)
    red_p = _round_up(red_c, _LANE)
    out_p = _round_up(out_c, _LANE)

    def pad2(a, r, c):
        return jnp.pad(a, ((0, r - a.shape[0]), (0, c - a.shape[1])))

    def pad1(a, n):
        return jnp.pad(a, (0, n - a.shape[0])).astype(jnp.float32)

    prep = {
        "w1": pad2(params["w1"].reshape(red_c, in_c).T, cin_p, red_p
                   ).astype(compute_dtype),
        "g1": pad1(params["g1"], red_p), "b1": pad1(params["b1"], red_p),
        "w2": jnp.pad(jnp.transpose(params["w2"], (2, 3, 1, 0)),
                      ((0, 0), (0, 0), (0, red_p - red_c), (0, red_p - red_c))
                      ).astype(compute_dtype),
        "g2": pad1(params["g2"], red_p), "b2": pad1(params["b2"], red_p),
        "w3": pad2(params["w3"].reshape(out_c, red_c).T, red_p, out_p
                   ).astype(compute_dtype),
        "g3": pad1(params["g3"], out_p), "b3": pad1(params["b3"], out_p),
    }
    if has_shortcut:
        sc = params["ws"].shape[0]
        prep["ws"] = pad2(params["ws"].reshape(sc, in_c).T, cin_p, out_p
                          ).astype(compute_dtype)
        prep["gs"] = pad1(params["gs"], out_p)
        prep["bs"] = pad1(params["bs"], out_p)
    return prep


# ----------------------------------------------------------------------------
# Forward
# ----------------------------------------------------------------------------
@functools.partial(jax.jit,
                   static_argnames=("stride", "has_shortcut", "out_c", "tile_m"))
def bottleneck_forward(prep, x_nchw, *, stride, has_shortcut, out_c, tile_m=256):
    """Bottleneck forward.  tile_m = pixel rows per grid step (multiple of 8);
    256 is a safe everywhere default (v5e: <=512; v6e: 512-1024; v7x: budget
    against 64 MiB physical / 32 MiB scoped VMEM)."""
    n, in_c, h, w = x_nchw.shape
    cin_p, red_p = prep["w1"].shape
    out_p = prep["w3"].shape[1]
    cdt = prep["w1"].dtype

    # NCHW -> NHWC; pad channels to multiples of 128 (padded channels carry
    # zero weights / gamma / beta so they stay exactly zero through the block).
    x = jnp.transpose(x_nchw, (0, 2, 3, 1)).astype(jnp.float32)
    x = jnp.pad(x, ((0, 0), (0, 0), (0, 0), (0, cin_p - in_c)))

    m1 = n * h * w
    m1p = _round_up(m1, tile_m)
    x2d = jnp.pad(x.reshape(m1, cin_p).astype(cdt), ((0, m1p - m1), (0, 0)))

    # ---- conv1: 1x1 + BN + ReLU (two-pass, M-tiled) ----
    y1, mom1 = _matmul_moments(x2d, prep["w1"], tile_m)
    s1, b1 = _finalize_bn(mom1, m1, prep["g1"], prep["b1"])
    h1 = _bn_act(y1, s1, b1, tile_m, relu=True, out_dtype=cdt)

    # ---- conv2: 3x3 (stride) + BN + ReLU, in-kernel shifted matmuls ----
    ho = (h + 2 - 3) // stride + 1
    wo = (w + 2 - 3) // stride + 1
    xq, hq = _spatial_prep(h1[:m1].reshape(n, h, w, red_p), stride)
    y2, mom2 = _conv3x3_moments(xq, prep["w2"], stride, ho, wo, hq)
    m2 = n * ho * wo
    m2p = _round_up(m2, tile_m)
    s2, b2 = _finalize_bn(mom2, m2, prep["g2"], prep["b2"])
    y2f = jnp.pad(y2.reshape(m2, red_p), ((0, m2p - m2), (0, 0)))
    h2 = _bn_act(y2f, s2, b2, tile_m, relu=True, out_dtype=cdt,
                 valid_rows=m2 if m2 != m2p else None)

    # ---- conv3 pass 1 ----
    y3, mom3 = _matmul_moments(h2, prep["w3"], tile_m)
    s3, b3 = _finalize_bn(mom3, m2, prep["g3"], prep["b3"])

    # ---- shortcut branch ----
    if has_shortcut:
        # TODO(synk): express the stride-s spatial subsample through the
        # conv3-pass-2 BlockSpec index_map instead of this wrapper slice.
        xs = x[:, ::stride, ::stride, :].reshape(m2, cin_p).astype(cdt)
        xs = jnp.pad(xs, ((0, m2p - m2), (0, 0)))
        ys, moms = _matmul_moments(xs, prep["ws"], tile_m)
        ss, bs = _finalize_bn(moms, m2, prep["gs"], prep["bs"])
        res = ys
    else:
        res = x2d                                   # identity (m1p == m2p here)
        ss = jnp.ones((1, out_p), jnp.float32)
        bs = jnp.zeros((1, out_p), jnp.float32)

    # ---- conv3 BN + shortcut BN + residual add + final ReLU (fused pass 2) --
    out2d = _bn_add_relu(y3, res, s3, b3, ss, bs, tile_m, jnp.float32)
    out = out2d[:m2, :out_c].reshape(n, ho, wo, out_c)
    return jnp.transpose(out, (0, 3, 1, 2))         # back to NCHW


# ----------------------------------------------------------------------------
# Pure-JAX reference (sanity check)
# ----------------------------------------------------------------------------
def _ref_bn(y, g, b):
    m = y.mean(axis=(0, 2, 3), keepdims=True)
    v = ((y - m) ** 2).mean(axis=(0, 2, 3), keepdims=True)
    return g.reshape(1, -1, 1, 1) * (y - m) / jnp.sqrt(v + _EPS) + b.reshape(1, -1, 1, 1)


def _ref_conv(x, w, stride, pad):
    return jax.lax.conv_general_dilated(
        x, w, (stride, stride), [(pad, pad), (pad, pad)],
        dimension_numbers=("NCHW", "OIHW", "NCHW"))


def bottleneck_reference(params, x, stride, has_shortcut):
    h = jax.nn.relu(_ref_bn(_ref_conv(x, params["w1"], 1, 0), params["g1"], params["b1"]))
    h = jax.nn.relu(_ref_bn(_ref_conv(h, params["w2"], stride, 1), params["g2"], params["b2"]))
    h = _ref_bn(_ref_conv(h, params["w3"], 1, 0), params["g3"], params["b3"])
    if has_shortcut:
        s = _ref_bn(_ref_conv(x, params["ws"], stride, 0), params["gs"], params["bs"])
    else:
        s = x
    return jax.nn.relu(h + s)


# ----------------------------------------------------------------------------
if __name__ == "__main__":
    key = jax.random.PRNGKey(0)
    k_x1, k_x2, k_p1, k_p2 = jax.random.split(key, 4)

    # Case 1: projection shortcut (stride=2, in_c != 4*red_c), f32 compute.
    in_c, red_c, out_c, stride = 8, 4, 16, 2
    x1 = jax.random.normal(k_x1, (2, in_c, 16, 16), jnp.float32)
    p1, sc1 = init_bottleneck(k_p1, in_c, red_c, out_c, stride)
    prep1 = prepare_params(p1, sc1, compute_dtype=jnp.float32)
    y1 = bottleneck_forward(prep1, x1, stride=stride, has_shortcut=sc1,
                            out_c=out_c, tile_m=256)
    jax.block_until_ready(y1)
    r1 = bottleneck_reference(p1, x1, stride, sc1)
    np.testing.assert_allclose(np.asarray(y1), np.asarray(r1), atol=1e-4, rtol=1e-4)

    # Case 2: identity shortcut (stride=1, in_c == 4*red_c), f32 compute.
    in_c, red_c, out_c, stride = 16, 4, 16, 1
    x2 = jax.random.normal(k_x2, (2, in_c, 16, 16), jnp.float32)
    p2, sc2 = init_bottleneck(k_p2, in_c, red_c, out_c, stride)
    prep2 = prepare_params(p2, sc2, compute_dtype=jnp.float32)
    y2 = bottleneck_forward(prep2, x2, stride=stride, has_shortcut=sc2,
                            out_c=out_c, tile_m=256)
    jax.block_until_ready(y2)
    r2 = bottleneck_reference(p2, x2, stride, sc2)
    np.testing.assert_allclose(np.asarray(y2), np.asarray(r2), atol=1e-4, rtol=1e-4)

    # Case 3: bf16 matmuls (MXU-native path), f32 BN/residual math.
    prep1_bf16 = prepare_params(p1, sc1, compute_dtype=jnp.bfloat16)
    y3 = bottleneck_forward(prep1_bf16, x1, stride=2, has_shortcut=sc1,
                            out_c=16, tile_m=256)
    jax.block_until_ready(y3)
    np.testing.assert_allclose(np.asarray(y3), np.asarray(r1), atol=1e-1, rtol=1e-1)

    print("KERNEL_OK")
</pallas_src>

<mosaic_0001>
module attributes {stable_mosaic.version = 11 : i64} {
  func.func @_mm_moments_kernel(%arg0: i32, %arg1: memref<256x128xf32, #tpu.memory_space<vmem>>, %arg2: memref<128x128xf32, #tpu.memory_space<vmem>>, %arg3: memref<256x128xf32, #tpu.memory_space<vmem>>, %arg4: memref<1x2x128xf32, #tpu.memory_space<vmem>>) attributes {dimension_semantics = [#tpu.dimension_semantics<parallel>], iteration_bounds = array<i64: 2>, scalar_prefetch = 0 : i64, scratch_operands = 0 : i64, tpu.core_type = #tpu.core_type<tc>, window_params = [{transform_indices = @transform_0, window_bounds = array<i64: 256, 128>}, {pipeline_mode = #tpu.pipeline_mode<synchronous>, transform_indices = @transform_1, window_bounds = array<i64: 128, 128>}, {transform_indices = @transform_2, window_bounds = array<i64: 256, 128>}, {transform_indices = @transform_3, window_bounds = array<i64: 1, 2, 128>}]} {
    %c0 = arith.constant 0 : index
    %c0_0 = arith.constant 0 : index
    %0 = vector.load %arg1[%c0, %c0_0] : memref<256x128xf32, #tpu.memory_space<vmem>>, vector<256x128xf32>
    %c0_1 = arith.constant 0 : index
    %c0_2 = arith.constant 0 : index
    %1 = vector.load %arg2[%c0_1, %c0_2] : memref<128x128xf32, #tpu.memory_space<vmem>>, vector<128x128xf32>
    %cst = arith.constant dense<0.000000e+00> : vector<256x128xf32>
    %2 = tpu.matmul %0, %1, %cst {dimension_numbers = #tpu.dot_dimension_numbers<[1], [0], [0], [1], [0, 0, 1, 1], [], []>} : vector<256x128xf32>, vector<128x128xf32>, vector<256x128xf32> -> vector<256x128xf32>
    %c0_3 = arith.constant 0 : index
    %c0_4 = arith.constant 0 : index
    %3 = vector.load %arg3[%c0_3, %c0_4] : memref<256x128xf32, #tpu.memory_space<vmem>>, vector<256x128xf32>
    tpu.vector_store %arg3[%c0_3, %c0_4], %2 {strides = array<i32>} : memref<256x128xf32, #tpu.memory_space<vmem>>, vector<256x128xf32>,
    %cst_5 = arith.constant dense<0.000000e+00> : vector<128xf32>
    %4 = vector.multi_reduction <add>, %2, %cst_5 [0] : vector<256x128xf32> to vector<128xf32>
    %5 = vector.shape_cast %4 : vector<128xf32> to vector<1x128xf32>
    %c0_6 = arith.constant 0 : index
    %c0_7 = arith.constant 0 : index
    %c0_8 = arith.constant 0 : index
    %6 = vector.load %arg4[%c0_6, %c0_7, %c0_8] : memref<1x2x128xf32, #tpu.memory_space<vmem>>, vector<1x1x128xf32>
    %7 = vector.shape_cast %6 : vector<1x1x128xf32> to vector<1x128xf32>
    %8 = vector.shape_cast %5 : vector<1x128xf32> to vector<1x1x128xf32>
    tpu.vector_store %arg4[%c0_6, %c0_7, %c0_8], %8 {strides = array<i32>} : memref<1x2x128xf32, #tpu.memory_space<vmem>>, vector<1x1x128xf32>,
    %9 = arith.mulf %2, %2 : vector<256x128xf32>
    %cst_9 = arith.constant dense<0.000000e+00> : vector<128xf32>
    %10 = vector.multi_reduction <add>, %9, %cst_9 [0] : vector<256x128xf32> to vector<128xf32>
    %11 = vector.shape_cast %10 : vector<128xf32> to vector<1x128xf32>
    %c0_10 = arith.constant 0 : index
    %c1 = arith.constant 1 : index
    %c0_11 = arith.constant 0 : index
    %12 = vector.load %arg4[%c0_10, %c1, %c0_11] : memref<1x2x128xf32, #tpu.memory_space<vmem>>, vector<1x1x128xf32>
    %13 = vector.shape_cast %12 : vector<1x1x128xf32> to vector<1x128xf32>
    %14 = vector.shape_cast %11 : vector<1x128xf32> to vector<1x1x128xf32>
    tpu.vector_store %arg4[%c0_10, %c1, %c0_11], %14 {strides = array<i32>} : memref<1x2x128xf32, #tpu.memory_space<vmem>>, vector<1x1x128xf32>,
    return
  }
  func.func @transform_0(%arg0: i32) -> (i32, i32) {
    %c0_i32 = arith.constant 0 : i32
    %c0_i32_0 = arith.constant 0 : i32
    return %arg0, %c0_i32 : i32, i32
  }
  func.func @transform_1(%arg0: i32) -> (i32, i32) {
    %c0_i32 = arith.constant 0 : i32
    %c0_i32_0 = arith.constant 0 : i32
    %c0_i32_1 = arith.constant 0 : i32
    return %c0_i32, %c0_i32_0 : i32, i32
  }
  func.func @transform_2(%arg0: i32) -> (i32, i32) {
    %c0_i32 = arith.constant 0 : i32
    %c0_i32_0 = arith.constant 0 : i32
    return %arg0, %c0_i32 : i32, i32
  }
  func.func @transform_3(%arg0: i32) -> (i32, i32, i32) {
    %c0_i32 = arith.constant 0 : i32
    %c0_i32_0 = arith.constant 0 : i32
    %c0_i32_1 = arith.constant 0 : i32
    return %arg0, %c0_i32, %c0_i32_0 : i32, i32, i32
  }
}

module attributes {stable_mosaic.version = 11 : i64} {
  func.func @_bn_act_kernel(%arg0: i32, %arg1: memref<256x128xf32, #tpu.memory_space<vmem>>, %arg2: memref<1x128xf32, #tpu.memory_space<vmem>>, %arg3: memref<1x128xf32, #tpu.memory_space<vmem>>, %arg4: memref<256x128xf32, #tpu.memory_space<vmem>>) attributes {dimension_semantics = [#tpu.dimension_semantics<parallel>], iteration_bounds = array<i64: 2>, scalar_prefetch = 0 : i64, scratch_operands = 0 : i64, tpu.core_type = #tpu.core_type<tc>, window_params = [{transform_indices = @transform_0, window_bounds = array<i64: 256, 128>}, {pipeline_mode = #tpu.pipeline_mode<synchronous>, transform_indices = @transform_1, window_bounds = array<i64: 1, 128>}, {pipeline_mode = #tpu.pipeline_mode<synchronous>, transform_indices = @transform_2, window_bounds = array<i64: 1, 128>}, {transform_indices = @transform_3, window_bounds = array<i64: 256, 128>}]} {
    %c0 = arith.constant 0 : index
    %c0_0 = arith.constant 0 : index
    %0 = vector.load %arg1[%c0, %c0_0] : memref<256x128xf32, #tpu.memory_space<vmem>>, vector<256x128xf32>
    %c0_1 = arith.constant 0 : index
    %c0_2 = arith.constant 0 : index
    %1 = vector.load %arg2[%c0_1, %c0_2] : memref<1x128xf32, #tpu.memory_space<vmem>>, vector<1x128xf32>
    %2 = vector.broadcast %1 : vector<1x128xf32> to vector<256x128xf32>
    %3 = arith.mulf %0, %2 : vector<256x128xf32>
    %c0_3 = arith.constant 0 : index
    %c0_4 = arith.constant 0 : index
    %4 = vector.load %arg3[%c0_3, %c0_4] : memref<1x128xf32, #tpu.memory_space<vmem>>, vector<1x128xf32>
    %5 = vector.broadcast %4 : vector<1x128xf32> to vector<256x128xf32>
    %6 = arith.addf %3, %5 : vector<256x128xf32>
    %cst = arith.constant 0.000000e+00 : f32
    %7 = vector.broadcast %cst : f32 to vector<256x128xf32>
    %8 = arith.maximumf %6, %7 : vector<256x128xf32>
    %c0_5 = arith.constant 0 : index
    %c0_6 = arith.constant 0 : index
    %9 = vector.load %arg4[%c0_5, %c0_6] : memref<256x128xf32, #tpu.memory_space<vmem>>, vector<256x128xf32>
    tpu.vector_store %arg4[%c0_5, %c0_6], %8 {strides = array<i32>} : memref<256x128xf32, #tpu.memory_space<vmem>>, vector<256x128xf32>,
    return
  }
  func.func @transform_0(%arg0: i32) -> (i32, i32) {
    %c0_i32 = arith.constant 0 : i32
    %c0_i32_0 = arith.constant 0 : i32
    return %arg0, %c0_i32 : i32, i32
  }
  func.func @transform_1(%arg0: i32) -> (i32, i32) {
    %c0_i32 = arith.constant 0 : i32
    %c0_i32_0 = arith.constant 0 : i32
    %c0_i32_1 = arith.constant 0 : i32
    return %c0_i32, %c0_i32_0 : i32, i32
  }
  func.func @transform_2(%arg0: i32) -> (i32, i32) {
    %c0_i32 = arith.constant 0 : i32
    %c0_i32_0 = arith.constant 0 : i32
    %c0_i32_1 = arith.constant 0 : i32
    return %c0_i32, %c0_i32_0 : i32, i32
  }
  func.func @transform_3(%arg0: i32) -> (i32, i32) {
    %c0_i32 = arith.constant 0 : i32
    %c0_i32_0 = arith.constant 0 : i32
    return %arg0, %c0_i32 : i32, i32
  }
}

module attributes {stable_mosaic.version = 11 : i64} {
  func.func @_conv3x3_moments_kernel(%arg0: i32, %arg1: memref<1x36x9x128xf32, #tpu.memory_space<vmem>>, %arg2: memref<3x3x128x128xf32, #tpu.memory_space<vmem>>, %arg3: memref<1x8x8x128xf32, #tpu.memory_space<vmem>>, %arg4: memref<1x2x128xf32, #tpu.memory_space<vmem>>) attributes {dimension_semantics = [#tpu.dimension_semantics<parallel>], iteration_bounds = array<i64: 2>, scalar_prefetch = 0 : i64, scratch_operands = 0 : i64, tpu.core_type = #tpu.core_type<tc>, window_params = [{transform_indices = @transform_0, window_bounds = array<i64: 1, 36, 9, 128>}, {pipeline_mode = #tpu.pipeline_mode<synchronous>, transform_indices = @transform_1, window_bounds = array<i64: 3, 3, 128, 128>}, {transform_indices = @transform_2, window_bounds = array<i64: 1, 8, 8, 128>}, {transform_indices = @transform_3, window_bounds = array<i64: 1, 2, 128>}]} {
    %cst = arith.constant 0.000000e+00 : f32
    %0 = vector.broadcast %cst : f32 to vector<64x128xf32>
    %c0 = arith.constant 0 : index
    %c0_0 = arith.constant 0 : index
    %c0_1 = arith.constant 0 : index
    %c0_2 = arith.constant 0 : index
    %1 = vector.load %arg1[%c0, %c0_0, %c0_1, %c0_2] : memref<1x36x9x128xf32, #tpu.memory_space<vmem>>, vector<1x8x8x128xf32>
    %2 = vector.shape_cast %1 : vector<1x8x8x128xf32> to vector<8x8x128xf32>
    %3 = vector.shape_cast %2 : vector<8x8x128xf32> to vector<64x128xf32>
    %c0_3 = arith.constant 0 : index
    %c0_4 = arith.constant 0 : index
    %c0_5 = arith.constant 0 : index
    %c0_6 = arith.constant 0 : index
    %4 = vector.load %arg2[%c0_3, %c0_4, %c0_5, %c0_6] : memref<3x3x128x128xf32, #tpu.memory_space<vmem>>, vector<1x1x128x128xf32>
    %5 = vector.shape_cast %4 : vector<1x1x128x128xf32> to vector<128x128xf32>
    %cst_7 = arith.constant dense<0.000000e+00> : vector<64x128xf32>
    %6 = tpu.matmul %3, %5, %cst_7 {dimension_numbers = #tpu.dot_dimension_numbers<[1], [0], [0], [1], [0, 0, 1, 1], [], []>} : vector<64x128xf32>, vector<128x128xf32>, vector<64x128xf32> -> vector<64x128xf32>
    %7 = arith.addf %0, %6 : vector<64x128xf32>
    %c0_8 = arith.constant 0 : index
    %c9 = arith.constant 9 : index
    %c0_9 = arith.constant 0 : index
    %c0_10 = arith.constant 0 : index
    %8 = vector.load %arg1[%c0_8, %c9, %c0_9, %c0_10] : memref<1x36x9x128xf32, #tpu.memory_space<vmem>>, vector<1x8x8x128xf32>
    %9 = vector.shape_cast %8 : vector<1x8x8x128xf32> to vector<8x8x128xf32>
    %10 = vector.shape_cast %9 : vector<8x8x128xf32> to vector<64x128xf32>
    %c0_11 = arith.constant 0 : index
    %c1 = arith.constant 1 : index
    %c0_12 = arith.constant 0 : index
    %c0_13 = arith.constant 0 : index
    %11 = vector.load %arg2[%c0_11, %c1, %c0_12, %c0_13] : memref<3x3x128x128xf32, #tpu.memory_space<vmem>>, vector<1x1x128x128xf32>
    %12 = vector.shape_cast %11 : vector<1x1x128x128xf32> to vector<128x128xf32>
    %cst_14 = arith.constant dense<0.000000e+00> : vector<64x128xf32>
    %13 = tpu.matmul %10, %12, %cst_14 {dimension_numbers = #tpu.dot_dimension_numbers<[1], [0], [0], [1], [0, 0, 1, 1], [], []>} : vector<64x128xf32>, vector<128x128xf32>, vector<64x128xf32> -> vector<64x128xf32>
    %14 = arith.addf %7, %13 : vector<64x128xf32>
    %c0_15 = arith.constant 0 : index
    %c0_16 = arith.constant 0 : index
    %c1_17 = arith.constant 1 : index
    %c0_18 = arith.constant 0 : index
    %15 = vector.load %arg1[%c0_15, %c0_16, %c1_17, %c0_18] : memref<1x36x9x128xf32, #tpu.memory_space<vmem>>, vector<1x8x8x128xf32>
    %16 = vector.shape_cast %15 : vector<1x8x8x128xf32> to vector<8x8x128xf32>
    %17 = vector.shape_cast %16 : vector<8x8x128xf32> to vector<64x128xf32>
    %c0_19 = arith.constant 0 : index
    %c2 = arith.constant 2 : index
    %c0_20 = arith.constant 0 : index
    %c0_21 = arith.constant 0 : index
    %18 = vector.load %arg2[%c0_19, %c2, %c0_20, %c0_21] : memref<3x3x128x128xf32, #tpu.memory_space<vmem>>, vector<1x1x128x128xf32>
    %19 = vector.shape_cast %18 : vector<1x1x128x128xf32> to vector<128x128xf32>
    %cst_22 = arith.constant dense<0.000000e+00> : vector<64x128xf32>
    %20 = tpu.matmul %17, %19, %cst_22 {dimension_numbers = #tpu.dot_dimension_numbers<[1], [0], [0], [1], [0, 0, 1, 1], [], []>} : vector<64x128xf32>, vector<128x128xf32>, vector<64x128xf32> -> vector<64x128xf32>
    %21 = arith.addf %14, %20 : vector<64x128xf32>
    %c0_23 = arith.constant 0 : index
    %c18 = arith.constant 18 : index
    %c0_24 = arith.constant 0 : index
    %c0_25 = arith.constant 0 : index
    %22 = vector.load %arg1[%c0_23, %c18, %c0_24, %c0_25] : memref<1x36x9x128xf32, #tpu.memory_space<vmem>>, vector<1x8x8x128xf32>
    %23 = vector.shape_cast %22 : vector<1x8x8x128xf32> to vector<8x8x128xf32>
    %24 = vector.shape_cast %23 : vector<8x8x128xf32> to vector<64x128xf32>
    %c1_26 = arith.constant 1 : index
    %c0_27 = arith.constant 0 : index
    %c0_28 = arith.constant 0 : index
    %c0_29 = arith.constant 0 : index
    %25 = vector.load %arg2[%c1_26, %c0_27, %c0_28, %c0_29] : memref<3x3x128x128xf32, #tpu.memory_space<vmem>>, vector<1x1x128x128xf32>
    %26 = vector.shape_cast %25 : vector<1x1x128x128xf32> to vector<128x128xf32>
    %cst_30 = arith.constant dense<0.000000e+00> : vector<64x128xf32>
    %27 = tpu.matmul %24, %26, %cst_30 {dimension_numbers = #tpu.dot_dimension_numbers<[1], [0], [0], [1], [0, 0, 1, 1], [], []>} : vector<64x128xf32>, vector<128x128xf32>, vector<64x128xf32> -> vector<64x128xf32>
    %28 = arith.addf %21, %27 : vector<64x128xf32>
    %c0_31 = arith.constant 0 : index
    %c27 = arith.constant 27 : index
    %c0_32 = arith.constant 0 : index
    %c0_33 = arith.constant 0 : index
    %29 = vector.load %arg1[%c0_31, %c27, %c0_32, %c0_33] : memref<1x36x9x128xf32, #tpu.memory_space<vmem>>, vector<1x8x8x128xf32>
    %30 = vector.shape_cast %29 : vector<1x8x8x128xf32> to vector<8x8x128xf32>
    %31 = vector.shape_cast %30 : vector<8x8x128xf32> to vector<64x128xf32>
    %c1_34 = arith.constant 1 : index
    %c1_35 = arith.constant 1 : index
    %c0_36 = arith.constant 0 : index
    %c0_37 = arith.constant 0 : index
    %32 = vector.load %arg2[%c1_34, %c1_35, %c0_36, %c0_37] : memref<3x3x128x128xf32, #tpu.memory_space<vmem>>, vector<1x1x128x128xf32>
    %33 = vector.shape_cast %32 : vector<1x1x128x128xf32> to vector<128x128xf32>
    %cst_38 = arith.constant dense<0.000000e+00> : vector<64x128xf32>
    %34 = tpu.matmul %31, %33, %cst_38 {dimension_numbers = #tpu.dot_dimension_numbers<[1], [0], [0], [1], [0, 0, 1, 1], [], []>} : vector<64x128xf32>, vector<128x128xf32>, vector<64x128xf32> -> vector<64x128xf32>
    %35 = arith.addf %28, %34 : vector<64x128xf32>
    %c0_39 = arith.constant 0 : index
    %c18_40 = arith.constant 18 : index
    %c1_41 = arith.constant 1 : index
    %c0_42 = arith.constant 0 : index
    %36 = vector.load %arg1[%c0_39, %c18_40, %c1_41, %c0_42] : memref<1x36x9x128xf32, #tpu.memory_space<vmem>>, vector<1x8x8x128xf32>
    %37 = vector.shape_cast %36 : vector<1x8x8x128xf32> to vector<8x8x128xf32>
    %38 = vector.shape_cast %37 : vector<8x8x128xf32> to vector<64x128xf32>
    %c1_43 = arith.constant 1 : index
    %c2_44 = arith.constant 2 : index
    %c0_45 = arith.constant 0 : index
    %c0_46 = arith.constant 0 : index
    %39 = vector.load %arg2[%c1_43, %c2_44, %c0_45, %c0_46] : memref<3x3x128x128xf32, #tpu.memory_space<vmem>>, vector<1x1x128x128xf32>
    %40 = vector.shape_cast %39 : vector<1x1x128x128xf32> to vector<128x128xf32>
    %cst_47 = arith.constant dense<0.000000e+00> : vector<64x128xf32>
    %41 = tpu.matmul %38, %40, %cst_47 {dimension_numbers = #tpu.dot_dimension_numbers<[1], [0], [0], [1], [0, 0, 1, 1], [], []>} : vector<64x128xf32>, vector<128x128xf32>, vector<64x128xf32> -> vector<64x128xf32>
    %42 = arith.addf %35, %41 : vector<64x128xf32>
    %c0_48 = arith.constant 0 : index
    %c1_49 = arith.constant 1 : index
    %c0_50 = arith.constant 0 : index
    %c0_51 = arith.constant 0 : index
    %43 = vector.load %arg1[%c0_48, %c1_49, %c0_50, %c0_51] : memref<1x36x9x128xf32, #tpu.memory_space<vmem>>, vector<1x8x8x128xf32>
    %44 = vector.shape_cast %43 : vector<1x8x8x128xf32> to vector<8x8x128xf32>
    %45 = vector.shape_cast %44 : vector<8x8x128xf32> to vector<64x128xf32>
    %c2_52 = arith.constant 2 : index
    %c0_53 = arith.constant 0 : index
    %c0_54 = arith.constant 0 : index
    %c0_55 = arith.constant 0 : index
    %46 = vector.load %arg2[%c2_52, %c0_53, %c0_54, %c0_55] : memref<3x3x128x128xf32, #tpu.memory_space<vmem>>, vector<1x1x128x128xf32>
    %47 = vector.shape_cast %46 : vector<1x1x128x128xf32> to vector<128x128xf32>
    %cst_56 = arith.constant dense<0.000000e+00> : vector<64x128xf32>
    %48 = tpu.matmul %45, %47, %cst_56 {dimension_numbers = #tpu.dot_dimension_numbers<[1], [0], [0], [1], [0, 0, 1, 1], [], []>} : vector<64x128xf32>, vector<128x128xf32>, vector<64x128xf32> -> vector<64x128xf32>
    %49 = arith.addf %42, %48 : vector<64x128xf32>
    %c0_57 = arith.constant 0 : index
    %c10 = arith.constant 10 : index
    %c0_58 = arith.constant 0 : index
    %c0_59 = arith.constant 0 : index
    %50 = vector.load %arg1[%c0_57, %c10, %c0_58, %c0_59] : memref<1x36x9x128xf32, #tpu.memory_space<vmem>>, vector<1x8x8x128xf32>
    %51 = vector.shape_cast %50 : vector<1x8x8x128xf32> to vector<8x8x128xf32>
    %52 = vector.shape_cast %51 : vector<8x8x128xf32> to vector<64x128xf32>
    %c2_60 = arith.constant 2 : index
    %c1_61 = arith.constant 1 : index
    %c0_62 = arith.constant 0 : index
    %c0_63 = arith.constant 0 : index
    %53 = vector.load %arg2[%c2_60, %c1_61, %c0_62, %c0_63] : memref<3x3x128x128xf32, #tpu.memory_space<vmem>>, vector<1x1x128x128xf32>
    %54 = vector.shape_cast %53 : vector<1x1x128x128xf32> to vector<128x128xf32>
    %cst_64 = arith.constant dense<0.000000e+00> : vector<64x128xf32>
    %55 = tpu.matmul %52, %54, %cst_64 {dimension_numbers = #tpu.dot_dimension_numbers<[1], [0], [0], [1], [0, 0, 1, 1], [], []>} : vector<64x128xf32>, vector<128x128xf32>, vector<64x128xf32> -> vector<64x128xf32>
    %56 = arith.addf %49, %55 : vector<64x128xf32>
    %c0_65 = arith.constant 0 : index
    %c1_66 = arith.constant 1 : index
    %c1_67 = arith.constant 1 : index
    %c0_68 = arith.constant 0 : index
    %57 = vector.load %arg1[%c0_65, %c1_66, %c1_67, %c0_68] : memref<1x36x9x128xf32, #tpu.memory_space<vmem>>, vector<1x8x8x128xf32>
    %58 = vector.shape_cast %57 : vector<1x8x8x128xf32> to vector<8x8x128xf32>
    %59 = vector.shape_cast %58 : vector<8x8x128xf32> to vector<64x128xf32>
    %c2_69 = arith.constant 2 : index
    %c2_70 = arith.constant 2 : index
    %c0_71 = arith.constant 0 : index
    %c0_72 = arith.constant 0 : index
    %60 = vector.load %arg2[%c2_69, %c2_70, %c0_71, %c0_72] : memref<3x3x128x128xf32, #tpu.memory_space<vmem>>, vector<1x1x128x128xf32>
    %61 = vector.shape_cast %60 : vector<1x1x128x128xf32> to vector<128x128xf32>
    %cst_73 = arith.constant dense<0.000000e+00> : vector<64x128xf32>
    %62 = tpu.matmul %59, %61, %cst_73 {dimension_numbers = #tpu.dot_dimension_numbers<[1], [0], [0], [1], [0, 0, 1, 1], [], []>} : vector<64x128xf32>, vector<128x128xf32>, vector<64x128xf32> -> vector<64x128xf32>
    %63 = arith.addf %56, %62 : vector<64x128xf32>
    %64 = vector.shape_cast %63 : vector<64x128xf32> to vector<1x8x8x128xf32>
    %c0_74 = arith.constant 0 : index
    %c0_75 = arith.constant 0 : index
    %c0_76 = arith.constant 0 : index
    %c0_77 = arith.constant 0 : index
    %65 = vector.load %arg3[%c0_74, %c0_75, %c0_76, %c0_77] : memref<1x8x8x128xf32, #tpu.memory_space<vmem>>, vector<1x8x8x128xf32>
    tpu.vector_store %arg3[%c0_74, %c0_75, %c0_76, %c0_77], %64 {strides = array<i32>} : memref<1x8x8x128xf32, #tpu.memory_space<vmem>>, vector<1x8x8x128xf32>,
    %cst_78 = arith.constant dense<0.000000e+00> : vector<128xf32>
    %66 = vector.multi_reduction <add>, %63, %cst_78 [0] : vector<64x128xf32> to vector<128xf32>
    %67 = vector.shape_cast %66 : vector<128xf32> to vector<1x128xf32>
    %c0_79 = arith.constant 0 : index
    %c0_80 = arith.constant 0 : index
    %c0_81 = arith.constant 0 : index
    %68 = vector.load %arg4[%c0_79, %c0_80, %c0_81] : memref<1x2x128xf32, #tpu.memory_space<vmem>>, vector<1x1x128xf32>
    %69 = vector.shape_cast %68 : vector<1x1x128xf32> to vector<1x128xf32>
    %70 = vector.shape_cast %67 : vector<1x128xf32> to vector<1x1x128xf32>
    tpu.vector_store %arg4[%c0_79, %c0_80, %c0_81], %70 {strides = array<i32>} : memref<1x2x128xf32, #tpu.memory_space<vmem>>, vector<1x1x128xf32>,
    %71 = arith.mulf %63, %63 : vector<64x128xf32>
    %cst_82 = arith.constant dense<0.000000e+00> : vector<128xf32>
    %72 = vector.multi_reduction <add>, %71, %cst_82 [0] : vector<64x128xf32> to vector<128xf32>
    %73 = vector.shape_cast %72 : vector<128xf32> to vector<1x128xf32>
    %c0_83 = arith.constant 0 : index
    %c1_84 = arith.constant 1 : index
    %c0_85 = arith.constant 0 : index
    %74 = vector.load %arg4[%c0_83, %c1_84, %c0_85] : memref<1x2x128xf32, #tpu.memory_space<vmem>>, vector<1x1x128xf32>
    %75 = vector.shape_cast %74 : vector<1x1x128xf32> to vector<1x128xf32>
    %76 = vector.shape_cast %73 : vector<1x128xf32> to vector<1x1x128xf32>
    tpu.vector_store %arg4[%c0_83, %c1_84, %c0_85], %76 {strides = array<i32>} : memref<1x2x128xf32, #tpu.memory_space<vmem>>, vector<1x1x128xf32>,
    return
  }
  func.func @transform_0(%arg0: i32) -> (i32, i32, i32, i32) {
    %c0_i32 = arith.constant 0 : i32
    %c0_i32_0 = arith.constant 0 : i32
    %c0_i32_1 = arith.constant 0 : i32
    %c0_i32_2 = arith.constant 0 : i32
    return %arg0, %c0_i32, %c0_i32_0, %c0_i32_1 : i32, i32, i32, i32
  }
  func.func @transform_1(%arg0: i32) -> (i32, i32, i32, i32) {
    %c0_i32 = arith.constant 0 : i32
    %c0_i32_0 = arith.constant 0 : i32
    %c0_i32_1 = arith.constant 0 : i32
    %c0_i32_2 = arith.constant 0 : i32
    %c0_i32_3 = arith.constant 0 : i32
    return %c0_i32, %c0_i32_0, %c0_i32_1, %c0_i32_2 : i32, i32, i32, i32
  }
  func.func @transform_2(%arg0: i32) -> (i32, i32, i32, i32) {
    %c0_i32 = arith.constant 0 : i32
    %c0_i32_0 = arith.constant 0 : i32
    %c0_i32_1 = arith.constant 0 : i32
    %c0_i32_2 = arith.constant 0 : i32
    return %arg0, %c0_i32, %c0_i32_0, %c0_i32_1 : i32, i32, i32, i32
  }
  func.func @transform_3(%arg0: i32) -> (i32, i32, i32) {
    %c0_i32 = arith.constant 0 : i32
    %c0_i32_0 = arith.constant 0 : i32
    %c0_i32_1 = arith.constant 0 : i32
    return %arg0, %c0_i32, %c0_i32_0 : i32, i32, i32
  }
}

module attributes {stable_mosaic.version = 11 : i64} {
  func.func @_bn_act_kernel(%arg0: i32, %arg1: memref<256x128xf32, #tpu.memory_space<vmem>>, %arg2: memref<1x128xf32, #tpu.memory_space<vmem>>, %arg3: memref<1x128xf32, #tpu.memory_space<vmem>>, %arg4: memref<256x128xf32, #tpu.memory_space<vmem>>) attributes {dimension_semantics = [#tpu.dimension_semantics<parallel>], iteration_bounds = array<i64: 1>, scalar_prefetch = 0 : i64, scratch_operands = 0 : i64, tpu.core_type = #tpu.core_type<tc>, window_params = [{transform_indices = @transform_0, window_bounds = array<i64: 256, 128>}, {pipeline_mode = #tpu.pipeline_mode<synchronous>, transform_indices = @transform_1, window_bounds = array<i64: 1, 128>}, {pipeline_mode = #tpu.pipeline_mode<synchronous>, transform_indices = @transform_2, window_bounds = array<i64: 1, 128>}, {transform_indices = @transform_3, window_bounds = array<i64: 256, 128>}]} {
    %c0 = arith.constant 0 : index
    %c0_0 = arith.constant 0 : index
    %0 = vector.load %arg1[%c0, %c0_0] : memref<256x128xf32, #tpu.memory_space<vmem>>, vector<256x128xf32>
    %c0_1 = arith.constant 0 : index
    %c0_2 = arith.constant 0 : index
    %1 = vector.load %arg2[%c0_1, %c0_2] : memref<1x128xf32, #tpu.memory_space<vmem>>, vector<1x128xf32>
    %2 = vector.broadcast %1 : vector<1x128xf32> to vector<256x128xf32>
    %3 = arith.mulf %0, %2 : vector<256x128xf32>
    %c0_3 = arith.constant 0 : index
    %c0_4 = arith.constant 0 : index
    %4 = vector.load %arg3[%c0_3, %c0_4] : memref<1x128xf32, #tpu.memory_space<vmem>>, vector<1x128xf32>
    %5 = vector.broadcast %4 : vector<1x128xf32> to vector<256x128xf32>
    %6 = arith.addf %3, %5 : vector<256x128xf32>
    %cst = arith.constant 0.000000e+00 : f32
    %7 = vector.broadcast %cst : f32 to vector<256x128xf32>
    %8 = arith.maximumf %6, %7 : vector<256x128xf32>
    %c256_i32 = arith.constant 256 : i32
    %9 = arith.muli %arg0, %c256_i32 : i32
    %10 = tpu.iota {dimensions = array<i32: 0>} : vector<256x128xi32>
    %11 = vector.broadcast %9 : i32 to vector<256x128xi32>
    %12 = arith.addi %11, %10 : vector<256x128xi32>
    %c128_i32 = arith.constant 128 : i32
    %13 = vector.broadcast %c128_i32 : i32 to vector<256x128xi32>
    %14 = arith.cmpi slt, %12, %13 : vector<256x128xi32>
    %cst_5 = arith.constant 0.000000e+00 : f32
    %15 = vector.broadcast %cst_5 : f32 to vector<256x128xf32>
    %16 = arith.select %14, %8, %15 : vector<256x128xi1>, vector<256x128xf32>
    %c0_6 = arith.constant 0 : index
    %c0_7 = arith.constant 0 : index
    %17 = vector.load %arg4[%c0_6, %c0_7] : memref<256x128xf32, #tpu.memory_space<vmem>>, vector<256x128xf32>
    tpu.vector_store %arg4[%c0_6, %c0_7], %16 {strides = array<i32>} : memref<256x128xf32, #tpu.memory_space<vmem>>, vector<256x128xf32>,
    return
  }
  func.func @transform_0(%arg0: i32) -> (i32, i32) {
    %c0_i32 = arith.constant 0 : i32
    %c0_i32_0 = arith.constant 0 : i32
    return %arg0, %c0_i32 : i32, i32
  }
  func.func @transform_1(%arg0: i32) -> (i32, i32) {
    %c0_i32 = arith.constant 0 : i32
    %c0_i32_0 = arith.constant 0 : i32
    %c0_i32_1 = arith.constant 0 : i32
    return %c0_i32, %c0_i32_0 : i32, i32
  }
  func.func @transform_2(%arg0: i32) -> (i32, i32) {
    %c0_i32 = arith.constant 0 : i32
    %c0_i32_0 = arith.constant 0 : i32
    %c0_i32_1 = arith.constant 0 : i32
    return %c0_i32, %c0_i32_0 : i32, i32
  }
  func.func @transform_3(%arg0: i32) -> (i32, i32) {
    %c0_i32 = arith.constant 0 : i32
    %c0_i32_0 = arith.constant 0 : i32
    return %arg0, %c0_i32 : i32, i32
  }
}

module attributes {stable_mosaic.version = 11 : i64} {
  func.func @_mm_moments_kernel(%arg0: i32, %arg1: memref<256x128xf32, #tpu.memory_space<vmem>>, %arg2: memref<128x128xf32, #tpu.memory_space<vmem>>, %arg3: memref<256x128xf32, #tpu.memory_space<vmem>>, %arg4: memref<1x2x128xf32, #tpu.memory_space<vmem>>) attributes {dimension_semantics = [#tpu.dimension_semantics<parallel>], iteration_bounds = array<i64: 1>, scalar_prefetch = 0 : i64, scratch_operands = 0 : i64, tpu.core_type = #tpu.core_type<tc>, window_params = [{transform_indices = @transform_0, window_bounds = array<i64: 256, 128>}, {pipeline_mode = #tpu.pipeline_mode<synchronous>, transform_indices = @transform_1, window_bounds = array<i64: 128, 128>}, {transform_indices = @transform_2, window_bounds = array<i64: 256, 128>}, {transform_indices = @transform_3, window_bounds = array<i64: 1, 2, 128>}]} {
    %c0 = arith.constant 0 : index
    %c0_0 = arith.constant 0 : index
    %0 = vector.load %arg1[%c0, %c0_0] : memref<256x128xf32, #tpu.memory_space<vmem>>, vector<256x128xf32>
    %c0_1 = arith.constant 0 : index
    %c0_2 = arith.constant 0 : index
    %1 = vector.load %arg2[%c0_1, %c0_2] : memref<128x128xf32, #tpu.memory_space<vmem>>, vector<128x128xf32>
    %cst = arith.constant dense<0.000000e+00> : vector<256x128xf32>
    %2 = tpu.matmul %0, %1, %cst {dimension_numbers = #tpu.dot_dimension_numbers<[1], [0], [0], [1], [0, 0, 1, 1], [], []>} : vector<256x128xf32>, vector<128x128xf32>, vector<256x128xf32> -> vector<256x128xf32>
    %c0_3 = arith.constant 0 : index
    %c0_4 = arith.constant 0 : index
    %3 = vector.load %arg3[%c0_3, %c0_4] : memref<256x128xf32, #tpu.memory_space<vmem>>, vector<256x128xf32>
    tpu.vector_store %arg3[%c0_3, %c0_4], %2 {strides = array<i32>} : memref<256x128xf32, #tpu.memory_space<vmem>>, vector<256x128xf32>,
    %cst_5 = arith.constant dense<0.000000e+00> : vector<128xf32>
    %4 = vector.multi_reduction <add>, %2, %cst_5 [0] : vector<256x128xf32> to vector<128xf32>
    %5 = vector.shape_cast %4 : vector<128xf32> to vector<1x128xf32>
    %c0_6 = arith.constant 0 : index
    %c0_7 = arith.constant 0 : index
    %c0_8 = arith.constant 0 : index
    %6 = vector.load %arg4[%c0_6, %c0_7, %c0_8] : memref<1x2x128xf32, #tpu.memory_space<vmem>>, vector<1x1x128xf32>
    %7 = vector.shape_cast %6 : vector<1x1x128xf32> to vector<1x128xf32>
    %8 = vector.shape_cast %5 : vector<1x128xf32> to vector<1x1x128xf32>
    tpu.vector_store %arg4[%c0_6, %c0_7, %c0_8], %8 {strides = array<i32>} : memref<1x2x128xf32, #tpu.memory_space<vmem>>, vector<1x1x128xf32>,
    %9 = arith.mulf %2, %2 : vector<256x128xf32>
    %cst_9 = arith.constant dense<0.000000e+00> : vector<128xf32>
    %10 = vector.multi_reduction <add>, %9, %cst_9 [0] : vector<256x128xf32> to vector<128xf32>
    %11 = vector.shape_cast %10 : vector<128xf32> to vector<1x128xf32>
    %c0_10 = arith.constant 0 : index
    %c1 = arith.constant 1 : index
    %c0_11 = arith.constant 0 : index
    %12 = vector.load %arg4[%c0_10, %c1, %c0_11] : memref<1x2x128xf32, #tpu.memory_space<vmem>>, vector<1x1x128xf32>
    %13 = vector.shape_cast %12 : vector<1x1x128xf32> to vector<1x128xf32>
    %14 = vector.shape_cast %11 : vector<1x128xf32> to vector<1x1x128xf32>
    tpu.vector_store %arg4[%c0_10, %c1, %c0_11], %14 {strides = array<i32>} : memref<1x2x128xf32, #tpu.memory_space<vmem>>, vector<1x1x128xf32>,
    return
  }
  func.func @transform_0(%arg0: i32) -> (i32, i32) {
    %c0_i32 = arith.constant 0 : i32
    %c0_i32_0 = arith.constant 0 : i32
    return %arg0, %c0_i32 : i32, i32
  }
  func.func @transform_1(%arg0: i32) -> (i32, i32) {
    %c0_i32 = arith.constant 0 : i32
    %c0_i32_0 = arith.constant 0 : i32
    %c0_i32_1 = arith.constant 0 : i32
    return %c0_i32, %c0_i32_0 : i32, i32
  }
  func.func @transform_2(%arg0: i32) -> (i32, i32) {
    %c0_i32 = arith.constant 0 : i32
    %c0_i32_0 = arith.constant 0 : i32
    return %arg0, %c0_i32 : i32, i32
  }
  func.func @transform_3(%arg0: i32) -> (i32, i32, i32) {
    %c0_i32 = arith.constant 0 : i32
    %c0_i32_0 = arith.constant 0 : i32
    %c0_i32_1 = arith.constant 0 : i32
    return %arg0, %c0_i32, %c0_i32_0 : i32, i32, i32
  }
}

module attributes {stable_mosaic.version = 11 : i64} {
  func.func @_bn_add_relu_kernel(%arg0: i32, %arg1: memref<256x128xf32, #tpu.memory_space<vmem>>, %arg2: memref<256x128xf32, #tpu.memory_space<vmem>>, %arg3: memref<1x128xf32, #tpu.memory_space<vmem>>, %arg4: memref<1x128xf32, #tpu.memory_space<vmem>>, %arg5: memref<1x128xf32, #tpu.memory_space<vmem>>, %arg6: memref<1x128xf32, #tpu.memory_space<vmem>>, %arg7: memref<256x128xf32, #tpu.memory_space<vmem>>) attributes {dimension_semantics = [#tpu.dimension_semantics<parallel>], iteration_bounds = array<i64: 1>, scalar_prefetch = 0 : i64, scratch_operands = 0 : i64, tpu.core_type = #tpu.core_type<tc>, window_params = [{transform_indices = @transform_0, window_bounds = array<i64: 256, 128>}, {transform_indices = @transform_1, window_bounds = array<i64: 256, 128>}, {pipeline_mode = #tpu.pipeline_mode<synchronous>, transform_indices = @transform_2, window_bounds = array<i64: 1, 128>}, {pipeline_mode = #tpu.pipeline_mode<synchronous>, transform_indices = @transform_3, window_bounds = array<i64: 1, 128>}, {pipeline_mode = #tpu.pipeline_mode<synchronous>, transform_indices = @transform_4, window_bounds = array<i64: 1, 128>}, {pipeline_mode = #tpu.pipeline_mode<synchronous>, transform_indices = @transform_5, window_bounds = array<i64: 1, 128>}, {transform_indices = @transform_6, window_bounds = array<i64: 256, 128>}]} {
    %c0 = arith.constant 0 : index
    %c0_0 = arith.constant 0 : index
    %0 = vector.load %arg1[%c0, %c0_0] : memref<256x128xf32, #tpu.memory_space<vmem>>, vector<256x128xf32>
    %c0_1 = arith.constant 0 : index
    %c0_2 = arith.constant 0 : index
    %1 = vector.load %arg3[%c0_1, %c0_2] : memref<1x128xf32, #tpu.memory_space<vmem>>, vector<1x128xf32>
    %2 = vector.broadcast %1 : vector<1x128xf32> to vector<256x128xf32>
    %3 = arith.mulf %0, %2 : vector<256x128xf32>
    %c0_3 = arith.constant 0 : index
    %c0_4 = arith.constant 0 : index
    %4 = vector.load %arg4[%c0_3, %c0_4] : memref<1x128xf32, #tpu.memory_space<vmem>>, vector<1x128xf32>
    %5 = vector.broadcast %4 : vector<1x128xf32> to vector<256x128xf32>
    %6 = arith.addf %3, %5 : vector<256x128xf32>
    %c0_5 = arith.constant 0 : index
    %c0_6 = arith.constant 0 : index
    %7 = vector.load %arg2[%c0_5, %c0_6] : memref<256x128xf32, #tpu.memory_space<vmem>>, vector<256x128xf32>
    %c0_7 = arith.constant 0 : index
    %c0_8 = arith.constant 0 : index
    %8 = vector.load %arg5[%c0_7, %c0_8] : memref<1x128xf32, #tpu.memory_space<vmem>>, vector<1x128xf32>
    %9 = vector.broadcast %8 : vector<1x128xf32> to vector<256x128xf32>
    %10 = arith.mulf %7, %9 : vector<256x128xf32>
    %c0_9 = arith.constant 0 : index
    %c0_10 = arith.constant 0 : index
    %11 = vector.load %arg6[%c0_9, %c0_10] : memref<1x128xf32, #tpu.memory_space<vmem>>, vector<1x128xf32>
    %12 = vector.broadcast %11 : vector<1x128xf32> to vector<256x128xf32>
    %13 = arith.addf %10, %12 : vector<256x128xf32>
    %14 = arith.addf %6, %13 : vector<256x128xf32>
    %cst = arith.constant 0.000000e+00 : f32
    %15 = vector.broadcast %cst : f32 to vector<256x128xf32>
    %16 = arith.maximumf %14, %15 : vector<256x128xf32>
    %c0_11 = arith.constant 0 : index
    %c0_12 = arith.constant 0 : index
    %17 = vector.load %arg7[%c0_11, %c0_12] : memref<256x128xf32, #tpu.memory_space<vmem>>, vector<256x128xf32>
    tpu.vector_store %arg7[%c0_11, %c0_12], %16 {strides = array<i32>} : memref<256x128xf32, #tpu.memory_space<vmem>>, vector<256x128xf32>,
    return
  }
  func.func @transform_0(%arg0: i32) -> (i32, i32) {
    %c0_i32 = arith.constant 0 : i32
    %c0_i32_0 = arith.constant 0 : i32
    return %arg0, %c0_i32 : i32, i32
  }
  func.func @transform_1(%arg0: i32) -> (i32, i32) {
    %c0_i32 = arith.constant 0 : i32
    %c0_i32_0 = arith.constant 0 : i32
    return %arg0, %c0_i32 : i32, i32
  }
  func.func @transform_2(%arg0: i32) -> (i32, i32) {
    %c0_i32 = arith.constant 0 : i32
    %c0_i32_0 = arith.constant 0 : i32
    %c0_i32_1 = arith.constant 0 : i32
    return %c0_i32, %c0_i32_0 : i32, i32
  }
  func.func @transform_3(%arg0: i32) -> (i32, i32) {
    %c0_i32 = arith.constant 0 : i32
    %c0_i32_0 = arith.constant 0 : i32
    %c0_i32_1 = arith.constant 0 : i32
    return %c0_i32, %c0_i32_0 : i32, i32
  }
  func.func @transform_4(%arg0: i32) -> (i32, i32) {
    %c0_i32 = arith.constant 0 : i32
    %c0_i32_0 = arith.constant 0 : i32
    %c0_i32_1 = arith.constant 0 : i32
    return %c0_i32, %c0_i32_0 : i32, i32
  }
  func.func @transform_5(%arg0: i32) -> (i32, i32) {
    %c0_i32 = arith.constant 0 : i32
    %c0_i32_0 = arith.constant 0 : i32
    %c0_i32_1 = arith.constant 0 : i32
    return %c0_i32, %c0_i32_0 : i32, i32
  }
  func.func @transform_6(%arg0: i32) -> (i32, i32) {
    %c0_i32 = arith.constant 0 : i32
    %c0_i32_0 = arith.constant 0 : i32
    return %arg0, %c0_i32 : i32, i32
  }
}

</mosaic_0001>

<bundles_post_ra>
// kernel: bottleneck_forward.7
= control target key start
LH: loop header
LB: loop body
LE: loop exit
PB: predicated region body
PF: predicated region fallthrough
CT: control target
= control target key end

     0   :  { %s669_s12 = smov 0   ;;  %s925_s0 = inlined_call_operand.vmem [shape: f32[512,128], index: 0, kind: input, shape index: {}]   ;;  %s926_s1 = inlined_call_operand.vmem [shape: f32[128,128], index: 1, kind: input, shape index: {}]   ;;  %s927_s2 = inlined_call_operand.vmem [shape: f32[512,128], index: 2, kind: output, shape index: {0}]   ;;  %s928_s3 = inlined_call_operand.vmem [shape: f32[2,2,128], index: 3, kind: output, shape index: {1}]  }
   0x1 LB: > { %s675_s13 = sadd.s32 4294967295, %s647_s12   ;;  %p577_p0 = scmp.ge.s32.totalorder %s647_s12, 1  ;;  %s647_s12 = sphi %s669_s12, %s14_s12  }
   0x2   : > { %p141_p1 = scmp.lt.s32.totalorder %s647_s12, 3 }
   0x4   : > { %p142_p2 = pnand %p577_p0, %p141_p1 }
   0x5   : > { %s578_s30 = sshll.u32 (!%p142_p2), %s675_s13, 5  ;;  %p181_p4 = scmp.lt.s32.totalorder (!%p142_p2), %s675_s13, 1 }
   0x6   : > { %145 = sbr.rel (%p142_p2) target bundleno = 290 (0x122), region = 28  ;;  %p170_p3 = scmp.lt.s32.totalorder (!%p142_p2), %s578_s30, 63 }
   0xb   : > { %v232_v0 = vld [vmem:[%s926_s1 + $0x78] sm:$0xff]  ;;  %v231_v1 = vld [vmem:[%s926_s1 + $0x70] sm:$0xff]  ;;  %v230_v2 = vld [vmem:[%s926_s1 + $0x68] sm:$0xff]  ;;  %s930_s30 = smov (!%p170_p3, %s578_s30), 63  ;;  %s932_s13 = smov (!%p181_p4, %s675_s13), 1 }
   0xc   : > { %233 = vmatpush.msra.mxu0 %v232_v0  ;;  %585 = vmatpush.msra.mxu1 %v232_v0  ;;  %v229_v3 = vld [vmem:[%s926_s1 + $0x60] sm:$0xff]  ;;  %v228_v4 = vld [vmem:[%s926_s1 + $0x58] sm:$0xff]  ;;  %v227_v5 = vld [vmem:[%s926_s1 + $0x50] sm:$0xff]  ;;  %s579_s16 = sshll.u32 %s930_s30, 3  ;;  %s582_s29 = sshll.u32 %s932_s13, 1 }
   0xd   : > { %586 = vmatpush.msra.mxu2 %v232_v0  ;;  %587 = vmatpush.msra.mxu3 %v232_v0  ;;  %v226_v6 = vld [vmem:[%s926_s1 + $0x48] sm:$0xff]  ;;  %v225_v7 = vld [vmem:[%s926_s1 + $0x40] sm:$0xff]  ;;  %v224_v8 = vld [vmem:[%s926_s1 + $0x38] sm:$0xff]  ;;  %s733_s23 = scalar_lea.vmem %s925_s0, %s579_s16  ;;  %s775_s28 = scalar_lea.vmem %s927_s2, %s579_s16 }
   0xe   : > { %234 = vmatpush.msra.mxu0 %v231_v1  ;;  %588 = vmatpush.msra.mxu1 %v231_v1  ;;  %v223_v9 = vld [vmem:[%s926_s1 + $0x30] sm:$0xff]  ;;  %v222_v10 = vld [vmem:[%s926_s1 + $0x28] sm:$0xff]  ;;  %v221_v11 = vld [vmem:[%s926_s1 + $0x20] sm:$0xff]  ;;  %s184_s5 = scalar_lea.vmem %s928_s3, %s582_s29 }
   0xf   : > { %589 = vmatpush.msra.mxu2 %v231_v1  ;;  %590 = vmatpush.msra.mxu3 %v231_v1  ;;  %v220_v12 = vld [vmem:[%s926_s1 + $0x18] sm:$0xff]  ;;  %v219_v13 = vld [vmem:[%s926_s1 + $0x10] sm:$0xff]  ;;  %v218_v14 = vld [vmem:[%s926_s1 + $0x8] sm:$0xff] }
  0x10   : > { %235 = vmatpush.msra.mxu0 %v230_v2  ;;  %591 = vmatpush.msra.mxu1 %v230_v2  ;;  %v217_v15 = vld [vmem:[%s926_s1] sm:$0xff]  ;;  %v186_v19 = vld [vmem:[%s733_s23 + $0x8] sm:$0xff]  ;;  %v187_v23 = vld [vmem:[%s733_s23 + $0x10] sm:$0xff] }
  0x11   : > { %592 = vmatpush.msra.mxu2 %v230_v2  ;;  %593 = vmatpush.msra.mxu3 %v230_v2  ;;  %v185_v16 = vld [vmem:[%s733_s23] sm:$0xff]  ;;  %v194_v20 = vld [vmem:[%s733_s23 + $0x48] sm:$0xff]  ;;  %v195_v24 = vld [vmem:[%s733_s23 + $0x50] sm:$0xff] }
  0x12   : > { %236 = vmatpush.msra.mxu0 %v229_v3  ;;  %594 = vmatpush.msra.mxu1 %v229_v3  ;;  %v193_v17 = vld [vmem:[%s733_s23 + $0x40] sm:$0xff]  ;;  %v202_v21 = vld [vmem:[%s733_s23 + $0x88] sm:$0xff]  ;;  %v203_v25 = vld [vmem:[%s733_s23 + $0x90] sm:$0xff] }
  0x13   : > { %595 = vmatpush.msra.mxu2 %v229_v3  ;;  %596 = vmatpush.msra.mxu3 %v229_v3  ;;  %v201_v18 = vld [vmem:[%s733_s23 + $0x80] sm:$0xff]  ;;  %v210_v26 = vld [vmem:[%s733_s23 + $0xc8] sm:$0xff]  ;;  %v188_v27 = vld [vmem:[%s733_s23 + $0x18] sm:$0xff] }
  0x14   : > { %237 = vmatpush.msra.mxu0 %v228_v4  ;;  %597 = vmatpush.msra.mxu1 %v228_v4  ;;  %v209_v22 = vld [vmem:[%s733_s23 + $0xc0] sm:$0xff]  ;;  %v196_v28 = vld [vmem:[%s733_s23 + $0x58] sm:$0xff]  ;;  %v211_v30 = vld [vmem:[%s733_s23 + $0xd0] sm:$0xff] }
  0x15   : > { %598 = vmatpush.msra.mxu2 %v228_v4  ;;  %599 = vmatpush.msra.mxu3 %v228_v4  ;;  %v204_v29 = vld [vmem:[%s733_s23 + $0x98] sm:$0xff]  ;;  %v189_v31 = vld [vmem:[%s733_s23 + $0x20] sm:$0xff]  ;;  %v190_v35 = vld [vmem:[%s733_s23 + $0x28] sm:$0xff] }
  0x16   : > { %238 = vmatpush.msra.mxu0 %v227_v5  ;;  %600 = vmatpush.msra.mxu1 %v227_v5  ;;  %v197_v32 = vld [vmem:[%s733_s23 + $0x60] sm:$0xff]  ;;  %v212_v33 = vld [vmem:[%s733_s23 + $0xd8] sm:$0xff]  ;;  %v198_v36 = vld [vmem:[%s733_s23 + $0x68] sm:$0xff] }
  0x17   : > { %601 = vmatpush.msra.mxu2 %v227_v5  ;;  %602 = vmatpush.msra.mxu3 %v227_v5  ;;  %v205_v34 = vld [vmem:[%s733_s23 + $0xa0] sm:$0xff]  ;;  %v206_v38 = vld [vmem:[%s733_s23 + $0xa8] sm:$0xff]  ;;  %v191_v39 = vld [vmem:[%s733_s23 + $0x30] sm:$0xff] }
  0x18   : > { %239 = vmatpush.msra.mxu0 %v226_v6  ;;  %603 = vmatpush.msra.mxu1 %v226_v6  ;;  %v213_v37 = vld [vmem:[%s733_s23 + $0xe0] sm:$0xff]  ;;  %v199_v40 = vld [vmem:[%s733_s23 + $0x70] sm:$0xff]  ;;  %v214_v41 = vld [vmem:[%s733_s23 + $0xe8] sm:$0xff] }
  0x19   : > { %604 = vmatpush.msra.mxu2 %v226_v6  ;;  %605 = vmatpush.msra.mxu3 %v226_v6  ;;  %v207_v42 = vld [vmem:[%s733_s23 + $0xb0] sm:$0xff]  ;;  %v192_v43 = vld [vmem:[%s733_s23 + $0x38] sm:$0xff] }
  0x1a   : > { %240 = vmatpush.msra.mxu0 %v225_v7  ;;  %606 = vmatpush.msra.mxu1 %v225_v7  ;;  %v200_v44 = vld [vmem:[%s733_s23 + $0x78] sm:$0xff]  ;;  %v215_v45 = vld [vmem:[%s733_s23 + $0xf0] sm:$0xff] }
  0x1b   : > { %607 = vmatpush.msra.mxu2 %v225_v7  ;;  %608 = vmatpush.msra.mxu3 %v225_v7  ;;  %v208_v46 = vld [vmem:[%s733_s23 + $0xb8] sm:$0xff] }
  0x1c   : > { %241 = vmatpush.msra.mxu0 %v224_v8  ;;  %609 = vmatpush.msra.mxu1 %v224_v8  ;;  %v216_v47 = vld [vmem:[%s733_s23 + $0xf8] sm:$0xff] }
  0x1d   : > { %610 = vmatpush.msra.mxu2 %v224_v8  ;;  %611 = vmatpush.msra.mxu3 %v224_v8 }
  0x1e   : > { %242 = vmatpush.msra.mxu0 %v223_v9  ;;  %612 = vmatpush.msra.mxu1 %v223_v9 }
  0x1f   : > { %613 = vmatpush.msra.mxu2 %v223_v9  ;;  %614 = vmatpush.msra.mxu3 %v223_v9 }
  0x20   : > { %243 = vmatpush.msra.mxu0 %v222_v10  ;;  %615 = vmatpush.msra.mxu1 %v222_v10 }
  0x21   : > { %616 = vmatpush.msra.mxu2 %v222_v10  ;;  %617 = vmatpush.msra.mxu3 %v222_v10 }
  0x22   : > { %244 = vmatpush.msra.mxu0 %v221_v11  ;;  %618 = vmatpush.msra.mxu1 %v221_v11 }
  0x23   : > { %619 = vmatpush.msra.mxu2 %v221_v11  ;;  %620 = vmatpush.msra.mxu3 %v221_v11 }
  0x24   : > { %245 = vmatpush.msra.mxu0 %v220_v12  ;;  %621 = vmatpush.msra.mxu1 %v220_v12 }
  0x25   : > { %622 = vmatpush.msra.mxu2 %v220_v12  ;;  %623 = vmatpush.msra.mxu3 %v220_v12 }
  0x26   : > { %246 = vmatpush.msra.mxu0 %v219_v13  ;;  %624 = vmatpush.msra.mxu1 %v219_v13 }
  0x27   : > { %625 = vmatpush.msra.mxu2 %v219_v13  ;;  %626 = vmatpush.msra.mxu3 %v219_v13 }
  0x28   : > { %247 = vmatpush.msra.mxu0 %v218_v14  ;;  %627 = vmatpush.msra.mxu1 %v218_v14 }
  0x29   : > { %628 = vmatpush.msra.mxu2 %v218_v14  ;;  %629 = vmatpush.msra.mxu3 %v218_v14 }
  0x2a   : > { %248 = vmatpush.msra.mxu0 %v217_v15  ;;  %630 = vmatpush.msra.mxu1 %v217_v15 }
  0x2b   : > { %249 = vmatmul.f32.vlgmr.msra.gmra.mxu0 %v185_v16  ;;  %273 = vmatmul.f32.vlgmr.msra.gmra.mxu1 %v193_v17 }
  0x2c   : > { %631 = vmatpush.msra.mxu2 %v217_v15  ;;  %632 = vmatpush.msra.mxu3 %v217_v15 }
  0x2d   : > { %297 = vmatmul.f32.vlgmr.msra.gmra.mxu2 %v201_v18  ;;  %321 = vmatmul.f32.vlgmr.msra.gmra.mxu3 %v209_v22 }
  0x33   : > { %252 = vmatmul.f32.gmra.mxu0 %v186_v19  ;;  %276 = vmatmul.f32.gmra.mxu1 %v194_v20 }
  0x35   : > { %300 = vmatmul.f32.gmra.mxu2 %v202_v21  ;;  %324 = vmatmul.f32.gmra.mxu3 %v210_v26 }
  0x3b   : > { %255 = vmatmul.f32.gmra.mxu0 %v187_v23  ;;  %279 = vmatmul.f32.gmra.mxu1 %v195_v24 }
  0x3d   : > { %303 = vmatmul.f32.gmra.mxu2 %v203_v25  ;;  %327 = vmatmul.f32.gmra.mxu3 %v211_v30 }
  0x43   : > { %258 = vmatmul.f32.gmra.mxu0 %v188_v27  ;;  %282 = vmatmul.f32.gmra.mxu1 %v196_v28 }
  0x45   : > { %306 = vmatmul.f32.gmra.mxu2 %v204_v29  ;;  %330 = vmatmul.f32.gmra.mxu3 %v212_v33 }
  0x4b   : > { %261 = vmatmul.f32.gmra.mxu0 %v189_v31  ;;  %285 = vmatmul.f32.gmra.mxu1 %v197_v32 }
  0x4d   : > { %309 = vmatmul.f32.gmra.mxu2 %v205_v34  ;;  %333 = vmatmul.f32.gmra.mxu3 %v213_v37 }
  0x53   : > { %264 = vmatmul.f32.gmra.mxu0 %v190_v35  ;;  %288 = vmatmul.f32.gmra.mxu1 %v198_v36 }
  0x55   : > { %312 = vmatmul.f32.gmra.mxu2 %v206_v38  ;;  %336 = vmatmul.f32.gmra.mxu3 %v214_v41 }
  0x5b   : > { %267 = vmatmul.f32.gmra.mxu0 %v191_v39  ;;  %291 = vmatmul.f32.gmra.mxu1 %v199_v40 }
  0x5d   : > { %315 = vmatmul.f32.gmra.mxu2 %v207_v42  ;;  %339 = vmatmul.f32.gmra.mxu3 %v215_v45 }
  0x63   : > { %270 = vmatmul.f32.gmra.mxu0 %v192_v43  ;;  %294 = vmatmul.f32.gmra.mxu1 %v200_v44 }
  0x65   : > { %318 = vmatmul.f32.gmra.mxu2 %v208_v46  ;;  %342 = vmatmul.f32.gmra.mxu3 %v216_v47 }
  0xa8   : > { %v250_v48 = vpop.f32.mrf.mxu0  ;;  %v777_v49 = vpop.f32.mrf.mxu1 }
  0xa9   : > { %346 = vst [vmem:[%s775_s28] sm:$0xff] %v250_v48  ;;  %v416_v6 = vmul.f32 %v250_v48, %v250_v48  ;;  %v424_v34 = vmul.f32 %v777_v49, %v777_v49 }
  0xaa   : > { %354 = vst [vmem:[%s775_s28 + $0x40] sm:$0xff] %v777_v49 }
  0xb0   : > { %v253_v50 = vpop.f32.mrf.mxu0  ;;  %v782_v51 = vpop.f32.mrf.mxu1 }
  0xb1   : > { %347 = vst [vmem:[%s775_s28 + $0x8] sm:$0xff] %v253_v50  ;;  %v785_v52 = vpop.f32.mrf.mxu2  ;;  %v796_v56 = vpop.f32.mrf.mxu3  ;;  %v417_v5 = vmul.f32 %v253_v50, %v253_v50  ;;  %v378_v7 = vadd.f32 %v253_v50, %v250_v48  ;;  %v425_v37 = vmul.f32 %v782_v51, %v782_v51 }
  0xb2   : > { %355 = vst [vmem:[%s775_s28 + $0x48] sm:$0xff] %v782_v51 }
  0xb3   : > { %362 = vst [vmem:[%s775_s28 + $0x80] sm:$0xff] %v785_v52  ;;  %v448_v9 = vadd.f32 %v417_v5, %v416_v6 }
  0xb4   : > { %370 = vst [vmem:[%s775_s28 + $0xc0] sm:$0xff] %v796_v56 }
  0xb8   : > { %v256_v53 = vpop.f32.mrf.mxu0  ;;  %v791_v54 = vpop.f32.mrf.mxu1 }
  0xb9   : > { %348 = vst [vmem:[%s775_s28 + $0x10] sm:$0xff] %v256_v53  ;;  %v794_v55 = vpop.f32.mrf.mxu2  ;;  %v809_v60 = vpop.f32.mrf.mxu3  ;;  %v418_v8 = vmul.f32 %v256_v53, %v256_v53  ;;  %v379_v10 = vadd.f32 %v378_v7, %v256_v53  ;;  %v426_v40 = vmul.f32 %v791_v54, %v791_v54 }
  0xba   : > { %356 = vst [vmem:[%s775_s28 + $0x50] sm:$0xff] %v791_v54 }
  0xbb   : > { %363 = vst [vmem:[%s775_s28 + $0x88] sm:$0xff] %v794_v55  ;;  %v449_v14 = vadd.f32 %v448_v9, %v418_v8  ;;  %v432_v8 = vmul.f32 %v785_v52, %v785_v52 }
  0xbc   : > { %371 = vst [vmem:[%s775_s28 + $0xc8] sm:$0xff] %v809_v60 }
  0xc0   : > { %v259_v57 = vpop.f32.mrf.mxu0  ;;  %v804_v58 = vpop.f32.mrf.mxu1 }
  0xc1   : > { %349 = vst [vmem:[%s775_s28 + $0x18] sm:$0xff] %v259_v57  ;;  %v807_v59 = vpop.f32.mrf.mxu2  ;;  %v822_v0 = vpop.f32.mrf.mxu3  ;;  %v419_v11 = vmul.f32 %v259_v57, %v259_v57  ;;  %v380_v15 = vadd.f32 %v379_v10, %v259_v57  ;;  %v427_v43 = vmul.f32 %v804_v58, %v804_v58  ;;  %v433_v10 = vmul.f32 %v794_v55, %v794_v55 }
  0xc2   : > { %357 = vst [vmem:[%s775_s28 + $0x58] sm:$0xff] %v804_v58 }
  0xc3   : > { %364 = vst [vmem:[%s775_s28 + $0x90] sm:$0xff] %v807_v59  ;;  %v450_v19 = vadd.f32 %v449_v14, %v419_v11 }
  0xc4   : > { %372 = vst [vmem:[%s775_s28 + $0xd0] sm:$0xff] %v822_v0 }
  0xc8   : > { %v262_v61 = vpop.f32.mrf.mxu0  ;;  %v817_v62 = vpop.f32.mrf.mxu1 }
  0xc9   : > { %350 = vst [vmem:[%s775_s28 + $0x20] sm:$0xff] %v262_v61  ;;  %v820_v63 = vpop.f32.mrf.mxu2  ;;  %v835_v4 = vpop.f32.mrf.mxu3  ;;  %v420_v16 = vmul.f32 %v262_v61, %v262_v61  ;;  %v381_v20 = vadd.f32 %v380_v15, %v262_v61  ;;  %v428_v48 = vmul.f32 %v817_v62, %v817_v62 }
  0xca   : > { %358 = vst [vmem:[%s775_s28 + $0x60] sm:$0xff] %v817_v62  ;;  %v435_v15 = vmul.f32 %v820_v63, %v820_v63 }
  0xcb   : > { %365 = vst [vmem:[%s775_s28 + $0x98] sm:$0xff] %v820_v63  ;;  %v451_v22 = vadd.f32 %v450_v19, %v420_v16 }
  0xcc   : > { %373 = vst [vmem:[%s775_s28 + $0xd8] sm:$0xff] %v835_v4 }
  0xd0   : > { %v265_v1 = vpop.f32.mrf.mxu0  ;;  %v830_v2 = vpop.f32.mrf.mxu1 }
  0xd1   : > { %351 = vst [vmem:[%s775_s28 + $0x28] sm:$0xff] %v265_v1  ;;  %v833_v3 = vpop.f32.mrf.mxu2  ;;  %v846_v18 = vpop.f32.mrf.mxu3  ;;  %v421_v21 = vmul.f32 %v265_v1, %v265_v1  ;;  %v382_v23 = vadd.f32 %v381_v20, %v265_v1  ;;  %v429_v53 = vmul.f32 %v830_v2, %v830_v2 }
  0xd2   : > { %359 = vst [vmem:[%s775_s28 + $0x68] sm:$0xff] %v830_v2 }
  0xd3   : > { %366 = vst [vmem:[%s775_s28 + $0xa0] sm:$0xff] %v833_v3  ;;  %v452_v25 = vadd.f32 %v451_v22, %v421_v21 }
  0xd4   : > { %374 = vst [vmem:[%s775_s28 + $0xe0] sm:$0xff] %v846_v18 }
  0xd8   : > { %v268_v12 = vpop.f32.mrf.mxu0  ;;  %v292_v13 = vpop.f32.mrf.mxu1 }
  0xd9   : > { %352 = vst [vmem:[%s775_s28 + $0x30] sm:$0xff] %v268_v12  ;;  %v844_v17 = vpop.f32.mrf.mxu2  ;;  %v422_v24 = vmul.f32 %v268_v12, %v268_v12  ;;  %v383_v26 = vadd.f32 %v382_v23, %v268_v12  ;;  %v854_v33 = vpop.f32.mrf.mxu3  ;;  %v434_v12 = vmul.f32 %v807_v59, %v807_v59 }
  0xda   : > { %360 = vst [vmem:[%s775_s28 + $0x70] sm:$0xff] %v292_v13  ;;  %v437_v22 = vmul.f32 %v844_v17, %v844_v17 }
  0xdb   : > { %367 = vst [vmem:[%s775_s28 + $0xa8] sm:$0xff] %v844_v17  ;;  %v453_v29 = vadd.f32 %v452_v25, %v422_v24 }
  0xdc   : > { %375 = vst [vmem:[%s775_s28 + $0xe8] sm:$0xff] %v854_v33 }
  0xe0   : > { %v271_v27 = vpop.f32.mrf.mxu0  ;;  %v295_v28 = vpop.f32.mrf.mxu1 }
  0xe1   : > { %353 = vst [vmem:[%s775_s28 + $0x38] sm:$0xff] %v271_v27  ;;  %v384_v30 = vadd.f32 %v383_v26, %v271_v27  ;;  %v423_v31 = vmul.f32 %v271_v27, %v271_v27  ;;  %v316_v32 = vpop.f32.mrf.mxu2  ;;  %v340_v47 = vpop.f32.mrf.mxu3  ;;  %v431_v1 = vmul.f32 %v295_v28, %v295_v28 }
  0xe2   : > { %361 = vst [vmem:[%s775_s28 + $0x78] sm:$0xff] %v295_v28  ;;  %v438_v25 = vmul.f32 %v316_v32, %v316_v32 }
  0xe3   : > { %v385_v35 = vadd.f32 %v384_v30, %v777_v49  ;;  %v454_v36 = vadd.f32 %v453_v29, %v423_v31  ;;  %368 = vst [vmem:[%s775_s28 + $0xb0] sm:$0xff] %v316_v32 }
  0xe4   : > { %376 = vst [vmem:[%s775_s28 + $0xf0] sm:$0xff] %v340_v47 }
  0xe5   : > { %v386_v38 = vadd.f32 %v385_v35, %v782_v51  ;;  %v455_v39 = vadd.f32 %v454_v36, %v424_v34  ;;  %v443_v36 = vmul.f32 %v835_v4, %v835_v4 }
  0xe7   : > { %v387_v41 = vadd.f32 %v386_v38, %v791_v54  ;;  %v456_v42 = vadd.f32 %v455_v39, %v425_v37  ;;  %v444_v38 = vmul.f32 %v846_v18, %v846_v18 }
  0xe9   : > { %v457_v44 = vadd.f32 %v456_v42, %v426_v40  ;;  %v388_v45 = vadd.f32 %v387_v41, %v804_v58  ;;  %v319_v46 = vpop.f32.mrf.mxu2  ;;  %v430_v58 = vmul.f32 %v292_v13, %v292_v13  ;;  %v343_v7 = vpop.f32.mrf.mxu3 }
  0xea   : > { %369 = vst [vmem:[%s775_s28 + $0xb8] sm:$0xff] %v319_v46  ;;  %v439_v26 = vmul.f32 %v319_v46, %v319_v46 }
  0xeb   : > { %v389_v49 = vadd.f32 %v388_v45, %v817_v62  ;;  %v458_v50 = vadd.f32 %v457_v44, %v427_v43  ;;  %377 = vst [vmem:[%s775_s28 + $0xf8] sm:$0xff] %v343_v7  ;;  %v446_v44 = vmul.f32 %v340_v47, %v340_v47  ;;  %v447_v45 = vmul.f32 %v343_v7, %v343_v7 }
  0xed   : > { %v390_v51 = vadd.f32 %v389_v49, %v830_v2  ;;  %v459_v54 = vadd.f32 %v458_v50, %v428_v48 }
  0xef   : > { %v460_v57 = vadd.f32 %v459_v54, %v429_v53  ;;  %v391_v61 = vadd.f32 %v390_v51, %v292_v13 }
  0xf1   : > { %v461_v5 = vadd.f32 %v460_v57, %v430_v58  ;;  %v392_v6 = vadd.f32 %v391_v61, %v295_v28 }
  0xf3   : > { %v393_v62 = vadd.f32 %v392_v6, %v785_v52  ;;  %v462_v9 = vadd.f32 %v461_v5, %v431_v1  ;;  %v436_v52 = vmul.f32 %v833_v3, %v833_v3 }
  0xf5   : > { %v394_v2 = vadd.f32 %v393_v62, %v794_v55  ;;  %v463_v11 = vadd.f32 %v462_v9, %v432_v8 }
  0xf7   : > { %v395_v13 = vadd.f32 %v394_v2, %v807_v59  ;;  %v464_v14 = vadd.f32 %v463_v11, %v433_v10 }
  0xf9   : > { %v465_v16 = vadd.f32 %v464_v14, %v434_v12  ;;  %v396_v19 = vadd.f32 %v395_v13, %v820_v63  ;;  %v440_v63 = vmul.f32 %v796_v56, %v796_v56 }
  0xfb   : > { %v397_v20 = vadd.f32 %v396_v19, %v833_v3  ;;  %v466_v21 = vadd.f32 %v465_v16, %v435_v15  ;;  %v441_v3 = vmul.f32 %v809_v60, %v809_v60 }
  0xfd   : > { %v398_v55 = vadd.f32 %v397_v20, %v844_v17  ;;  %v467_v23 = vadd.f32 %v466_v21, %v436_v52  ;;  %v442_v17 = vmul.f32 %v822_v0, %v822_v0 }
  0xff   : > { %v468_v59 = vadd.f32 %v467_v23, %v437_v22  ;;  %v399_v24 = vadd.f32 %v398_v55, %v316_v32 }
 0x101   : > { %v469_v27 = vadd.f32 %v468_v59, %v438_v25  ;;  %v400_v28 = vadd.f32 %v399_v24, %v319_v46 }
 0x103   : > { %v401_v29 = vadd.f32 %v400_v28, %v796_v56  ;;  %v470_v30 = vadd.f32 %v469_v27, %v439_v26 }
 0x105   : > { %v402_v31 = vadd.f32 %v401_v29, %v809_v60  ;;  %v471_v34 = vadd.f32 %v470_v30, %v440_v63 }
 0x107   : > { %v403_v32 = vadd.f32 %v402_v31, %v822_v0  ;;  %v472_v35 = vadd.f32 %v471_v34, %v441_v3  ;;  %v445_v0 = vmul.f32 %v854_v33, %v854_v33 }
 0x109   : > { %v473_v37 = vadd.f32 %v472_v35, %v442_v17  ;;  %v404_v56 = vadd.f32 %v403_v32, %v835_v4 }
 0x10b   : > { %v405_v60 = vadd.f32 %v404_v56, %v846_v18  ;;  %v474_v39 = vadd.f32 %v473_v37, %v443_v36 }
 0x10d   : > { %v406_v40 = vadd.f32 %v405_v60, %v854_v33  ;;  %v475_v41 = vadd.f32 %v474_v39, %v444_v38 }
 0x10f   : > { %v476_v42 = vadd.f32 %v475_v41, %v445_v0  ;;  %v407_v43 = vadd.f32 %v406_v40, %v340_v47 }
 0x111   : > { %v477_v46 = vadd.f32 %v476_v42, %v446_v44  ;;  %v408_v4 = vadd.f32 %v407_v43, %v343_v7 }
 0x113   : > { %v409_v48 = vrot.slane %v408_v4, 4  ;;  %v478_v49 = vadd.f32 %v477_v46, %v447_v45 }
 0x115   : > { %v410_v50 = vadd.f32 %v409_v48, %v408_v4  ;;  %v479_v51 = vrot.slane %v478_v49, 4 }
 0x117   : > { %v411_v18 = vrot.slane %v410_v50, 2  ;;  %v480_v53 = vadd.f32 %v479_v51, %v478_v49 }
 0x119   : > { %v412_v54 = vadd.f32 %v411_v18, %v410_v50  ;;  %v481_v57 = vrot.slane %v480_v53, 2 }
 0x11b   : > { %v413_v61 = vrot.slane %v412_v54, 1  ;;  %v482_v33 = vadd.f32 %v481_v57, %v480_v53 }
 0x11d   : > { %v414_v47 = vadd.f32 %v413_v61, %v412_v54  ;;  %v483_v58 = vrot.slane %v482_v33, 1 }
 0x11f   : > { %415 = vst [vmem:[%s184_s5] sm:$0x1] %v414_v47  ;;  %v484_v1 = vadd.f32 %v483_v58, %v482_v33 }
 0x121   : > { %485 = vst [vmem:[%s184_s5 + $0x1] sm:$0x1] %v484_v1 }
 0x122 PF: > { %s14_s12 = sadd.s32 1, %s647_s12  }
 0x123   : > { %p11_p5 = scmp.ge.s32.totalorder %s14_s12, 4  }
 0x125   :  { %13 = sbr.rel (!%p11_p5) target bundleno = 1 (0x1), region = 70 }

// kernel: bottleneck_forward.8
= control target key start
LH: loop header
LB: loop body
LE: loop exit
PB: predicated region body
PF: predicated region fallthrough
CT: control target
= control target key end

     0   :  { %s447_s12 = smov 0   ;;  %s606_s0 = inlined_call_operand.vmem [shape: f32[512,128], index: 0, kind: input, shape index: {}]   ;;  %s607_s1 = inlined_call_operand.vmem [shape: f32[1,128], index: 1, kind: input, shape index: {}]   ;;  %s608_s2 = inlined_call_operand.vmem [shape: f32[1,128], index: 2, kind: input, shape index: {}]   ;;  %s609_s3 = inlined_call_operand.vmem [shape: f32[512,128], index: 3, kind: output, shape index: {}]  }
   0x1 LB: > { %s398_s13 = sadd.s32 4294967295, %s425_s12   ;;  %p402_p0 = scmp.ge.s32.totalorder %s425_s12, 1  ;;  %s425_s12 = sphi %s447_s12, %s13_s12  }
   0x2   : > { %p138_p1 = scmp.lt.s32.totalorder %s425_s12, 3 }
   0x4   : > { %p139_p2 = pnand %p402_p0, %p138_p1 }
   0x5   : > { %s403_s14 = sshll.u32 (!%p139_p2), %s398_s13, 5 }
   0x6   : > { %142 = sbr.rel (%p139_p2) target bundleno = 53 (0x35), region = 32  ;;  %p163_p3 = scmp.lt.s32.totalorder (!%p139_p2), %s403_s14, 63 }
   0xb   : > { %s611_s14 = smov (!%p163_p3, %s403_s14), 63  ;;  %v458_v0 = vld [vmem:[%s607_s1] ss:$0 sm:$0xff] }
   0xc   : > { %s404_s17 = sshll.u32 %s611_s14, 3  ;;  %v468_v1 = vld [vmem:[%s608_s2] ss:$0 sm:$0xff] }
   0xd   : > { %s463_s20 = scalar_lea.vmem %s606_s0, %s404_s17  ;;  %s491_s25 = scalar_lea.vmem %s609_s3, %s404_s17 }
   0xe   : > { %v174_v2 = vld [vmem:[%s463_s20] sm:$0xff]  ;;  %v175_v3 = vld [vmem:[%s463_s20 + $0x8] sm:$0xff]  ;;  %v176_v4 = vld [vmem:[%s463_s20 + $0x10] sm:$0xff] }
   0xf   : > { %v210_v5 = vmul.f32 %v458_v0, %v174_v2  ;;  %v211_v6 = vmul.f32 %v458_v0, %v175_v3  ;;  %v212_v7 = vmul.f32 %v458_v0, %v176_v4  ;;  %v177_v8 = vld [vmem:[%s463_s20 + $0x18] sm:$0xff]  ;;  %v178_v9 = vld [vmem:[%s463_s20 + $0x20] sm:$0xff]  ;;  %v179_v10 = vld [vmem:[%s463_s20 + $0x28] sm:$0xff] }
  0x10   : > { %v213_v11 = vmul.f32 %v458_v0, %v177_v8  ;;  %v214_v12 = vmul.f32 %v458_v0, %v178_v9  ;;  %v215_v13 = vmul.f32 %v458_v0, %v179_v10  ;;  %v180_v14 = vld [vmem:[%s463_s20 + $0x30] sm:$0xff]  ;;  %v181_v15 = vld [vmem:[%s463_s20 + $0x38] sm:$0xff]  ;;  %v182_v24 = vld [vmem:[%s463_s20 + $0x40] sm:$0xff] }
  0x11   : > { %v246_v16 = vadd.f32 %v468_v1, %v210_v5  ;;  %v247_v17 = vadd.f32 %v468_v1, %v211_v6  ;;  %v248_v18 = vadd.f32 %v468_v1, %v212_v7  ;;  %v216_v19 = vmul.f32 %v458_v0, %v180_v14  ;;  %v183_v25 = vld [vmem:[%s463_s20 + $0x48] sm:$0xff]  ;;  %v184_v26 = vld [vmem:[%s463_s20 + $0x50] sm:$0xff]  ;;  %v185_v31 = vld [vmem:[%s463_s20 + $0x58] sm:$0xff] }
  0x12   : > { %v249_v20 = vadd.f32 %v468_v1, %v213_v11  ;;  %v250_v21 = vadd.f32 %v468_v1, %v214_v12  ;;  %v251_v22 = vadd.f32 %v468_v1, %v215_v13  ;;  %v217_v23 = vmul.f32 %v458_v0, %v181_v15  ;;  %v186_v32 = vld [vmem:[%s463_s20 + $0x60] sm:$0xff]  ;;  %v187_v33 = vld [vmem:[%s463_s20 + $0x68] sm:$0xff]  ;;  %v188_v37 = vld [vmem:[%s463_s20 + $0x70] sm:$0xff] }
  0x13   : > { %v278_v27 = vmax.f32 %v246_v16, 0.0  ;;  %v279_v28 = vmax.f32 %v247_v17, 0.0  ;;  %v280_v29 = vmax.f32 %v248_v18, 0.0  ;;  %v252_v30 = vadd.f32 %v468_v1, %v216_v19  ;;  %v189_v42 = vld [vmem:[%s463_s20 + $0x78] sm:$0xff]  ;;  %v190_v54 = vld [vmem:[%s463_s20 + $0x80] sm:$0xff]  ;;  %v191_v55 = vld [vmem:[%s463_s20 + $0x88] sm:$0xff] }
  0x14   : > { %v281_v34 = vmax.f32 %v249_v20, 0.0  ;;  %v282_v35 = vmax.f32 %v250_v21, 0.0  ;;  %v253_v36 = vadd.f32 %v468_v1, %v217_v23  ;;  %v283_v38 = vmax.f32 %v251_v22, 0.0  ;;  %v192_v56 = vld [vmem:[%s463_s20 + $0x90] sm:$0xff]  ;;  %v193_v59 = vld [vmem:[%s463_s20 + $0x98] sm:$0xff]  ;;  %v194_v63 = vld [vmem:[%s463_s20 + $0xa0] sm:$0xff] }
  0x15   : > { %310 = vst [vmem:[%s491_s25] sm:$0xff] %v278_v27  ;;  %v218_v39 = vmul.f32 %v458_v0, %v182_v24  ;;  %v219_v40 = vmul.f32 %v458_v0, %v183_v25  ;;  %v220_v41 = vmul.f32 %v458_v0, %v184_v26  ;;  %v284_v43 = vmax.f32 %v252_v30, 0.0  ;;  %v195_v6 = vld [vmem:[%s463_s20 + $0xa8] sm:$0xff]  ;;  %v196_v10 = vld [vmem:[%s463_s20 + $0xb0] sm:$0xff]  ;;  %v197_v14 = vld [vmem:[%s463_s20 + $0xb8] sm:$0xff] }
  0x16   : > { %311 = vst [vmem:[%s491_s25 + $0x8] sm:$0xff] %v279_v28  ;;  %v221_v44 = vmul.f32 %v458_v0, %v185_v31  ;;  %v222_v45 = vmul.f32 %v458_v0, %v186_v32  ;;  %v223_v46 = vmul.f32 %v458_v0, %v187_v33  ;;  %v224_v50 = vmul.f32 %v458_v0, %v188_v37  ;;  %v198_v18 = vld [vmem:[%s463_s20 + $0xc0] sm:$0xff]  ;;  %v199_v22 = vld [vmem:[%s463_s20 + $0xc8] sm:$0xff]  ;;  %v200_v26 = vld [vmem:[%s463_s20 + $0xd0] sm:$0xff] }
  0x17   : > { %312 = vst [vmem:[%s491_s25 + $0x10] sm:$0xff] %v280_v29  ;;  %v254_v47 = vadd.f32 %v468_v1, %v218_v39  ;;  %v255_v48 = vadd.f32 %v468_v1, %v219_v40  ;;  %v256_v49 = vadd.f32 %v468_v1, %v220_v41  ;;  %v285_v51 = vmax.f32 %v253_v36, 0.0  ;;  %v201_v30 = vld [vmem:[%s463_s20 + $0xd8] sm:$0xff] }
  0x18   : > { %313 = vst [vmem:[%s491_s25 + $0x18] sm:$0xff] %v281_v34  ;;  %v257_v52 = vadd.f32 %v468_v1, %v221_v44  ;;  %v225_v53 = vmul.f32 %v458_v0, %v189_v42  ;;  %v258_v58 = vadd.f32 %v468_v1, %v222_v45  ;;  %v259_v62 = vadd.f32 %v468_v1, %v223_v46  ;;  %v202_v34 = vld [vmem:[%s463_s20 + $0xe0] sm:$0xff]  ;;  %v204_v42 = vld [vmem:[%s463_s20 + $0xf0] sm:$0xff]  ;;  %v205_v46 = vld [vmem:[%s463_s20 + $0xf8] sm:$0xff] }
  0x19   : > { %314 = vst [vmem:[%s491_s25 + $0x20] sm:$0xff] %v282_v35  ;;  %v286_v57 = vmax.f32 %v254_v47, 0.0  ;;  %v287_v60 = vmax.f32 %v255_v48, 0.0  ;;  %v288_v61 = vmax.f32 %v256_v49, 0.0  ;;  %v260_v2 = vadd.f32 %v468_v1, %v224_v50 }
  0x1a   : > { %315 = vst [vmem:[%s491_s25 + $0x28] sm:$0xff] %v283_v38  ;;  %v226_v3 = vmul.f32 %v458_v0, %v190_v54  ;;  %v227_v4 = vmul.f32 %v458_v0, %v191_v55  ;;  %v228_v5 = vmul.f32 %v458_v0, %v192_v56  ;;  %v289_v7 = vmax.f32 %v257_v52, 0.0  ;;  %v203_v38 = vld [vmem:[%s463_s20 + $0xe8] sm:$0xff] }
  0x1b   : > { %316 = vst [vmem:[%s491_s25 + $0x30] sm:$0xff] %v284_v43  ;;  %v261_v8 = vadd.f32 %v468_v1, %v225_v53  ;;  %v229_v9 = vmul.f32 %v458_v0, %v193_v59  ;;  %v290_v11 = vmax.f32 %v258_v58, 0.0  ;;  %v230_v13 = vmul.f32 %v458_v0, %v194_v63 }
  0x1c   : > { %317 = vst [vmem:[%s491_s25 + $0x38] sm:$0xff] %v285_v51  ;;  %v262_v12 = vadd.f32 %v468_v1, %v226_v3  ;;  %v291_v15 = vmax.f32 %v259_v62, 0.0  ;;  %v263_v16 = vadd.f32 %v468_v1, %v227_v4  ;;  %v231_v17 = vmul.f32 %v458_v0, %v195_v6 }
  0x1d   : > { %318 = vst [vmem:[%s491_s25 + $0x40] sm:$0xff] %v286_v57  ;;  %v292_v19 = vmax.f32 %v260_v2, 0.0  ;;  %v264_v20 = vadd.f32 %v468_v1, %v228_v5  ;;  %v232_v21 = vmul.f32 %v458_v0, %v196_v10  ;;  %v293_v23 = vmax.f32 %v261_v8, 0.0 }
  0x1e   : > { %319 = vst [vmem:[%s491_s25 + $0x48] sm:$0xff] %v287_v60  ;;  %v265_v24 = vadd.f32 %v468_v1, %v229_v9  ;;  %v233_v25 = vmul.f32 %v458_v0, %v197_v14  ;;  %v294_v27 = vmax.f32 %v262_v12, 0.0  ;;  %v266_v28 = vadd.f32 %v468_v1, %v230_v13 }
  0x1f   : > { %320 = vst [vmem:[%s491_s25 + $0x50] sm:$0xff] %v288_v61  ;;  %v234_v29 = vmul.f32 %v458_v0, %v198_v18  ;;  %v295_v31 = vmax.f32 %v263_v16, 0.0  ;;  %v267_v32 = vadd.f32 %v468_v1, %v231_v17  ;;  %v235_v33 = vmul.f32 %v458_v0, %v199_v22 }
  0x20   : > { %321 = vst [vmem:[%s491_s25 + $0x58] sm:$0xff] %v289_v7  ;;  %v296_v35 = vmax.f32 %v264_v20, 0.0  ;;  %v268_v36 = vadd.f32 %v468_v1, %v232_v21  ;;  %v236_v37 = vmul.f32 %v458_v0, %v200_v26  ;;  %v297_v39 = vmax.f32 %v265_v24, 0.0 }
  0x21   : > { %322 = vst [vmem:[%s491_s25 + $0x60] sm:$0xff] %v290_v11  ;;  %v269_v40 = vadd.f32 %v468_v1, %v233_v25  ;;  %v237_v41 = vmul.f32 %v458_v0, %v201_v30  ;;  %v298_v43 = vmax.f32 %v266_v28, 0.0  ;;  %v270_v44 = vadd.f32 %v468_v1, %v234_v29 }
  0x22   : > { %323 = vst [vmem:[%s491_s25 + $0x68] sm:$0xff] %v291_v15  ;;  %v238_v45 = vmul.f32 %v458_v0, %v202_v34  ;;  %v299_v47 = vmax.f32 %v267_v32, 0.0  ;;  %v271_v48 = vadd.f32 %v468_v1, %v235_v33  ;;  %v239_v49 = vmul.f32 %v458_v0, %v203_v38 }
  0x23   : > { %324 = vst [vmem:[%s491_s25 + $0x70] sm:$0xff] %v292_v19  ;;  %v300_v50 = vmax.f32 %v268_v36, 0.0  ;;  %v272_v51 = vadd.f32 %v468_v1, %v236_v37  ;;  %v240_v52 = vmul.f32 %v458_v0, %v204_v42  ;;  %v301_v53 = vmax.f32 %v269_v40, 0.0 }
  0x24   : > { %325 = vst [vmem:[%s491_s25 + $0x78] sm:$0xff] %v293_v23  ;;  %v273_v54 = vadd.f32 %v468_v1, %v237_v41  ;;  %v241_v55 = vmul.f32 %v458_v0, %v205_v46  ;;  %v302_v56 = vmax.f32 %v270_v44, 0.0  ;;  %v274_v57 = vadd.f32 %v468_v1, %v238_v45 }
  0x25   : > { %326 = vst [vmem:[%s491_s25 + $0x80] sm:$0xff] %v294_v27  ;;  %v303_v58 = vmax.f32 %v271_v48, 0.0  ;;  %v275_v59 = vadd.f32 %v468_v1, %v239_v49  ;;  %v304_v60 = vmax.f32 %v272_v51, 0.0  ;;  %v276_v61 = vadd.f32 %v468_v1, %v240_v52 }
  0x26   : > { %327 = vst [vmem:[%s491_s25 + $0x88] sm:$0xff] %v295_v31  ;;  %v305_v0 = vmax.f32 %v273_v54, 0.0  ;;  %v277_v62 = vadd.f32 %v468_v1, %v241_v55  ;;  %v306_v63 = vmax.f32 %v274_v57, 0.0 }
  0x27   : > { %328 = vst [vmem:[%s491_s25 + $0x90] sm:$0xff] %v296_v35  ;;  %v307_v2 = vmax.f32 %v275_v59, 0.0  ;;  %v308_v3 = vmax.f32 %v276_v61, 0.0 }
  0x28   : > { %329 = vst [vmem:[%s491_s25 + $0x98] sm:$0xff] %v297_v39  ;;  %v309_v4 = vmax.f32 %v277_v62, 0.0 }
  0x29   : > { %330 = vst [vmem:[%s491_s25 + $0xa0] sm:$0xff] %v298_v43 }
  0x2a   : > { %331 = vst [vmem:[%s491_s25 + $0xa8] sm:$0xff] %v299_v47 }
  0x2b   : > { %332 = vst [vmem:[%s491_s25 + $0xb0] sm:$0xff] %v300_v50 }
  0x2c   : > { %333 = vst [vmem:[%s491_s25 + $0xb8] sm:$0xff] %v301_v53 }
  0x2d   : > { %334 = vst [vmem:[%s491_s25 + $0xc0] sm:$0xff] %v302_v56 }
  0x2e   : > { %335 = vst [vmem:[%s491_s25 + $0xc8] sm:$0xff] %v303_v58 }
  0x2f   : > { %336 = vst [vmem:[%s491_s25 + $0xd0] sm:$0xff] %v304_v60 }
  0x30   : > { %337 = vst [vmem:[%s491_s25 + $0xd8] sm:$0xff] %v305_v0 }
  0x31   : > { %338 = vst [vmem:[%s491_s25 + $0xe0] sm:$0xff] %v306_v63 }
  0x32   : > { %339 = vst [vmem:[%s491_s25 + $0xe8] sm:$0xff] %v307_v2 }
  0x33   : > { %340 = vst [vmem:[%s491_s25 + $0xf0] sm:$0xff] %v308_v3 }
  0x34   : > { %341 = vst [vmem:[%s491_s25 + $0xf8] sm:$0xff] %v309_v4 }
  0x35 PF: > { %s13_s12 = sadd.s32 1, %s425_s12  }
  0x36   : > { %p10_p4 = scmp.ge.s32.totalorder %s13_s12, 4  }
  0x38   :  { %12 = sbr.rel (!%p10_p4) target bundleno = 1 (0x1), region = 62 }

// kernel: bottleneck_forward.10
= control target key start
LH: loop header
LB: loop body
LE: loop exit
PB: predicated region body
PF: predicated region fallthrough
CT: control target
= control target key end

     0   :  { %v320_v2 = vmov 0.0   ;;  %s543_s0 = inlined_call_operand.vmem [shape: f32[256,128], index: 0, kind: input, shape index: {}]   ;;  %s544_s1 = inlined_call_operand.vmem [shape: f32[1,128], index: 1, kind: input, shape index: {}]   ;;  %s545_s2 = inlined_call_operand.vmem [shape: f32[1,128], index: 2, kind: input, shape index: {}]   ;;  %s546_s3 = inlined_call_operand.vmem [shape: f32[256,128], index: 3, kind: output, shape index: {}]  }
   0x1   :  { %v14_v0 = vld [vmem:[%s543_s0] sm:$0xff]  ;;  %297 = vst [vmem:[%s546_s3 + $0x80] sm:$0xff] %v320_v2  ;;  %v15_v4 = vld [vmem:[%s543_s0 + $0x8] sm:$0xff]  ;;  %v16_v7 = vld [vmem:[%s543_s0 + $0x10] sm:$0xff] }
   0x2   :  { %v347_v1 = vld [vmem:[%s544_s1] ss:$0 sm:$0xff]  ;;  %298 = vst [vmem:[%s546_s3 + $0x88] sm:$0xff] %v320_v2  ;;  %v17_v8 = vld [vmem:[%s543_s0 + $0x18] sm:$0xff]  ;;  %v19_v13 = vld [vmem:[%s543_s0 + $0x28] sm:$0xff] }
   0x3   :  { %v356_v3 = vld [vmem:[%s545_s2] ss:$0 sm:$0xff]  ;;  %v50_v5 = vmul.f32 %v347_v1, %v14_v0  ;;  %v51_v6 = vmul.f32 %v347_v1, %v15_v4  ;;  %299 = vst [vmem:[%s546_s3 + $0x90] sm:$0xff] %v320_v2  ;;  %v52_v10 = vmul.f32 %v347_v1, %v16_v7  ;;  %v53_v11 = vmul.f32 %v347_v1, %v17_v8  ;;  %v20_v14 = vld [vmem:[%s543_s0 + $0x30] sm:$0xff]  ;;  %v21_v15 = vld [vmem:[%s543_s0 + $0x38] sm:$0xff] }
   0x4   :  { %v18_v9 = vld [vmem:[%s543_s0 + $0x20] sm:$0xff]  ;;  %300 = vst [vmem:[%s546_s3 + $0x98] sm:$0xff] %v320_v2  ;;  %v55_v18 = vmul.f32 %v347_v1, %v19_v13  ;;  %v56_v19 = vmul.f32 %v347_v1, %v20_v14  ;;  %v57_v23 = vmul.f32 %v347_v1, %v21_v15  ;;  %v23_v25 = vld [vmem:[%s543_s0 + $0x48] sm:$0xff]  ;;  %v24_v30 = vld [vmem:[%s543_s0 + $0x50] sm:$0xff] }
   0x5   :  { %v54_v12 = vmul.f32 %v347_v1, %v18_v9  ;;  %v86_v16 = vadd.f32 %v356_v3, %v50_v5  ;;  %v87_v17 = vadd.f32 %v356_v3, %v51_v6  ;;  %301 = vst [vmem:[%s546_s3 + $0xa0] sm:$0xff] %v320_v2  ;;  %v88_v20 = vadd.f32 %v356_v3, %v52_v10  ;;  %v22_v24 = vld [vmem:[%s543_s0 + $0x40] sm:$0xff]  ;;  %v25_v31 = vld [vmem:[%s543_s0 + $0x58] sm:$0xff]  ;;  %v27_v36 = vld [vmem:[%s543_s0 + $0x68] sm:$0xff] }
   0x6   :  { %v89_v21 = vadd.f32 %v356_v3, %v53_v11  ;;  %302 = vst [vmem:[%s546_s3 + $0xa8] sm:$0xff] %v320_v2  ;;  %v91_v28 = vadd.f32 %v356_v3, %v55_v18  ;;  %v92_v29 = vadd.f32 %v356_v3, %v56_v19  ;;  %v26_v32 = vld [vmem:[%s543_s0 + $0x60] sm:$0xff]  ;;  %v93_v35 = vadd.f32 %v356_v3, %v57_v23  ;;  %v28_v37 = vld [vmem:[%s543_s0 + $0x70] sm:$0xff]  ;;  %v29_v42 = vld [vmem:[%s543_s0 + $0x78] sm:$0xff] }
   0x7   :  { %v90_v22 = vadd.f32 %v356_v3, %v54_v12  ;;  %v118_v26 = vmax.f32 %v86_v16, 0.0  ;;  %v119_v27 = vmax.f32 %v87_v17, 0.0  ;;  %303 = vst [vmem:[%s546_s3 + $0xb0] sm:$0xff] %v320_v2  ;;  %v120_v33 = vmax.f32 %v88_v20, 0.0 }
   0x8   :  { %v121_v34 = vmax.f32 %v89_v21, 0.0  ;;  %304 = vst [vmem:[%s546_s3 + $0xb8] sm:$0xff] %v320_v2  ;;  %v123_v39 = vmax.f32 %v91_v28, 0.0  ;;  %v58_v40 = vmul.f32 %v347_v1, %v22_v24  ;;  %v59_v41 = vmul.f32 %v347_v1, %v23_v25 }
   0x9   :  { %281 = vst [vmem:[%s546_s3] sm:$0xff] %v118_v26  ;;  %v122_v38 = vmax.f32 %v90_v22, 0.0  ;;  %v124_v43 = vmax.f32 %v92_v29, 0.0  ;;  %v60_v44 = vmul.f32 %v347_v1, %v24_v30  ;;  %v61_v45 = vmul.f32 %v347_v1, %v25_v31 }
   0xa   :  { %282 = vst [vmem:[%s546_s3 + $0x8] sm:$0xff] %v119_v27  ;;  %v62_v46 = vmul.f32 %v347_v1, %v26_v32  ;;  %v94_v47 = vadd.f32 %v356_v3, %v58_v40  ;;  %v95_v48 = vadd.f32 %v356_v3, %v59_v41  ;;  %v63_v49 = vmul.f32 %v347_v1, %v27_v36 }
   0xb   :  { %283 = vst [vmem:[%s546_s3 + $0x10] sm:$0xff] %v120_v33  ;;  %v64_v50 = vmul.f32 %v347_v1, %v28_v37  ;;  %v125_v51 = vmax.f32 %v93_v35, 0.0  ;;  %v96_v52 = vadd.f32 %v356_v3, %v60_v44  ;;  %v97_v53 = vadd.f32 %v356_v3, %v61_v45 }
   0xc   :  { %284 = vst [vmem:[%s546_s3 + $0x18] sm:$0xff] %v121_v34  ;;  %v65_v54 = vmul.f32 %v347_v1, %v29_v42  ;;  %v126_v55 = vmax.f32 %v94_v47, 0.0  ;;  %v98_v56 = vadd.f32 %v356_v3, %v62_v46  ;;  %v127_v57 = vmax.f32 %v95_v48, 0.0 }
   0xd   :  { %285 = vst [vmem:[%s546_s3 + $0x20] sm:$0xff] %v122_v38  ;;  %v99_v58 = vadd.f32 %v356_v3, %v63_v49  ;;  %v128_v59 = vmax.f32 %v96_v52, 0.0  ;;  %v100_v60 = vadd.f32 %v356_v3, %v64_v50  ;;  %v129_v61 = vmax.f32 %v97_v53, 0.0 }
   0xe   :  { %286 = vst [vmem:[%s546_s3 + $0x28] sm:$0xff] %v123_v39  ;;  %v101_v62 = vadd.f32 %v356_v3, %v65_v54  ;;  %v130_v63 = vmax.f32 %v98_v56, 0.0 }
   0xf   :  { %287 = vst [vmem:[%s546_s3 + $0x30] sm:$0xff] %v124_v43  ;;  %v131_v0 = vmax.f32 %v99_v58, 0.0  ;;  %v132_v1 = vmax.f32 %v100_v60, 0.0 }
  0x10   :  { %288 = vst [vmem:[%s546_s3 + $0x38] sm:$0xff] %v125_v51  ;;  %v133_v3 = vmax.f32 %v101_v62, 0.0 }
  0x11   :  { %289 = vst [vmem:[%s546_s3 + $0x40] sm:$0xff] %v126_v55 }
  0x12   :  { %290 = vst [vmem:[%s546_s3 + $0x48] sm:$0xff] %v127_v57 }
  0x13   :  { %291 = vst [vmem:[%s546_s3 + $0x50] sm:$0xff] %v128_v59 }
  0x14   :  { %292 = vst [vmem:[%s546_s3 + $0x58] sm:$0xff] %v129_v61 }
  0x15   :  { %293 = vst [vmem:[%s546_s3 + $0x60] sm:$0xff] %v130_v63 }
  0x16   :  { %294 = vst [vmem:[%s546_s3 + $0x68] sm:$0xff] %v131_v0 }
  0x17   :  { %295 = vst [vmem:[%s546_s3 + $0x70] sm:$0xff] %v132_v1 }
  0x18   :  { %296 = vst [vmem:[%s546_s3 + $0x78] sm:$0xff] %v133_v3 }
  0x19   :  { %305 = vst [vmem:[%s546_s3 + $0xc0] sm:$0xff] %v320_v2 }
  0x1a   :  { %306 = vst [vmem:[%s546_s3 + $0xc8] sm:$0xff] %v320_v2 }
  0x1b   :  { %307 = vst [vmem:[%s546_s3 + $0xd0] sm:$0xff] %v320_v2 }
  0x1c   :  { %308 = vst [vmem:[%s546_s3 + $0xd8] sm:$0xff] %v320_v2 }
  0x1d   :  { %309 = vst [vmem:[%s546_s3 + $0xe0] sm:$0xff] %v320_v2 }
  0x1e   :  { %310 = vst [vmem:[%s546_s3 + $0xe8] sm:$0xff] %v320_v2 }
  0x1f   :  { %311 = vst [vmem:[%s546_s3 + $0xf0] sm:$0xff] %v320_v2 }
  0x20   :  { %312 = vst [vmem:[%s546_s3 + $0xf8] sm:$0xff] %v320_v2 }

// kernel: bottleneck_forward.9
= control target key start
LH: loop header
LB: loop body
LE: loop exit
PB: predicated region body
PF: predicated region fallthrough
CT: control target
= control target key end

     0   :  { %s1231_s12 = smov 0   ;;  %s1899_s0 = inlined_call_operand.vmem [shape: f32[2,36,9,128], index: 0, kind: input, shape index: {}]   ;;  %s1900_s1 = inlined_call_operand.vmem [shape: f32[3,3,128,128], index: 1, kind: input, shape index: {}]   ;;  %s1901_s2 = inlined_call_operand.vmem [shape: f32[2,8,8,128], index: 2, kind: output, shape index: {0}]   ;;  %s1902_s3 = inlined_call_operand.vmem [shape: f32[2,2,128], index: 3, kind: output, shape index: {1}]  }
   0x1 LB: > { %s966_s13 = sadd.s32 4294967295, %s1209_s12   ;;  %p970_p0 = scmp.ge.s32.totalorder %s1209_s12, 1  ;;  %s1209_s12 = sphi %s1231_s12, %s14_s12  }
   0x2   : > { %p140_p1 = scmp.lt.s32.totalorder %s1209_s12, 3 }
   0x4   : > { %p141_p2 = pnand %p970_p0, %p140_p1 }
   0x5   : > { %p1301_p3 = scmp.lt.s32.totalorder (!%p141_p2), %s966_s13, 1 }
   0x6   : > { %144 = sbr.rel (%p141_p2) target bundleno = 346 (0x15a), region = 28 }
   0xb   : > { %v998_v0 = vld [vmem:[%s1900_s1 + $0xf8] sm:$0xff]  ;;  %v997_v1 = vld [vmem:[%s1900_s1 + $0xf0] sm:$0xff]  ;;  %v996_v2 = vld [vmem:[%s1900_s1 + $0xe8] sm:$0xff]  ;;  %s1905_s13 = smov (!%p1301_p3, %s966_s13), 1 }
   0xc   : > { %1162 = vmatpush.msra.mxu1 %v998_v0  ;;  %232 = vmatpush.msra.mxu0 %v998_v0  ;;  %v1014_v3 = vld [vmem:[%s1900_s1 + $0x178] sm:$0xff]  ;;  %v1013_v4 = vld [vmem:[%s1900_s1 + $0x170] sm:$0xff]  ;;  %v995_v5 = vld [vmem:[%s1900_s1 + $0xe0] sm:$0xff]  ;;  %s1194_s29 = smul.u32 576, %s1905_s13  ;;  %s974_s18 = sshll.u32 %s1905_s13, 1 }
   0xd   : > { %339 = vmatpush.msra.mxu2 %v1014_v3  ;;  %v1012_v6 = vld [vmem:[%s1900_s1 + $0x168] sm:$0xff]  ;;  %v994_v7 = vld [vmem:[%s1900_s1 + $0xd8] sm:$0xff]  ;;  %v1011_v8 = vld [vmem:[%s1900_s1 + $0x160] sm:$0xff]  ;;  %s181_s22 = scalar_lea.vmem %s1902_s3, %s974_s18 }
   0xe   : > { %1163 = vmatpush.msra.mxu1 %v997_v1  ;;  %233 = vmatpush.msra.mxu0 %v997_v1  ;;  %v993_v9 = vld [vmem:[%s1900_s1 + $0xd0] sm:$0xff]  ;;  %v1038_v10 = vld [vmem:[%s1900_s1 + $0x1f8] sm:$0xff]  ;;  %v992_v13 = vld [vmem:[%s1900_s1 + $0xc8] sm:$0xff]  ;;  %s1369_s19 = scalar_lea.vmem %s1899_s0, %s1194_s29 }
   0xf   : > { %340 = vmatpush.msra.mxu2 %v1013_v4  ;;  %v1010_v11 = vld [vmem:[%s1900_s1 + $0x158] sm:$0xff]  ;;  %v1037_v12 = vld [vmem:[%s1900_s1 + $0x1f0] sm:$0xff]  ;;  %414 = vmatpush.msra.mxu3 %v1038_v10  ;;  %v1036_v15 = vld [vmem:[%s1900_s1 + $0x1e8] sm:$0xff] }
  0x10   : > { %1164 = vmatpush.msra.mxu1 %v996_v2  ;;  %234 = vmatpush.msra.mxu0 %v996_v2  ;;  %v1009_v14 = vld [vmem:[%s1900_s1 + $0x150] sm:$0xff]  ;;  %v991_v16 = vld [vmem:[%s1900_s1 + $0xc0] sm:$0xff]  ;;  %v1008_v17 = vld [vmem:[%s1900_s1 + $0x148] sm:$0xff] }
  0x11   : > { %341 = vmatpush.msra.mxu2 %v1012_v6  ;;  %415 = vmatpush.msra.mxu3 %v1037_v12  ;;  %v1035_v18 = vld [vmem:[%s1900_s1 + $0x1e0] sm:$0xff]  ;;  %v990_v19 = vld [vmem:[%s1900_s1 + $0xb8] sm:$0xff]  ;;  %v989_v22 = vld [vmem:[%s1900_s1 + $0xb0] sm:$0xff] }
  0x12   : > { %1165 = vmatpush.msra.mxu1 %v995_v5  ;;  %235 = vmatpush.msra.mxu0 %v995_v5  ;;  %v1007_v20 = vld [vmem:[%s1900_s1 + $0x140] sm:$0xff]  ;;  %v1034_v21 = vld [vmem:[%s1900_s1 + $0x1d8] sm:$0xff]  ;;  %v1033_v24 = vld [vmem:[%s1900_s1 + $0x1d0] sm:$0xff] }
  0x13   : > { %342 = vmatpush.msra.mxu2 %v1011_v8  ;;  %416 = vmatpush.msra.mxu3 %v1036_v15  ;;  %v1006_v23 = vld [vmem:[%s1900_s1 + $0x138] sm:$0xff]  ;;  %v988_v25 = vld [vmem:[%s1900_s1 + $0xa8] sm:$0xff]  ;;  %v1005_v26 = vld [vmem:[%s1900_s1 + $0x130] sm:$0xff] }
  0x14   : > { %1166 = vmatpush.msra.mxu1 %v994_v7  ;;  %236 = vmatpush.msra.mxu0 %v994_v7  ;;  %v1032_v27 = vld [vmem:[%s1900_s1 + $0x1c8] sm:$0xff]  ;;  %v987_v28 = vld [vmem:[%s1900_s1 + $0xa0] sm:$0xff]  ;;  %v986_v31 = vld [vmem:[%s1900_s1 + $0x98] sm:$0xff] }
  0x15   : > { %343 = vmatpush.msra.mxu2 %v1010_v11  ;;  %417 = vmatpush.msra.mxu3 %v1035_v18  ;;  %v1004_v29 = vld [vmem:[%s1900_s1 + $0x128] sm:$0xff]  ;;  %v1031_v30 = vld [vmem:[%s1900_s1 + $0x1c0] sm:$0xff]  ;;  %v1030_v33 = vld [vmem:[%s1900_s1 + $0x1b8] sm:$0xff] }
  0x16   : > { %1167 = vmatpush.msra.mxu1 %v993_v9  ;;  %237 = vmatpush.msra.mxu0 %v993_v9  ;;  %v1003_v32 = vld [vmem:[%s1900_s1 + $0x120] sm:$0xff]  ;;  %v985_v34 = vld [vmem:[%s1900_s1 + $0x90] sm:$0xff]  ;;  %v1002_v35 = vld [vmem:[%s1900_s1 + $0x118] sm:$0xff] }
  0x17   : > { %344 = vmatpush.msra.mxu2 %v1009_v14  ;;  %418 = vmatpush.msra.mxu3 %v1034_v21  ;;  %v1029_v36 = vld [vmem:[%s1900_s1 + $0x1b0] sm:$0xff]  ;;  %v984_v37 = vld [vmem:[%s1900_s1 + $0x88] sm:$0xff]  ;;  %v983_v40 = vld [vmem:[%s1900_s1 + $0x80] sm:$0xff] }
  0x18   : > { %1168 = vmatpush.msra.mxu1 %v992_v13  ;;  %238 = vmatpush.msra.mxu0 %v992_v13  ;;  %v1001_v38 = vld [vmem:[%s1900_s1 + $0x110] sm:$0xff]  ;;  %v1028_v39 = vld [vmem:[%s1900_s1 + $0x1a8] sm:$0xff]  ;;  %v205_v43 = vld [vmem:[%s1900_s1 + $0x78] sm:$0xff] }
  0x19   : > { %345 = vmatpush.msra.mxu2 %v1008_v17  ;;  %419 = vmatpush.msra.mxu3 %v1033_v24  ;;  %v1381_v41 = vld [vmem:[%s1369_s19 + $0xd0] sm:$0xff]  ;;  %v1062_v44 = vld [vmem:[%s1900_s1 + $0x278] sm:$0xff]  ;;  %v1000_v45 = vld [vmem:[%s1900_s1 + $0x108] sm:$0xff] }
  0x1a   : > { %1169 = vmatpush.msra.mxu1 %v991_v16  ;;  %239 = vmatpush.msra.mxu0 %v991_v16  ;;  %v975_v42 = vld [vmem:[%s1369_s19 + $0x90] sm:$0xff]  ;;  %v1027_v46 = vld [vmem:[%s1900_s1 + $0x1a0] sm:$0xff]  ;;  %v1026_v50 = vld [vmem:[%s1900_s1 + $0x198] sm:$0xff] }
  0x1b   : > { %346 = vmatpush.msra.mxu2 %v1007_v20  ;;  %420 = vmatpush.msra.mxu3 %v1032_v27  ;;  %v204_v47 = vld [vmem:[%s1900_s1 + $0x70] sm:$0xff]  ;;  %v999_v49 = vld [vmem:[%s1900_s1 + $0x100] sm:$0xff]  ;;  %v203_v51 = vld [vmem:[%s1900_s1 + $0x68] sm:$0xff] }
  0x1c   : > { %1170 = vmatpush.msra.mxu1 %v990_v19  ;;  %240 = vmatpush.msra.mxu0 %v990_v19  ;;  %v1061_v48 = vld [vmem:[%s1900_s1 + $0x270] sm:$0xff]  ;;  %v1060_v52 = vld [vmem:[%s1900_s1 + $0x268] sm:$0xff]  ;;  %v202_v55 = vld [vmem:[%s1900_s1 + $0x60] sm:$0xff] }
  0x1d   : > { %347 = vmatpush.msra.mxu2 %v1006_v23  ;;  %421 = vmatpush.msra.mxu3 %v1031_v30  ;;  %v314_v53 = vld [vmem:[%s1369_s19 + $0x1] sm:$0xff]  ;;  %v1025_v54 = vld [vmem:[%s1900_s1 + $0x190] sm:$0xff]  ;;  %v201_v59 = vld [vmem:[%s1900_s1 + $0x58] sm:$0xff] }
  0x1e   : > { %1171 = vmatpush.msra.mxu1 %v989_v22  ;;  %241 = vmatpush.msra.mxu0 %v989_v22  ;;  %v1059_v56 = vld [vmem:[%s1900_s1 + $0x260] sm:$0xff]  ;;  %v1058_v60 = vld [vmem:[%s1900_s1 + $0x258] sm:$0xff]  ;;  %v1024_v62 = vld [vmem:[%s1900_s1 + $0x188] sm:$0xff] }
  0x1f   : > { %348 = vmatpush.msra.mxu2 %v1005_v26  ;;  %422 = vmatpush.msra.mxu3 %v1030_v33  ;;  %v1426_v57 = vld [vmem:[%s1369_s19 + $0xe0] sm:$0xff]  ;;  %v1110_v61 = vld [vmem:[%s1900_s1 + $0x378] sm:$0xff]  ;;  %v200_v63 = vld [vmem:[%s1900_s1 + $0x50] sm:$0xff] }
  0x20   : > { %1172 = vmatpush.msra.mxu1 %v988_v25  ;;  %242 = vmatpush.msra.mxu0 %v988_v25  ;;  %v1429_v58 = vld [vmem:[%s1369_s19 + $0xa0] sm:$0xff]  ;;  %v1057_v0 = vld [vmem:[%s1900_s1 + $0x250] sm:$0xff]  ;;  %v199_v3 = vld [vmem:[%s1900_s1 + $0x48] sm:$0xff] }
  0x21   : > { %349 = vmatpush.msra.mxu2 %v1004_v29  ;;  %423 = vmatpush.msra.mxu3 %v1029_v36  ;;  %v1109_v1 = vld [vmem:[%s1900_s1 + $0x370] sm:$0xff]  ;;  %v1023_v2 = vld [vmem:[%s1900_s1 + $0x180] sm:$0xff]  ;;  %v1056_v4 = vld [vmem:[%s1900_s1 + $0x248] sm:$0xff] }
  0x22   : > { %1173 = vmatpush.msra.mxu1 %v987_v28  ;;  %243 = vmatpush.msra.mxu0 %v987_v28  ;;  %v1464_v5 = vld [vmem:[%s1369_s19 + $0x11] sm:$0xff]  ;;  %v1015_v6 = vld [vmem:[%s1369_s19 + $0x120] sm:$0xff]  ;;  %v1108_v13 = vld [vmem:[%s1900_s1 + $0x368] sm:$0xff] }
  0x23   : > { %350 = vmatpush.msra.mxu2 %v1003_v32  ;;  %424 = vmatpush.msra.mxu3 %v1028_v39  ;;  %v198_v7 = vld [vmem:[%s1900_s1 + $0x40] sm:$0xff]  ;;  %v1474_v9 = vld [vmem:[%s1369_s19 + $0xf0] sm:$0xff]  ;;  %v197_v11 = vld [vmem:[%s1900_s1 + $0x38] sm:$0xff] }
  0x24   : > { %1174 = vmatpush.msra.mxu1 %v986_v31  ;;  %244 = vmatpush.msra.mxu0 %v986_v31  ;;  %v1055_v8 = vld [vmem:[%s1900_s1 + $0x240] sm:$0xff]  ;;  %v1477_v10 = vld [vmem:[%s1369_s19 + $0xb0] sm:$0xff]  ;;  %v1054_v12 = vld [vmem:[%s1900_s1 + $0x238] sm:$0xff] }
  0x25   : > { %351 = vmatpush.msra.mxu2 %v1002_v35  ;;  %425 = vmatpush.msra.mxu3 %v1027_v46  ;;  %v1134_v14 = vld [vmem:[%s1900_s1 + $0x3f8] sm:$0xff]  ;;  %v196_v15 = vld [vmem:[%s1900_s1 + $0x30] sm:$0xff]  ;;  %v1107_v17 = vld [vmem:[%s1900_s1 + $0x360] sm:$0xff] }
  0x26   : > { %1175 = vmatpush.msra.mxu1 %v985_v34  ;;  %245 = vmatpush.msra.mxu0 %v985_v34  ;;  %v1053_v16 = vld [vmem:[%s1900_s1 + $0x230] sm:$0xff]  ;;  %v195_v19 = vld [vmem:[%s1900_s1 + $0x28] sm:$0xff]  ;;  %v194_v23 = vld [vmem:[%s1900_s1 + $0x20] sm:$0xff] }
  0x27   : > { %352 = vmatpush.msra.mxu2 %v1001_v38  ;;  %426 = vmatpush.msra.mxu3 %v1026_v50  ;;  %v1133_v18 = vld [vmem:[%s1900_s1 + $0x3f0] sm:$0xff]  ;;  %v1052_v20 = vld [vmem:[%s1900_s1 + $0x228] sm:$0xff]  ;;  %v1051_v24 = vld [vmem:[%s1900_s1 + $0x220] sm:$0xff] }
  0x28   : > { %1176 = vmatpush.msra.mxu1 %v984_v37  ;;  %246 = vmatpush.msra.mxu0 %v984_v37  ;;  %v1513_v21 = vld [vmem:[%s1369_s19 + $0x21] sm:$0xff]  ;;  %v1016_v22 = vld [vmem:[%s1369_s19 + $0x130] sm:$0xff]  ;;  %v193_v27 = vld [vmem:[%s1900_s1 + $0x18] sm:$0xff] }
  0x29   : > { %353 = vmatpush.msra.mxu2 %v1000_v45  ;;  %427 = vmatpush.msra.mxu3 %v1025_v54  ;;  %v1523_v25 = vld [vmem:[%s1369_s19 + $0x100] sm:$0xff]  ;;  %v1050_v28 = vld [vmem:[%s1900_s1 + $0x218] sm:$0xff]  ;;  %v1132_v30 = vld [vmem:[%s1900_s1 + $0x3e8] sm:$0xff] }
  0x2a   : > { %1177 = vmatpush.msra.mxu1 %v983_v40  ;;  %247 = vmatpush.msra.mxu0 %v983_v40  ;;  %v1526_v26 = vld [vmem:[%s1369_s19 + $0xc0] sm:$0xff]  ;;  %v1106_v29 = vld [vmem:[%s1900_s1 + $0x358] sm:$0xff]  ;;  %v192_v31 = vld [vmem:[%s1900_s1 + $0x10] sm:$0xff] }
  0x2b   : > { %260 = vmatmul.f32.vlgmr.msra.gmra.mxu1 %v1381_v41  ;;  %248 = vmatmul.f32.vlgmr.msra.gmra.mxu0 %v975_v42  ;;  %v1049_v32 = vld [vmem:[%s1900_s1 + $0x210] sm:$0xff]  ;;  %v1131_v34 = vld [vmem:[%s1900_s1 + $0x3e0] sm:$0xff]  ;;  %v191_v35 = vld [vmem:[%s1900_s1 + $0x8] sm:$0xff] }
  0x2c   : > { %273 = vmatpush.msrb.mxu1 %v205_v43  ;;  %489 = vmatpush.msrb.mxu0 %v1062_v44  ;;  %v1105_v33 = vld [vmem:[%s1900_s1 + $0x350] sm:$0xff]  ;;  %v1048_v36 = vld [vmem:[%s1900_s1 + $0x208] sm:$0xff]  ;;  %v1017_v38 = vld [vmem:[%s1369_s19 + $0x140] sm:$0xff] }
  0x2d   : > { %354 = vmatpush.msra.mxu2 %v999_v49  ;;  %428 = vmatpush.msra.mxu3 %v1024_v62  ;;  %v1562_v37 = vld [vmem:[%s1369_s19 + $0x31] sm:$0xff]  ;;  %v190_v39 = vld [vmem:[%s1900_s1] sm:$0xff]  ;;  %v1104_v45 = vld [vmem:[%s1900_s1 + $0x348] sm:$0xff] }
  0x2e   : > { %274 = vmatpush.msrb.mxu1 %v204_v47  ;;  %490 = vmatpush.msrb.mxu0 %v1061_v48  ;;  %v1047_v40 = vld [vmem:[%s1900_s1 + $0x200] sm:$0xff]  ;;  %v1039_v43 = vld [vmem:[%s1369_s19 + $0x1b0] sm:$0xff]  ;;  %v1086_v44 = vld [vmem:[%s1900_s1 + $0x2f8] sm:$0xff] }
  0x2f   : > { %355 = vmatmul.f32.vlgmr.msra.gmra.mxu2 %v314_v53  ;;  %429 = vmatpush.msra.mxu3 %v1023_v2  ;;  %v182_v42 = vld [vmem:[%s1369_s19] sm:$0xff]  ;;  %v1130_v46 = vld [vmem:[%s1900_s1 + $0x3d8] sm:$0xff]  ;;  %v1085_v48 = vld [vmem:[%s1900_s1 + $0x2f0] sm:$0xff] }
  0x30   : > { %275 = vmatpush.msrb.mxu1 %v203_v51  ;;  %491 = vmatpush.msrb.mxu0 %v1060_v52  ;;  %v1586_v47 = vld [vmem:[%s1900_s1 + $0x478] sm:$0xff]  ;;  %v1103_v49 = vld [vmem:[%s1900_s1 + $0x340] sm:$0xff]  ;;  %v1129_v50 = vld [vmem:[%s1900_s1 + $0x3d0] sm:$0xff] }
  0x31   : > { %638 = vmatpush.msrb.mxu2 %v1110_v61  ;;  %430 = vmatmul.f32.vlgmr.msra.gmra.mxu3 %v1015_v6  ;;  %v1600_v51 = vld [vmem:[%s1900_s1 + $0x470] sm:$0xff]  ;;  %v1084_v52 = vld [vmem:[%s1900_s1 + $0x2e8] sm:$0xff]  ;;  %v1102_v53 = vld [vmem:[%s1900_s1 + $0x338] sm:$0xff] }
  0x32   : > { %276 = vmatpush.msrb.mxu1 %v202_v55  ;;  %492 = vmatpush.msrb.mxu0 %v1059_v56  ;;  %v1610_v54 = vld [vmem:[%s1369_s19 + $0x41] sm:$0xff]  ;;  %v1018_v55 = vld [vmem:[%s1369_s19 + $0x150] sm:$0xff]  ;;  %v1082_v62 = vld [vmem:[%s1900_s1 + $0x2d8] sm:$0xff] }
  0x33   : > { %263 = vmatmul.f32.gmra.mxu1 %v1426_v57  ;;  %251 = vmatmul.f32.gmra.mxu0 %v1429_v58  ;;  %v1083_v56 = vld [vmem:[%s1900_s1 + $0x2e0] sm:$0xff]  ;;  %v1081_v2 = vld [vmem:[%s1900_s1 + $0x2d0] sm:$0xff] }
  0x34   : > { %277 = vmatpush.msrb.mxu1 %v201_v59  ;;  %493 = vmatpush.msrb.mxu0 %v1058_v60  ;;  %v1101_v59 = vld [vmem:[%s1900_s1 + $0x330] sm:$0xff]  ;;  %v1040_v61 = vld [vmem:[%s1369_s19 + $0x1c0] sm:$0xff] }
  0x35   : > { %639 = vmatpush.msrb.mxu2 %v1109_v1  ;;  %713 = vmatpush.msrb.mxu3 %v1134_v14  ;;  %v1621_v60 = vld [vmem:[%s1369_s19 + $0x10] sm:$0xff]  ;;  %v1637_v1 = vld [vmem:[%s1900_s1 + $0x468] sm:$0xff]  ;;  %v1652_v6 = vld [vmem:[%s1900_s1 + $0x460] sm:$0xff] }
  0x36   : > { %278 = vmatpush.msrb.mxu1 %v200_v63  ;;  %494 = vmatpush.msrb.mxu0 %v1057_v0  ;;  %v1128_v63 = vld [vmem:[%s1900_s1 + $0x3c8] sm:$0xff]  ;;  %v1098_v14 = vld [vmem:[%s1900_s1 + $0x318] sm:$0xff] }
  0x37   : > { %358 = vmatmul.f32.gmra.mxu2 %v1464_v5  ;;  %714 = vmatpush.msrb.mxu3 %v1133_v18  ;;  %v1100_v0 = vld [vmem:[%s1900_s1 + $0x328] sm:$0xff]  ;;  %v1125_v18 = vld [vmem:[%s1900_s1 + $0x3b0] sm:$0xff] }
  0x38   : > { %279 = vmatpush.msrb.mxu1 %v199_v3  ;;  %495 = vmatpush.msrb.mxu0 %v1056_v4  ;;  %v1127_v3 = vld [vmem:[%s1900_s1 + $0x3c0] sm:$0xff] }
  0x39   : > { %640 = vmatpush.msrb.mxu2 %v1108_v13  ;;  %433 = vmatmul.f32.gmra.mxu3 %v1016_v22  ;;  %v1099_v4 = vld [vmem:[%s1900_s1 + $0x320] sm:$0xff]  ;;  %v1077_v22 = vld [vmem:[%s1900_s1 + $0x2b0] sm:$0xff] }
  0x3a   : > { %280 = vmatpush.msrb.mxu1 %v198_v7  ;;  %496 = vmatpush.msrb.mxu0 %v1055_v8  ;;  %v1080_v7 = vld [vmem:[%s1900_s1 + $0x2c8] sm:$0xff]  ;;  %v1126_v8 = vld [vmem:[%s1900_s1 + $0x3b8] sm:$0xff]  ;;  %v1079_v13 = vld [vmem:[%s1900_s1 + $0x2c0] sm:$0xff] }
  0x3b   : > { %266 = vmatmul.f32.gmra.mxu1 %v1474_v9  ;;  %254 = vmatmul.f32.gmra.mxu0 %v1477_v10 }
  0x3c   : > { %281 = vmatpush.msrb.mxu1 %v197_v11  ;;  %497 = vmatpush.msrb.mxu0 %v1054_v12  ;;  %v1662_v11 = vld [vmem:[%s1369_s19 + $0x51] sm:$0xff]  ;;  %v1019_v12 = vld [vmem:[%s1369_s19 + $0x160] sm:$0xff] }
  0x3d   : > { %641 = vmatpush.msrb.mxu2 %v1107_v17  ;;  %715 = vmatpush.msrb.mxu3 %v1132_v30  ;;  %v1078_v17 = vld [vmem:[%s1900_s1 + $0x2b8] sm:$0xff]  ;;  %v1714_v30 = vld [vmem:[%s1369_s19 + $0x61] sm:$0xff] }
  0x3e   : > { %282 = vmatpush.msrb.mxu1 %v196_v15  ;;  %498 = vmatpush.msrb.mxu0 %v1053_v16  ;;  %v1673_v15 = vld [vmem:[%s1369_s19 + $0x20] sm:$0xff]  ;;  %v1041_v16 = vld [vmem:[%s1369_s19 + $0x1d0] sm:$0xff] }
  0x3f   : > { %361 = vmatmul.f32.gmra.mxu2 %v1513_v21  ;;  %716 = vmatpush.msrb.mxu3 %v1131_v34  ;;  %v1727_v34 = vld [vmem:[%s1369_s19 + $0x30] sm:$0xff] }
  0x40   : > { %283 = vmatpush.msrb.mxu1 %v195_v19  ;;  %499 = vmatpush.msrb.mxu0 %v1052_v20  ;;  %v1686_v19 = vld [vmem:[%s1900_s1 + $0x458] sm:$0xff]  ;;  %v1097_v20 = vld [vmem:[%s1900_s1 + $0x310] sm:$0xff] }
  0x41   : > { %642 = vmatpush.msrb.mxu2 %v1106_v29  ;;  %436 = vmatmul.f32.gmra.mxu3 %v1017_v38  ;;  %v1123_v29 = vld [vmem:[%s1900_s1 + $0x3a0] sm:$0xff]  ;;  %v1122_v38 = vld [vmem:[%s1900_s1 + $0x398] sm:$0xff] }
  0x42   : > { %284 = vmatpush.msrb.mxu1 %v194_v23  ;;  %500 = vmatpush.msrb.mxu0 %v1051_v24  ;;  %v1124_v23 = vld [vmem:[%s1900_s1 + $0x3a8] sm:$0xff]  ;;  %v1701_v24 = vld [vmem:[%s1900_s1 + $0x450] sm:$0xff] }
  0x43   : > { %269 = vmatmul.f32.gmra.mxu1 %v1523_v25  ;;  %257 = vmatmul.f32.gmra.mxu0 %v1526_v26 }
  0x44   : > { %285 = vmatpush.msrb.mxu1 %v193_v27  ;;  %501 = vmatpush.msrb.mxu0 %v1050_v28  ;;  %v1096_v27 = vld [vmem:[%s1900_s1 + $0x308] sm:$0xff] }
  0x45   : > { %643 = vmatpush.msrb.mxu2 %v1105_v33  ;;  %717 = vmatpush.msrb.mxu3 %v1130_v46  ;;  %v1076_v28 = vld [vmem:[%s1900_s1 + $0x2a8] sm:$0xff]  ;;  %v1075_v33 = vld [vmem:[%s1900_s1 + $0x2a0] sm:$0xff]  ;;  %v1758_v46 = vld [vmem:[%s1369_s19 + $0x71] sm:$0xff] }
  0x46   : > { %286 = vmatpush.msrb.mxu1 %v192_v31  ;;  %502 = vmatpush.msrb.mxu0 %v1049_v32  ;;  %v1020_v31 = vld [vmem:[%s1369_s19 + $0x170] sm:$0xff]  ;;  %v1721_v32 = vld [vmem:[%s1900_s1 + $0x448] sm:$0xff] }
  0x47   : > { %364 = vmatmul.f32.gmra.mxu2 %v1562_v37  ;;  %718 = vmatpush.msrb.mxu3 %v1129_v50  ;;  %v1072_v50 = vld [vmem:[%s1900_s1 + $0x288] sm:$0xff] }
  0x48   : > { %287 = vmatpush.msrb.mxu1 %v191_v35  ;;  %503 = vmatpush.msrb.mxu0 %v1048_v36  ;;  %v1042_v35 = vld [vmem:[%s1369_s19 + $0x1e0] sm:$0xff] }
  0x49   : > { %644 = vmatpush.msrb.mxu2 %v1104_v45  ;;  %439 = vmatmul.f32.gmra.mxu3 %v1018_v55  ;;  %v1095_v36 = vld [vmem:[%s1900_s1 + $0x300] sm:$0xff]  ;;  %v1120_v45 = vld [vmem:[%s1900_s1 + $0x388] sm:$0xff] }
  0x4a   : > { %288 = vmatpush.msrb.mxu1 %v190_v39  ;;  %504 = vmatpush.msrb.mxu0 %v1047_v40  ;;  %v1151_v39 = vld [vmem:[%s1900_s1 + $0x440] sm:$0xff]  ;;  %v1074_v40 = vld [vmem:[%s1900_s1 + $0x298] sm:$0xff]  ;;  %v1148_v55 = vld [vmem:[%s1900_s1 + $0x428] sm:$0xff] }
  0x4b   : > { %289 = vmatmul.f32.vlgmr.msrb.gmra.mxu1 %v182_v42  ;;  %505 = vmatmul.f32.vlgmr.msrb.gmra.mxu0 %v1039_v43  ;;  %v1121_v42 = vld [vmem:[%s1900_s1 + $0x390] sm:$0xff]  ;;  %v1150_v43 = vld [vmem:[%s1900_s1 + $0x438] sm:$0xff] }
  0x4c   : > { %563 = vmatpush.msra.mxu1 %v1086_v44  ;;  %787 = vmatpush.msra.mxu0 %v1586_v47  ;;  %v1073_v44 = vld [vmem:[%s1900_s1 + $0x290] sm:$0xff] }
  0x4d   : > { %645 = vmatpush.msrb.mxu2 %v1103_v49  ;;  %719 = vmatpush.msrb.mxu3 %v1128_v63  ;;  %v1149_v49 = vld [vmem:[%s1900_s1 + $0x430] sm:$0xff]  ;;  %v1044_v63 = vld [vmem:[%s1369_s19 + $0x200] sm:$0xff] }
  0x4e   : > { %564 = vmatpush.msra.mxu1 %v1085_v48  ;;  %788 = vmatpush.msra.mxu0 %v1600_v51  ;;  %v1021_v48 = vld [vmem:[%s1369_s19 + $0x180] sm:$0xff] }
  0x4f   : > { %646 = vmatpush.msrb.mxu2 %v1102_v53  ;;  %720 = vmatpush.msrb.mxu3 %v1127_v3  ;;  %v1043_v53 = vld [vmem:[%s1369_s19 + $0x1f0] sm:$0xff] }
  0x50   : > { %565 = vmatpush.msra.mxu1 %v1084_v52  ;;  %367 = vmatmul.f32.gmra.mxu2 %v1610_v54  ;;  %v186_v52 = vld [vmem:[%s1369_s19 + $0x40] sm:$0xff]  ;;  %v1045_v3 = vld [vmem:[%s1369_s19 + $0x210] sm:$0xff] }
  0x51   : > { %647 = vmatpush.msrb.mxu2 %v1101_v59  ;;  %789 = vmatpush.msra.mxu0 %v1637_v1  ;;  %v1022_v59 = vld [vmem:[%s1369_s19 + $0x190] sm:$0xff] }
  0x52   : > { %566 = vmatpush.msra.mxu1 %v1083_v56  ;;  %721 = vmatpush.msrb.mxu3 %v1126_v8  ;;  %v1147_v56 = vld [vmem:[%s1900_s1 + $0x420] sm:$0xff] }
  0x53   : > { %292 = vmatmul.f32.gmra.mxu1 %v1621_v60  ;;  %508 = vmatmul.f32.gmra.mxu0 %v1040_v61  ;;  %v1146_v61 = vld [vmem:[%s1900_s1 + $0x418] sm:$0xff] }
  0x54   : > { %567 = vmatpush.msra.mxu1 %v1082_v62  ;;  %648 = vmatpush.msrb.mxu2 %v1100_v0  ;;  %v187_v62 = vld [vmem:[%s1369_s19 + $0x50] sm:$0xff] }
  0x55   : > { %790 = vmatpush.msra.mxu0 %v1652_v6  ;;  %442 = vmatmul.f32.gmra.mxu3 %v1019_v12  ;;  %v1145_v0 = vld [vmem:[%s1900_s1 + $0x410] sm:$0xff] }
  0x56   : > { %568 = vmatpush.msra.mxu1 %v1081_v2  ;;  %649 = vmatpush.msrb.mxu2 %v1099_v4  ;;  %v188_v2 = vld [vmem:[%s1369_s19 + $0x60] sm:$0xff]  ;;  %v189_v4 = vld [vmem:[%s1369_s19 + $0x70] sm:$0xff] }
  0x57   : > { %722 = vmatpush.msrb.mxu3 %v1125_v18  ;;  %791 = vmatpush.msra.mxu0 %v1686_v19  ;;  %v1068_v12 = vld [vmem:[%s1369_s19 + $0x171] sm:$0xff] }
  0x58   : > { %569 = vmatpush.msra.mxu1 %v1080_v7  ;;  %370 = vmatmul.f32.gmra.mxu2 %v1662_v11  ;;  %v1064_v7 = vld [vmem:[%s1369_s19 + $0x131] sm:$0xff] }
  0x59   : > { %650 = vmatpush.msrb.mxu2 %v1098_v14  ;;  %723 = vmatpush.msrb.mxu3 %v1124_v23  ;;  %v1070_v18 = vld [vmem:[%s1369_s19 + $0x191] sm:$0xff] }
  0x5a   : > { %570 = vmatpush.msra.mxu1 %v1079_v13  ;;  %792 = vmatpush.msra.mxu0 %v1701_v24  ;;  %v1142_v13 = vld [vmem:[%s1369_s19 + $0x81] sm:$0xff] }
  0x5b   : > { %295 = vmatmul.f32.gmra.mxu1 %v1673_v15  ;;  %511 = vmatmul.f32.gmra.mxu0 %v1041_v16 }
  0x5c   : > { %571 = vmatpush.msra.mxu1 %v1078_v17  ;;  %651 = vmatpush.msrb.mxu2 %v1097_v20 }
  0x5d   : > { %724 = vmatpush.msrb.mxu3 %v1123_v29  ;;  %793 = vmatpush.msra.mxu0 %v1721_v32 }
  0x5e   : > { %572 = vmatpush.msra.mxu1 %v1077_v22  ;;  %652 = vmatpush.msrb.mxu2 %v1096_v27 }
  0x5f   : > { %445 = vmatmul.f32.gmra.mxu3 %v1020_v31  ;;  %794 = vmatpush.msra.mxu0 %v1151_v39 }
  0x60   : > { %573 = vmatpush.msra.mxu1 %v1076_v28  ;;  %373 = vmatmul.f32.gmra.mxu2 %v1714_v30 }
  0x61   : > { %653 = vmatpush.msrb.mxu2 %v1095_v36  ;;  %725 = vmatpush.msrb.mxu3 %v1122_v38 }
  0x62   : > { %574 = vmatpush.msra.mxu1 %v1075_v33  ;;  %795 = vmatpush.msra.mxu0 %v1150_v43 }
  0x63   : > { %298 = vmatmul.f32.gmra.mxu1 %v1727_v34  ;;  %514 = vmatmul.f32.gmra.mxu0 %v1042_v35 }
  0x64   : > { %575 = vmatpush.msra.mxu1 %v1074_v40  ;;  %1178 = vmatpush.msra.mxu2 %v1586_v47  ;;  %v1119_v47 = vld [vmem:[%s1900_s1 + $0x380] sm:$0xff] }
  0x65   : > { %726 = vmatpush.msrb.mxu3 %v1121_v42  ;;  %796 = vmatpush.msra.mxu0 %v1149_v49 }
  0x66   : > { %576 = vmatpush.msra.mxu1 %v1073_v44  ;;  %1179 = vmatpush.msra.mxu2 %v1600_v51  ;;  %v1071_v51 = vld [vmem:[%s1900_s1 + $0x280] sm:$0xff] }
  0x67   : > { %727 = vmatpush.msrb.mxu3 %v1120_v45  ;;  %797 = vmatpush.msra.mxu0 %v1148_v55 }
  0x68   : > { %376 = vmatmul.f32.gmra.mxu2 %v1758_v46  ;;  %448 = vmatmul.f32.gmra.mxu3 %v1021_v48 }
  0x69   : > { %577 = vmatpush.msra.mxu1 %v1072_v50  ;;  %1180 = vmatpush.msra.mxu2 %v1637_v1  ;;  %v1144_v1 = vld [vmem:[%s1900_s1 + $0x408] sm:$0xff] }
  0x6a   : > { %728 = vmatpush.msrb.mxu3 %v1119_v47  ;;  %798 = vmatpush.msra.mxu0 %v1147_v56 }
  0x6b   : > { %301 = vmatmul.f32.gmra.mxu1 %v186_v52  ;;  %517 = vmatmul.f32.gmra.mxu0 %v1043_v53 }
  0x6c   : > { %578 = vmatpush.msra.mxu1 %v1071_v51  ;;  %1181 = vmatpush.msra.mxu2 %v1652_v6  ;;  %v1046_v6 = vld [vmem:[%s1369_s19 + $0x220] sm:$0xff] }
  0x6d   : > { %799 = vmatpush.msra.mxu0 %v1146_v61 }
  0x6e   : > { %1182 = vmatpush.msra.mxu2 %v1686_v19 }
  0x6f   : > { %800 = vmatpush.msra.mxu0 %v1145_v0 }
  0x70   : > { %654 = vmatmul.f32.vlgmr.msrb.gmra.mxu2 %v1621_v60  ;;  %451 = vmatmul.f32.gmra.mxu3 %v1022_v59  ;;  %v1143_v60 = vld [vmem:[%s1900_s1 + $0x400] sm:$0xff] }
  0x71   : > { %1183 = vmatpush.msra.mxu2 %v1701_v24  ;;  %801 = vmatpush.msra.mxu0 %v1144_v1 }
  0x73   : > { %304 = vmatmul.f32.gmra.mxu1 %v187_v62  ;;  %520 = vmatmul.f32.gmra.mxu0 %v1044_v63 }
  0x74   : > { %1184 = vmatpush.msra.mxu2 %v1721_v32  ;;  %802 = vmatpush.msra.mxu0 %v1143_v60 }
  0x76   : > { %1185 = vmatpush.msra.mxu2 %v1151_v39 }
  0x78   : > { %1186 = vmatpush.msra.mxu2 %v1150_v43  ;;  %729 = vmatmul.f32.vlgmr.msrb.gmra.mxu3 %v1429_v58  ;;  %v1063_v58 = vld [vmem:[%s1369_s19 + $0x121] sm:$0xff] }
  0x79   : > { %657 = vmatmul.f32.gmra.mxu2 %v1673_v15  ;;  %v1069_v15 = vld [vmem:[%s1369_s19 + $0x181] sm:$0xff] }
  0x7a   : > { %1187 = vmatpush.msra.mxu2 %v1149_v49 }
  0x7b   : > { %307 = vmatmul.f32.gmra.mxu1 %v188_v2  ;;  %523 = vmatmul.f32.gmra.mxu0 %v1045_v3 }
  0x7c   : > { %1188 = vmatpush.msra.mxu2 %v1148_v55 }
  0x7e   : > { %1189 = vmatpush.msra.mxu2 %v1147_v56 }
  0x80   : > { %1190 = vmatpush.msra.mxu2 %v1146_v61  ;;  %732 = vmatmul.f32.gmra.mxu3 %v1477_v10  ;;  %v1065_v10 = vld [vmem:[%s1369_s19 + $0x141] sm:$0xff] }
  0x81   : > { %660 = vmatmul.f32.gmra.mxu2 %v1727_v34 }
  0x82   : > { %1191 = vmatpush.msra.mxu2 %v1145_v0 }
  0x83   : > { %310 = vmatmul.f32.gmra.mxu1 %v189_v4  ;;  %526 = vmatmul.f32.gmra.mxu0 %v1046_v6 }
  0x84   : > { %1192 = vmatpush.msra.mxu2 %v1144_v1 }
  0x86   : > { %1193 = vmatpush.msra.mxu2 %v1143_v60 }
  0x88   : > { %735 = vmatmul.f32.gmra.mxu3 %v1526_v26  ;;  %v1066_v26 = vld [vmem:[%s1369_s19 + $0x151] sm:$0xff] }
  0x89   : > { %663 = vmatmul.f32.gmra.mxu2 %v186_v52 }
  0x8b   : > { %579 = vmatmul.f32.vlgmr.msra.gmra.mxu1 %v1063_v58  ;;  %803 = vmatmul.f32.vlgmr.msra.gmra.mxu0 %v1464_v5 }
  0x90   : > { %738 = vmatmul.f32.gmra.mxu3 %v1381_v41  ;;  %v1094_v41 = vld [vmem:[%s1369_s19 + $0x80] sm:$0xff] }
  0x91   : > { %666 = vmatmul.f32.gmra.mxu2 %v187_v62 }
  0x93   : > { %582 = vmatmul.f32.gmra.mxu1 %v1064_v7  ;;  %806 = vmatmul.f32.gmra.mxu0 %v1513_v21  ;;  %v1067_v21 = vld [vmem:[%s1369_s19 + $0x161] sm:$0xff] }
  0x98   : > { %741 = vmatmul.f32.gmra.mxu3 %v1426_v57  ;;  %v1118_v57 = vld [vmem:[%s1369_s19 + $0x110] sm:$0xff]  ;;  %s1161_s19 = sshll.u32 %s1905_s13, 6 }
  0x99   : > { %669 = vmatmul.f32.gmra.mxu2 %v188_v2  ;;  %s1868_s17 = scalar_lea.vmem %s1901_s2, %s1161_s19 }
  0x9b   : > { %585 = vmatmul.f32.gmra.mxu1 %v1065_v10  ;;  %809 = vmatmul.f32.gmra.mxu0 %v1562_v37 }
  0xa0   : > { %744 = vmatmul.f32.gmra.mxu3 %v1474_v9 }
  0xa1   : > { %672 = vmatmul.f32.gmra.mxu2 %v189_v4 }
  0xa3   : > { %588 = vmatmul.f32.gmra.mxu1 %v1066_v26  ;;  %812 = vmatmul.f32.gmra.mxu0 %v1610_v54 }
  0xa8   : > { %v261_v5 = vpop.f32.mrf.mxu1  ;;  %v249_v8 = vpop.f32.mrf.mxu0  ;;  %747 = vmatmul.f32.gmra.mxu3 %v1523_v25 }
  0xa9   : > { %675 = vmatmul.f32.gmra.mxu2 %v1094_v41 }
  0xab   : > { %591 = vmatmul.f32.gmra.mxu1 %v1067_v21  ;;  %815 = vmatmul.f32.gmra.mxu0 %v1662_v11 }
  0xb0   : > { %v264_v37 = vpop.f32.mrf.mxu1  ;;  %v252_v9 = vpop.f32.mrf.mxu0  ;;  %750 = vmatmul.f32.gmra.mxu3 %v1118_v57 }
  0xb1   : > { %821 = vmatmul.f32.vlgmr.msra.gmra.mxu2 %v1758_v46 }
  0xb2   : > { %v356_v54 = vpop.f32.mrf.mxu2 }
  0xb3   : > { %594 = vmatmul.f32.gmra.mxu1 %v1068_v12  ;;  %818 = vmatmul.f32.gmra.mxu0 %v1714_v30 }
  0xb4   : > { %v431_v11 = vpop.f32.mrf.mxu3 }
  0xb8   : > { %v267_v14 = vpop.f32.mrf.mxu1  ;;  %v255_v16 = vpop.f32.mrf.mxu0 }
  0xb9   : > { %824 = vmatmul.f32.gmra.mxu2 %v1142_v13 }
  0xba   : > { %v359_v25 = vpop.f32.mrf.mxu2 }
  0xbb   : > { %597 = vmatmul.f32.gmra.mxu1 %v1069_v15 }
  0xbc   : > { %v434_v22 = vpop.f32.mrf.mxu3 }
  0xc0   : > { %v270_v17 = vpop.f32.mrf.mxu1  ;;  %v258_v19 = vpop.f32.mrf.mxu0 }
  0xc2   : > { %v362_v20 = vpop.f32.mrf.mxu2 }
  0xc3   : > { %600 = vmatmul.f32.gmra.mxu1 %v1070_v18 }
  0xc4   : > { %v437_v30 = vpop.f32.mrf.mxu3 }
  0xc8   : > { %v290_v23 = vpop.f32.mrf.mxu1  ;;  %v506_v24 = vpop.f32.mrf.mxu0 }
  0xc9   : > { %v291_v27 = vadd.f32 %v290_v23, %v249_v8 }
  0xca   : > { %v365_v29 = vpop.f32.mrf.mxu2 }
  0xcb   : > { %v380_v28 = vadd.f32 %v356_v54, %v291_v27 }
  0xcc   : > { %v1836_v36 = vpop.f32.mrf.mxu3 }
  0xd0   : > { %v293_v31 = vpop.f32.mrf.mxu1  ;;  %v509_v32 = vpop.f32.mrf.mxu0 }
  0xd1   : > { %v294_v33 = vadd.f32 %v293_v31, %v252_v9 }
  0xd3   : > { %v381_v34 = vadd.f32 %v359_v25, %v294_v33  ;;  %v368_v35 = vpop.f32.mrf.mxu2 }
  0xd5   : > { %v456_v13 = vadd.f32 %v434_v22, %v381_v34 }
  0xd7   : > { %v531_v25 = vadd.f32 %v509_v32, %v456_v13 }
  0xd8   : > { %v296_v38 = vpop.f32.mrf.mxu1  ;;  %v512_v39 = vpop.f32.mrf.mxu0 }
  0xd9   : > { %v297_v40 = vadd.f32 %v296_v38, %v255_v16  ;;  %v1838_v44 = vpop.f32.mrf.mxu3 }
  0xdb   : > { %v382_v42 = vadd.f32 %v362_v20, %v297_v40  ;;  %v371_v43 = vpop.f32.mrf.mxu2 }
  0xdd   : > { %v457_v23 = vadd.f32 %v437_v30, %v382_v42 }
  0xe0   : > { %v299_v45 = vpop.f32.mrf.mxu1  ;;  %v1840_v46 = vpop.f32.mrf.mxu0 }
  0xe1   : > { %v300_v48 = vadd.f32 %v299_v45, %v258_v19 }
  0xe2   : > { %v1842_v52 = vpop.f32.mrf.mxu3 }
  0xe3   : > { %v383_v49 = vadd.f32 %v365_v29, %v300_v48  ;;  %v374_v50 = vpop.f32.mrf.mxu2 }
  0xe8   : > { %v302_v53 = vpop.f32.mrf.mxu1  ;;  %v1844_v47 = vpop.f32.mrf.mxu0 }
  0xe9   : > { %v303_v55 = vadd.f32 %v302_v53, %v261_v5  ;;  %v455_v5 = vadd.f32 %v431_v11, %v380_v28  ;;  %v532_v28 = vadd.f32 %v512_v39, %v457_v23 }
  0xeb   : > { %v1846_v51 = vadd.f32 %v368_v35, %v303_v55  ;;  %v377_v56 = vpop.f32.mrf.mxu2  ;;  %v1848_v59 = vpop.f32.mrf.mxu3 }
  0xf0   : > { %v305_v61 = vpop.f32.mrf.mxu1  ;;  %v1850_v62 = vpop.f32.mrf.mxu0 }
  0xf1   : > { %v306_v63 = vadd.f32 %v305_v61, %v264_v37  ;;  %v530_v37 = vadd.f32 %v506_v24, %v455_v5 }
  0xf3   : > { %v1852_v0 = vadd.f32 %v371_v43, %v306_v63  ;;  %v655_v1 = vpop.f32.mrf.mxu2  ;;  %v1854_v60 = vpop.f32.mrf.mxu3  ;;  %v458_v43 = vadd.f32 %v1836_v36, %v383_v49 }
  0xf5   : > { %v533_v42 = vadd.f32 %v1840_v46, %v458_v43 }
  0xf8   : > { %v308_v2 = vpop.f32.mrf.mxu1  ;;  %v1856_v3 = vpop.f32.mrf.mxu0 }
  0xf9   : > { %v309_v4 = vadd.f32 %v308_v2, %v267_v14 }
  0xfb   : > { %v1858_v6 = vadd.f32 %v374_v50, %v309_v4  ;;  %v730_v7 = vpop.f32.mrf.mxu3 }
  0xfc   : > { %v658_v58 = vpop.f32.mrf.mxu2 }
 0x100   : > { %v311_v10 = vpop.f32.mrf.mxu1  ;;  %v1860_v26 = vpop.f32.mrf.mxu0 }
 0x101   : > { %v312_v41 = vadd.f32 %v311_v10, %v270_v17 }
 0x103   : > { %v1862_v21 = vadd.f32 %v377_v56, %v312_v41  ;;  %v733_v57 = vpop.f32.mrf.mxu3 }
 0x104   : > { %v661_v8 = vpop.f32.mrf.mxu2 }
 0x108   : > { %v580_v12 = vpop.f32.mrf.mxu1  ;;  %v804_v9 = vpop.f32.mrf.mxu0 }
 0x109   : > { %v604_v54 = vadd.f32 %v580_v12, %v530_v37  ;;  %v460_v37 = vadd.f32 %v1842_v52, %v1852_v0 }
 0x10b   : > { %v679_v14 = vadd.f32 %v655_v1, %v604_v54  ;;  %v736_v17 = vpop.f32.mrf.mxu3  ;;  %v459_v1 = vadd.f32 %v1838_v44, %v1846_v51  ;;  %v535_v54 = vadd.f32 %v1850_v62, %v460_v37 }
 0x10c   : > { %v664_v15 = vpop.f32.mrf.mxu2 }
 0x10d   : > { %v754_v16 = vadd.f32 %v730_v7, %v679_v14  ;;  %v534_v7 = vadd.f32 %v1844_v47, %v459_v1 }
 0x10f   : > { %v828_v11 = vadd.f32 %v804_v9, %v754_v16 }
 0x110   : > { %v583_v18 = vpop.f32.mrf.mxu1  ;;  %v807_v19 = vpop.f32.mrf.mxu0 }
 0x111   : > { %836 = vst [vmem:[%s1868_s17] sm:$0xff] %v828_v11  ;;  %v605_v20 = vadd.f32 %v583_v18, %v531_v25  ;;  %v858_v34 = vmul.f32 %v828_v11, %v828_v11 }
 0x113   : > { %v680_v22 = vadd.f32 %v658_v58, %v605_v20  ;;  %v739_v40 = vpop.f32.mrf.mxu3 }
 0x114   : > { %v667_v24 = vpop.f32.mrf.mxu2 }
 0x115   : > { %v755_v27 = vadd.f32 %v733_v57, %v680_v22 }
 0x117   : > { %v829_v29 = vadd.f32 %v807_v19, %v755_v27 }
 0x118   : > { %v586_v31 = vpop.f32.mrf.mxu1  ;;  %v810_v33 = vpop.f32.mrf.mxu0 }
 0x119   : > { %837 = vst [vmem:[%s1868_s17 + $0x8] sm:$0xff] %v829_v29  ;;  %v844_v35 = vadd.f32 %v829_v29, %v828_v11  ;;  %v859_v32 = vmul.f32 %v829_v29, %v829_v29  ;;  %v606_v38 = vadd.f32 %v586_v31, %v532_v28  ;;  %v461_v11 = vadd.f32 %v1848_v59, %v1858_v6 }
 0x11a   : > { %v462_v29 = vadd.f32 %v1854_v60, %v1862_v21 }
 0x11b   : > { %v866_v45 = vadd.f32 %v859_v32, %v858_v34  ;;  %v681_v48 = vadd.f32 %v661_v8, %v606_v38  ;;  %v742_v36 = vpop.f32.mrf.mxu3  ;;  %v536_v19 = vadd.f32 %v1856_v3, %v461_v11 }
 0x11c   : > { %v670_v50 = vpop.f32.mrf.mxu2 }
 0x11d   : > { %v756_v30 = vadd.f32 %v736_v17, %v681_v48 }
 0x11f   : > { %v830_v53 = vadd.f32 %v810_v33, %v756_v30  ;;  %v537_v33 = vadd.f32 %v1860_v26, %v462_v29 }
 0x120   : > { %v589_v39 = vpop.f32.mrf.mxu1  ;;  %v813_v55 = vpop.f32.mrf.mxu0 }
 0x121   : > { %838 = vst [vmem:[%s1868_s17 + $0x10] sm:$0xff] %v830_v53  ;;  %v845_v56 = vadd.f32 %v844_v35, %v830_v53  ;;  %v860_v61 = vmul.f32 %v830_v53, %v830_v53  ;;  %v607_v63 = vadd.f32 %v589_v39, %v533_v42 }
 0x123   : > { %v867_v2 = vadd.f32 %v866_v45, %v860_v61  ;;  %v682_v4 = vadd.f32 %v664_v15, %v607_v63  ;;  %v745_v9 = vpop.f32.mrf.mxu3 }
 0x124   : > { %v673_v58 = vpop.f32.mrf.mxu2 }
 0x125   : > { %v757_v49 = vadd.f32 %v739_v40, %v682_v4 }
 0x127   : > { %v831_v10 = vadd.f32 %v813_v55, %v757_v49 }
 0x128   : > { %v592_v46 = vpop.f32.mrf.mxu1  ;;  %v816_v57 = vpop.f32.mrf.mxu0 }
 0x129   : > { %839 = vst [vmem:[%s1868_s17 + $0x18] sm:$0xff] %v831_v10  ;;  %v846_v41 = vadd.f32 %v845_v56, %v831_v10  ;;  %v861_v5 = vmul.f32 %v831_v10, %v831_v10  ;;  %v608_v8 = vadd.f32 %v592_v46, %v534_v7 }
 0x12b   : > { %v868_v12 = vadd.f32 %v867_v2, %v861_v5  ;;  %v683_v44 = vadd.f32 %v667_v24, %v608_v8  ;;  %v748_v23 = vpop.f32.mrf.mxu3 }
 0x12c   : > { %v676_v14 = vpop.f32.mrf.mxu2 }
 0x12d   : > { %v758_v51 = vadd.f32 %v742_v36, %v683_v44 }
 0x12f   : > { %v832_v13 = vadd.f32 %v816_v57, %v758_v51 }
 0x130   : > { %v595_v47 = vpop.f32.mrf.mxu1  ;;  %v819_v52 = vpop.f32.mrf.mxu0 }
 0x131   : > { %840 = vst [vmem:[%s1868_s17 + $0x20] sm:$0xff] %v832_v13  ;;  %v847_v15 = vadd.f32 %v846_v41, %v832_v13  ;;  %v862_v16 = vmul.f32 %v832_v13, %v832_v13  ;;  %v609_v25 = vadd.f32 %v595_v47, %v535_v54 }
 0x133   : > { %v869_v17 = vadd.f32 %v868_v12, %v862_v16  ;;  %v684_v18 = vadd.f32 %v670_v50, %v609_v25  ;;  %v751_v40 = vpop.f32.mrf.mxu3 }
 0x134   : > { %v822_v28 = vpop.f32.mrf.mxu2 }
 0x135   : > { %v759_v0 = vadd.f32 %v745_v9, %v684_v18 }
 0x137   : > { %v833_v20 = vadd.f32 %v819_v52, %v759_v0 }
 0x138   : > { %v598_v62 = vpop.f32.mrf.mxu1 }
 0x139   : > { %841 = vst [vmem:[%s1868_s17 + $0x28] sm:$0xff] %v833_v20  ;;  %v848_v22 = vadd.f32 %v847_v15, %v833_v20  ;;  %v863_v24 = vmul.f32 %v833_v20, %v833_v20  ;;  %v610_v27 = vadd.f32 %v598_v62, %v536_v19 }
 0x13b   : > { %v870_v31 = vadd.f32 %v869_v17, %v863_v24  ;;  %v685_v59 = vadd.f32 %v673_v58, %v610_v27 }
 0x13c   : > { %v825_v48 = vpop.f32.mrf.mxu2 }
 0x13d   : > { %v760_v6 = vadd.f32 %v748_v23, %v685_v59 }
 0x13f   : > { %v834_v34 = vadd.f32 %v822_v28, %v760_v6 }
 0x140   : > { %v601_v3 = vpop.f32.mrf.mxu1 }
 0x141   : > { %842 = vst [vmem:[%s1868_s17 + $0x30] sm:$0xff] %v834_v34  ;;  %v849_v35 = vadd.f32 %v848_v22, %v834_v34  ;;  %v864_v32 = vmul.f32 %v834_v34, %v834_v34  ;;  %v611_v38 = vadd.f32 %v601_v3, %v537_v33 }
 0x143   : > { %v871_v43 = vadd.f32 %v870_v31, %v864_v32  ;;  %v686_v45 = vadd.f32 %v676_v14, %v611_v38 }
 0x145   : > { %v761_v50 = vadd.f32 %v751_v40, %v686_v45 }
 0x147   : > { %v835_v30 = vadd.f32 %v825_v48, %v761_v50 }
 0x149   : > { %843 = vst [vmem:[%s1868_s17 + $0x38] sm:$0xff] %v835_v30  ;;  %v850_v60 = vadd.f32 %v849_v35, %v835_v30  ;;  %v865_v21 = vmul.f32 %v835_v30, %v835_v30 }
 0x14b   : > { %v851_v42 = vrot.slane %v850_v60, 4  ;;  %v872_v53 = vadd.f32 %v871_v43, %v865_v21 }
 0x14d   : > { %v852_v39 = vadd.f32 %v851_v42, %v850_v60  ;;  %v873_v26 = vrot.slane %v872_v53, 4 }
 0x14f   : > { %v853_v55 = vrot.slane %v852_v39, 2  ;;  %v874_v56 = vadd.f32 %v873_v26, %v872_v53 }
 0x151   : > { %v854_v61 = vadd.f32 %v853_v55, %v852_v39  ;;  %v875_v63 = vrot.slane %v874_v56, 2 }
 0x153   : > { %v855_v1 = vrot.slane %v854_v61, 1  ;;  %v876_v2 = vadd.f32 %v875_v63, %v874_v56 }
 0x155   : > { %v856_v4 = vadd.f32 %v855_v1, %v854_v61  ;;  %v877_v36 = vrot.slane %v876_v2, 1 }
 0x157   : > { %857 = vst [vmem:[%s181_s22] sm:$0x1] %v856_v4  ;;  %v878_v49 = vadd.f32 %v877_v36, %v876_v2 }
 0x159   : > { %879 = vst [vmem:[%s181_s22 + $0x1] sm:$0x1] %v878_v49 }
 0x15a PF: > { %s14_s12 = sadd.s32 1, %s1209_s12  }
 0x15b   : > { %p11_p4 = scmp.ge.s32.totalorder %s14_s12, 4  }
 0x15d   :  { %13 = sbr.rel (!%p11_p4) target bundleno = 1 (0x1), region = 83 }

// kernel: bottleneck_forward.11
= control target key start
LH: loop header
LB: loop body
LE: loop exit
PB: predicated region body
PF: predicated region fallthrough
CT: control target
= control target key end

     0   :  { %s744_s1 = inlined_call_operand.vmem [shape: f32[128,128], index: 1, kind: input, shape index: {}]   ;;  %s745_s0 = inlined_call_operand.vmem [shape: f32[256,128], index: 0, kind: input, shape index: {}]   ;;  %s746_s2 = inlined_call_operand.vmem [shape: f32[256,128], index: 2, kind: output, shape index: {0}]   ;;  %s747_s3 = inlined_call_operand.vmem [shape: f32[1,2,128], index: 3, kind: output, shape index: {1}]  }
   0x1   :  { %v60_v0 = vld [vmem:[%s744_s1 + $0x78] sm:$0xff]  ;;  %v59_v1 = vld [vmem:[%s744_s1 + $0x70] sm:$0xff]  ;;  %v58_v2 = vld [vmem:[%s744_s1 + $0x68] sm:$0xff] }
   0x2   :  { %61 = vmatpush.msra.mxu0 %v60_v0  ;;  %322 = vmatpush.msra.mxu1 %v60_v0  ;;  %v57_v3 = vld [vmem:[%s744_s1 + $0x60] sm:$0xff]  ;;  %v56_v4 = vld [vmem:[%s744_s1 + $0x58] sm:$0xff]  ;;  %v55_v5 = vld [vmem:[%s744_s1 + $0x50] sm:$0xff] }
   0x3   :  { %323 = vmatpush.msra.mxu2 %v60_v0  ;;  %324 = vmatpush.msra.mxu3 %v60_v0  ;;  %v54_v6 = vld [vmem:[%s744_s1 + $0x48] sm:$0xff]  ;;  %v53_v7 = vld [vmem:[%s744_s1 + $0x40] sm:$0xff]  ;;  %v52_v8 = vld [vmem:[%s744_s1 + $0x38] sm:$0xff] }
   0x4   :  { %62 = vmatpush.msra.mxu0 %v59_v1  ;;  %325 = vmatpush.msra.mxu1 %v59_v1  ;;  %v51_v9 = vld [vmem:[%s744_s1 + $0x30] sm:$0xff]  ;;  %v50_v10 = vld [vmem:[%s744_s1 + $0x28] sm:$0xff]  ;;  %v49_v11 = vld [vmem:[%s744_s1 + $0x20] sm:$0xff] }
   0x5   :  { %326 = vmatpush.msra.mxu2 %v59_v1  ;;  %327 = vmatpush.msra.mxu3 %v59_v1  ;;  %v48_v12 = vld [vmem:[%s744_s1 + $0x18] sm:$0xff]  ;;  %v47_v13 = vld [vmem:[%s744_s1 + $0x10] sm:$0xff]  ;;  %v46_v14 = vld [vmem:[%s744_s1 + $0x8] sm:$0xff] }
   0x6   :  { %63 = vmatpush.msra.mxu0 %v58_v2  ;;  %328 = vmatpush.msra.mxu1 %v58_v2  ;;  %v45_v15 = vld [vmem:[%s744_s1] sm:$0xff]  ;;  %v14_v19 = vld [vmem:[%s745_s0 + $0x8] sm:$0xff]  ;;  %v15_v23 = vld [vmem:[%s745_s0 + $0x10] sm:$0xff] }
   0x7   :  { %329 = vmatpush.msra.mxu2 %v58_v2  ;;  %330 = vmatpush.msra.mxu3 %v58_v2  ;;  %v13_v16 = vld [vmem:[%s745_s0] sm:$0xff]  ;;  %v22_v20 = vld [vmem:[%s745_s0 + $0x48] sm:$0xff]  ;;  %v23_v24 = vld [vmem:[%s745_s0 + $0x50] sm:$0xff] }
   0x8   :  { %64 = vmatpush.msra.mxu0 %v57_v3  ;;  %331 = vmatpush.msra.mxu1 %v57_v3  ;;  %v21_v17 = vld [vmem:[%s745_s0 + $0x40] sm:$0xff]  ;;  %v30_v21 = vld [vmem:[%s745_s0 + $0x88] sm:$0xff]  ;;  %v31_v25 = vld [vmem:[%s745_s0 + $0x90] sm:$0xff] }
   0x9   :  { %332 = vmatpush.msra.mxu2 %v57_v3  ;;  %333 = vmatpush.msra.mxu3 %v57_v3  ;;  %v29_v18 = vld [vmem:[%s745_s0 + $0x80] sm:$0xff]  ;;  %v38_v26 = vld [vmem:[%s745_s0 + $0xc8] sm:$0xff]  ;;  %v16_v27 = vld [vmem:[%s745_s0 + $0x18] sm:$0xff] }
   0xa   :  { %65 = vmatpush.msra.mxu0 %v56_v4  ;;  %334 = vmatpush.msra.mxu1 %v56_v4  ;;  %v37_v22 = vld [vmem:[%s745_s0 + $0xc0] sm:$0xff]  ;;  %v24_v28 = vld [vmem:[%s745_s0 + $0x58] sm:$0xff]  ;;  %v39_v30 = vld [vmem:[%s745_s0 + $0xd0] sm:$0xff] }
   0xb   :  { %335 = vmatpush.msra.mxu2 %v56_v4  ;;  %336 = vmatpush.msra.mxu3 %v56_v4  ;;  %v32_v29 = vld [vmem:[%s745_s0 + $0x98] sm:$0xff]  ;;  %v17_v31 = vld [vmem:[%s745_s0 + $0x20] sm:$0xff]  ;;  %v18_v35 = vld [vmem:[%s745_s0 + $0x28] sm:$0xff] }
   0xc   :  { %66 = vmatpush.msra.mxu0 %v55_v5  ;;  %337 = vmatpush.msra.mxu1 %v55_v5  ;;  %v25_v32 = vld [vmem:[%s745_s0 + $0x60] sm:$0xff]  ;;  %v40_v33 = vld [vmem:[%s745_s0 + $0xd8] sm:$0xff]  ;;  %v26_v36 = vld [vmem:[%s745_s0 + $0x68] sm:$0xff] }
   0xd   :  { %338 = vmatpush.msra.mxu2 %v55_v5  ;;  %339 = vmatpush.msra.mxu3 %v55_v5  ;;  %v33_v34 = vld [vmem:[%s745_s0 + $0xa0] sm:$0xff]  ;;  %v34_v38 = vld [vmem:[%s745_s0 + $0xa8] sm:$0xff]  ;;  %v19_v39 = vld [vmem:[%s745_s0 + $0x30] sm:$0xff] }
   0xe   :  { %67 = vmatpush.msra.mxu0 %v54_v6  ;;  %340 = vmatpush.msra.mxu1 %v54_v6  ;;  %v41_v37 = vld [vmem:[%s745_s0 + $0xe0] sm:$0xff]  ;;  %v27_v40 = vld [vmem:[%s745_s0 + $0x70] sm:$0xff]  ;;  %v42_v41 = vld [vmem:[%s745_s0 + $0xe8] sm:$0xff] }
   0xf   :  { %341 = vmatpush.msra.mxu2 %v54_v6  ;;  %342 = vmatpush.msra.mxu3 %v54_v6  ;;  %v35_v42 = vld [vmem:[%s745_s0 + $0xb0] sm:$0xff]  ;;  %v20_v43 = vld [vmem:[%s745_s0 + $0x38] sm:$0xff] }
  0x10   :  { %68 = vmatpush.msra.mxu0 %v53_v7  ;;  %343 = vmatpush.msra.mxu1 %v53_v7  ;;  %v28_v44 = vld [vmem:[%s745_s0 + $0x78] sm:$0xff]  ;;  %v43_v45 = vld [vmem:[%s745_s0 + $0xf0] sm:$0xff] }
  0x11   :  { %344 = vmatpush.msra.mxu2 %v53_v7  ;;  %345 = vmatpush.msra.mxu3 %v53_v7  ;;  %v36_v46 = vld [vmem:[%s745_s0 + $0xb8] sm:$0xff] }
  0x12   :  { %69 = vmatpush.msra.mxu0 %v52_v8  ;;  %346 = vmatpush.msra.mxu1 %v52_v8  ;;  %v44_v47 = vld [vmem:[%s745_s0 + $0xf8] sm:$0xff] }
  0x13   :  { %347 = vmatpush.msra.mxu2 %v52_v8  ;;  %348 = vmatpush.msra.mxu3 %v52_v8 }
  0x14   :  { %70 = vmatpush.msra.mxu0 %v51_v9  ;;  %349 = vmatpush.msra.mxu1 %v51_v9 }
  0x15   :  { %350 = vmatpush.msra.mxu2 %v51_v9  ;;  %351 = vmatpush.msra.mxu3 %v51_v9 }
  0x16   :  { %71 = vmatpush.msra.mxu0 %v50_v10  ;;  %352 = vmatpush.msra.mxu1 %v50_v10 }
  0x17   :  { %353 = vmatpush.msra.mxu2 %v50_v10  ;;  %354 = vmatpush.msra.mxu3 %v50_v10 }
  0x18   :  { %72 = vmatpush.msra.mxu0 %v49_v11  ;;  %355 = vmatpush.msra.mxu1 %v49_v11 }
  0x19   :  { %356 = vmatpush.msra.mxu2 %v49_v11  ;;  %357 = vmatpush.msra.mxu3 %v49_v11 }
  0x1a   :  { %73 = vmatpush.msra.mxu0 %v48_v12  ;;  %358 = vmatpush.msra.mxu1 %v48_v12 }
  0x1b   :  { %359 = vmatpush.msra.mxu2 %v48_v12  ;;  %360 = vmatpush.msra.mxu3 %v48_v12 }
  0x1c   :  { %74 = vmatpush.msra.mxu0 %v47_v13  ;;  %361 = vmatpush.msra.mxu1 %v47_v13 }
  0x1d   :  { %362 = vmatpush.msra.mxu2 %v47_v13  ;;  %363 = vmatpush.msra.mxu3 %v47_v13 }
  0x1e   :  { %75 = vmatpush.msra.mxu0 %v46_v14  ;;  %364 = vmatpush.msra.mxu1 %v46_v14 }
  0x1f   :  { %365 = vmatpush.msra.mxu2 %v46_v14  ;;  %366 = vmatpush.msra.mxu3 %v46_v14 }
  0x20   :  { %76 = vmatpush.msra.mxu0 %v45_v15  ;;  %367 = vmatpush.msra.mxu1 %v45_v15 }
  0x21   :  { %77 = vmatmul.f32.vlgmr.msra.gmra.mxu0 %v13_v16  ;;  %101 = vmatmul.f32.vlgmr.msra.gmra.mxu1 %v21_v17 }
  0x22   :  { %368 = vmatpush.msra.mxu2 %v45_v15  ;;  %369 = vmatpush.msra.mxu3 %v45_v15 }
  0x23   :  { %125 = vmatmul.f32.vlgmr.msra.gmra.mxu2 %v29_v18  ;;  %149 = vmatmul.f32.vlgmr.msra.gmra.mxu3 %v37_v22 }
  0x29   :  { %80 = vmatmul.f32.gmra.mxu0 %v14_v19  ;;  %104 = vmatmul.f32.gmra.mxu1 %v22_v20 }
  0x2b   :  { %128 = vmatmul.f32.gmra.mxu2 %v30_v21  ;;  %152 = vmatmul.f32.gmra.mxu3 %v38_v26 }
  0x31   :  { %83 = vmatmul.f32.gmra.mxu0 %v15_v23  ;;  %107 = vmatmul.f32.gmra.mxu1 %v23_v24 }
  0x33   :  { %131 = vmatmul.f32.gmra.mxu2 %v31_v25  ;;  %155 = vmatmul.f32.gmra.mxu3 %v39_v30 }
  0x39   :  { %86 = vmatmul.f32.gmra.mxu0 %v16_v27  ;;  %110 = vmatmul.f32.gmra.mxu1 %v24_v28 }
  0x3b   :  { %134 = vmatmul.f32.gmra.mxu2 %v32_v29  ;;  %158 = vmatmul.f32.gmra.mxu3 %v40_v33 }
  0x41   :  { %89 = vmatmul.f32.gmra.mxu0 %v17_v31  ;;  %113 = vmatmul.f32.gmra.mxu1 %v25_v32 }
  0x43   :  { %137 = vmatmul.f32.gmra.mxu2 %v33_v34  ;;  %161 = vmatmul.f32.gmra.mxu3 %v41_v37 }
  0x49   :  { %92 = vmatmul.f32.gmra.mxu0 %v18_v35  ;;  %116 = vmatmul.f32.gmra.mxu1 %v26_v36 }
  0x4b   :  { %140 = vmatmul.f32.gmra.mxu2 %v34_v38  ;;  %164 = vmatmul.f32.gmra.mxu3 %v42_v41 }
  0x51   :  { %95 = vmatmul.f32.gmra.mxu0 %v19_v39  ;;  %119 = vmatmul.f32.gmra.mxu1 %v27_v40 }
  0x53   :  { %143 = vmatmul.f32.gmra.mxu2 %v35_v42  ;;  %167 = vmatmul.f32.gmra.mxu3 %v43_v45 }
  0x59   :  { %98 = vmatmul.f32.gmra.mxu0 %v20_v43  ;;  %122 = vmatmul.f32.gmra.mxu1 %v28_v44 }
  0x5b   :  { %146 = vmatmul.f32.gmra.mxu2 %v36_v46  ;;  %170 = vmatmul.f32.gmra.mxu3 %v44_v47 }
  0x9e   :  { %v78_v48 = vpop.f32.mrf.mxu0  ;;  %v534_v49 = vpop.f32.mrf.mxu1 }
  0x9f   :  { %174 = vst [vmem:[%s746_s2] sm:$0xff] %v78_v48  ;;  %v244_v6 = vmul.f32 %v78_v48, %v78_v48  ;;  %v252_v34 = vmul.f32 %v534_v49, %v534_v49 }
  0xa0   :  { %182 = vst [vmem:[%s746_s2 + $0x40] sm:$0xff] %v534_v49 }
  0xa6   :  { %v81_v50 = vpop.f32.mrf.mxu0  ;;  %v543_v51 = vpop.f32.mrf.mxu1 }
  0xa7   :  { %175 = vst [vmem:[%s746_s2 + $0x8] sm:$0xff] %v81_v50  ;;  %v548_v52 = vpop.f32.mrf.mxu2  ;;  %v565_v56 = vpop.f32.mrf.mxu3  ;;  %v245_v5 = vmul.f32 %v81_v50, %v81_v50  ;;  %v206_v7 = vadd.f32 %v81_v50, %v78_v48  ;;  %v253_v37 = vmul.f32 %v543_v51, %v543_v51 }
  0xa8   :  { %183 = vst [vmem:[%s746_s2 + $0x48] sm:$0xff] %v543_v51 }
  0xa9   :  { %190 = vst [vmem:[%s746_s2 + $0x80] sm:$0xff] %v548_v52  ;;  %v276_v9 = vadd.f32 %v245_v5, %v244_v6 }
  0xaa   :  { %198 = vst [vmem:[%s746_s2 + $0xc0] sm:$0xff] %v565_v56 }
  0xae   :  { %v84_v53 = vpop.f32.mrf.mxu0  ;;  %v558_v54 = vpop.f32.mrf.mxu1 }
  0xaf   :  { %176 = vst [vmem:[%s746_s2 + $0x10] sm:$0xff] %v84_v53  ;;  %v563_v55 = vpop.f32.mrf.mxu2  ;;  %v586_v60 = vpop.f32.mrf.mxu3  ;;  %v246_v8 = vmul.f32 %v84_v53, %v84_v53  ;;  %v207_v10 = vadd.f32 %v206_v7, %v84_v53  ;;  %v254_v40 = vmul.f32 %v558_v54, %v558_v54 }
  0xb0   :  { %184 = vst [vmem:[%s746_s2 + $0x50] sm:$0xff] %v558_v54 }
  0xb1   :  { %191 = vst [vmem:[%s746_s2 + $0x88] sm:$0xff] %v563_v55  ;;  %v277_v14 = vadd.f32 %v276_v9, %v246_v8 }
  0xb2   :  { %199 = vst [vmem:[%s746_s2 + $0xc8] sm:$0xff] %v586_v60 }
  0xb6   :  { %v87_v57 = vpop.f32.mrf.mxu0  ;;  %v579_v58 = vpop.f32.mrf.mxu1 }
  0xb7   :  { %177 = vst [vmem:[%s746_s2 + $0x18] sm:$0xff] %v87_v57  ;;  %v584_v59 = vpop.f32.mrf.mxu2  ;;  %v607_v0 = vpop.f32.mrf.mxu3  ;;  %v247_v11 = vmul.f32 %v87_v57, %v87_v57  ;;  %v208_v15 = vadd.f32 %v207_v10, %v87_v57  ;;  %v255_v43 = vmul.f32 %v579_v58, %v579_v58 }
  0xb8   :  { %185 = vst [vmem:[%s746_s2 + $0x58] sm:$0xff] %v579_v58 }
  0xb9   :  { %192 = vst [vmem:[%s746_s2 + $0x90] sm:$0xff] %v584_v59  ;;  %v278_v19 = vadd.f32 %v277_v14, %v247_v11 }
  0xba   :  { %200 = vst [vmem:[%s746_s2 + $0xd0] sm:$0xff] %v607_v0 }
  0xbe   :  { %v90_v61 = vpop.f32.mrf.mxu0  ;;  %v600_v62 = vpop.f32.mrf.mxu1 }
  0xbf   :  { %178 = vst [vmem:[%s746_s2 + $0x20] sm:$0xff] %v90_v61  ;;  %v605_v63 = vpop.f32.mrf.mxu2  ;;  %v628_v4 = vpop.f32.mrf.mxu3  ;;  %v248_v16 = vmul.f32 %v90_v61, %v90_v61  ;;  %v209_v20 = vadd.f32 %v208_v15, %v90_v61  ;;  %v256_v48 = vmul.f32 %v600_v62, %v600_v62 }
  0xc0   :  { %186 = vst [vmem:[%s746_s2 + $0x60] sm:$0xff] %v600_v62  ;;  %v263_v15 = vmul.f32 %v605_v63, %v605_v63 }
  0xc1   :  { %193 = vst [vmem:[%s746_s2 + $0x98] sm:$0xff] %v605_v63  ;;  %v279_v22 = vadd.f32 %v278_v19, %v248_v16 }
  0xc2   :  { %201 = vst [vmem:[%s746_s2 + $0xd8] sm:$0xff] %v628_v4 }
  0xc6   :  { %v93_v1 = vpop.f32.mrf.mxu0  ;;  %v621_v2 = vpop.f32.mrf.mxu1 }
  0xc7   :  { %179 = vst [vmem:[%s746_s2 + $0x28] sm:$0xff] %v93_v1  ;;  %v626_v3 = vpop.f32.mrf.mxu2  ;;  %v647_v18 = vpop.f32.mrf.mxu3  ;;  %v249_v21 = vmul.f32 %v93_v1, %v93_v1  ;;  %v210_v23 = vadd.f32 %v209_v20, %v93_v1  ;;  %v257_v53 = vmul.f32 %v621_v2, %v621_v2 }
  0xc8   :  { %187 = vst [vmem:[%s746_s2 + $0x68] sm:$0xff] %v621_v2 }
  0xc9   :  { %194 = vst [vmem:[%s746_s2 + $0xa0] sm:$0xff] %v626_v3  ;;  %v280_v25 = vadd.f32 %v279_v22, %v249_v21 }
  0xca   :  { %202 = vst [vmem:[%s746_s2 + $0xe0] sm:$0xff] %v647_v18 }
  0xce   :  { %v96_v12 = vpop.f32.mrf.mxu0  ;;  %v120_v13 = vpop.f32.mrf.mxu1 }
  0xcf   :  { %180 = vst [vmem:[%s746_s2 + $0x30] sm:$0xff] %v96_v12  ;;  %v645_v17 = vpop.f32.mrf.mxu2  ;;  %v250_v24 = vmul.f32 %v96_v12, %v96_v12  ;;  %v211_v26 = vadd.f32 %v210_v23, %v96_v12  ;;  %v663_v33 = vpop.f32.mrf.mxu3  ;;  %v258_v61 = vmul.f32 %v120_v13, %v120_v13  ;;  %v262_v12 = vmul.f32 %v584_v59, %v584_v59 }
  0xd0   :  { %188 = vst [vmem:[%s746_s2 + $0x70] sm:$0xff] %v120_v13  ;;  %v265_v22 = vmul.f32 %v645_v17, %v645_v17 }
  0xd1   :  { %195 = vst [vmem:[%s746_s2 + $0xa8] sm:$0xff] %v645_v17  ;;  %v281_v29 = vadd.f32 %v280_v25, %v250_v24 }
  0xd2   :  { %203 = vst [vmem:[%s746_s2 + $0xe8] sm:$0xff] %v663_v33 }
  0xd6   :  { %v99_v27 = vpop.f32.mrf.mxu0  ;;  %v123_v28 = vpop.f32.mrf.mxu1 }
  0xd7   :  { %181 = vst [vmem:[%s746_s2 + $0x38] sm:$0xff] %v99_v27  ;;  %v212_v30 = vadd.f32 %v211_v26, %v99_v27  ;;  %v251_v31 = vmul.f32 %v99_v27, %v99_v27  ;;  %v144_v32 = vpop.f32.mrf.mxu2  ;;  %v168_v47 = vpop.f32.mrf.mxu3  ;;  %v259_v1 = vmul.f32 %v123_v28, %v123_v28 }
  0xd8   :  { %189 = vst [vmem:[%s746_s2 + $0x78] sm:$0xff] %v123_v28  ;;  %v266_v25 = vmul.f32 %v144_v32, %v144_v32 }
  0xd9   :  { %v213_v35 = vadd.f32 %v212_v30, %v534_v49  ;;  %v282_v36 = vadd.f32 %v281_v29, %v251_v31  ;;  %196 = vst [vmem:[%s746_s2 + $0xb0] sm:$0xff] %v144_v32 }
  0xda   :  { %204 = vst [vmem:[%s746_s2 + $0xf0] sm:$0xff] %v168_v47 }
  0xdb   :  { %v214_v38 = vadd.f32 %v213_v35, %v543_v51  ;;  %v283_v39 = vadd.f32 %v282_v36, %v252_v34  ;;  %v271_v36 = vmul.f32 %v628_v4, %v628_v4 }
  0xdd   :  { %v215_v41 = vadd.f32 %v214_v38, %v558_v54  ;;  %v284_v42 = vadd.f32 %v283_v39, %v253_v37 }
  0xdf   :  { %v285_v44 = vadd.f32 %v284_v42, %v254_v40  ;;  %v216_v45 = vadd.f32 %v215_v41, %v579_v58  ;;  %v147_v46 = vpop.f32.mrf.mxu2  ;;  %v171_v7 = vpop.f32.mrf.mxu3  ;;  %v273_v41 = vmul.f32 %v663_v33, %v663_v33 }
  0xe0   :  { %197 = vst [vmem:[%s746_s2 + $0xb8] sm:$0xff] %v147_v46  ;;  %v267_v26 = vmul.f32 %v147_v46, %v147_v46 }
  0xe1   :  { %v217_v49 = vadd.f32 %v216_v45, %v600_v62  ;;  %v286_v50 = vadd.f32 %v285_v44, %v255_v43  ;;  %205 = vst [vmem:[%s746_s2 + $0xf8] sm:$0xff] %v171_v7  ;;  %v260_v62 = vmul.f32 %v548_v52, %v548_v52  ;;  %v274_v44 = vmul.f32 %v168_v47, %v168_v47 }
  0xe2   :  { %v275_v45 = vmul.f32 %v171_v7, %v171_v7 }
  0xe3   :  { %v218_v51 = vadd.f32 %v217_v49, %v621_v2  ;;  %v287_v54 = vadd.f32 %v286_v50, %v256_v48  ;;  %v261_v2 = vmul.f32 %v563_v55, %v563_v55 }
  0xe5   :  { %v288_v57 = vadd.f32 %v287_v54, %v257_v53  ;;  %v219_v58 = vadd.f32 %v218_v51, %v120_v13 }
  0xe7   :  { %v289_v5 = vadd.f32 %v288_v57, %v258_v61  ;;  %v220_v6 = vadd.f32 %v219_v58, %v123_v28 }
  0xe9   :  { %v221_v8 = vadd.f32 %v220_v6, %v548_v52  ;;  %v290_v9 = vadd.f32 %v289_v5, %v259_v1  ;;  %v264_v52 = vmul.f32 %v626_v3, %v626_v3 }
  0xeb   :  { %v222_v10 = vadd.f32 %v221_v8, %v563_v55  ;;  %v291_v11 = vadd.f32 %v290_v9, %v260_v62 }
  0xed   :  { %v223_v13 = vadd.f32 %v222_v10, %v584_v59  ;;  %v292_v14 = vadd.f32 %v291_v11, %v261_v2 }
  0xef   :  { %v293_v16 = vadd.f32 %v292_v14, %v262_v12  ;;  %v224_v19 = vadd.f32 %v223_v13, %v605_v63  ;;  %v268_v63 = vmul.f32 %v565_v56, %v565_v56 }
  0xf1   :  { %v225_v20 = vadd.f32 %v224_v19, %v626_v3  ;;  %v294_v21 = vadd.f32 %v293_v16, %v263_v15  ;;  %v269_v3 = vmul.f32 %v586_v60, %v586_v60 }
  0xf3   :  { %v226_v55 = vadd.f32 %v225_v20, %v645_v17  ;;  %v295_v23 = vadd.f32 %v294_v21, %v264_v52  ;;  %v270_v17 = vmul.f32 %v607_v0, %v607_v0 }
  0xf5   :  { %v296_v59 = vadd.f32 %v295_v23, %v265_v22  ;;  %v227_v24 = vadd.f32 %v226_v55, %v144_v32 }
  0xf7   :  { %v297_v27 = vadd.f32 %v296_v59, %v266_v25  ;;  %v228_v28 = vadd.f32 %v227_v24, %v147_v46 }
  0xf9   :  { %v229_v29 = vadd.f32 %v228_v28, %v565_v56  ;;  %v298_v30 = vadd.f32 %v297_v27, %v267_v26  ;;  %v272_v56 = vmul.f32 %v647_v18, %v647_v18 }
  0xfb   :  { %v230_v31 = vadd.f32 %v229_v29, %v586_v60  ;;  %v299_v34 = vadd.f32 %v298_v30, %v268_v63 }
  0xfd   :  { %v231_v32 = vadd.f32 %v230_v31, %v607_v0  ;;  %v300_v35 = vadd.f32 %v299_v34, %v269_v3 }
  0xff   :  { %v301_v37 = vadd.f32 %v300_v35, %v270_v17  ;;  %v232_v38 = vadd.f32 %v231_v32, %v628_v4 }
 0x101   :  { %v233_v39 = vadd.f32 %v232_v38, %v647_v18  ;;  %v302_v40 = vadd.f32 %v301_v37, %v271_v36 }
 0x103   :  { %v234_v60 = vadd.f32 %v233_v39, %v663_v33  ;;  %v303_v42 = vadd.f32 %v302_v40, %v272_v56 }
 0x105   :  { %v304_v0 = vadd.f32 %v303_v42, %v273_v41  ;;  %v235_v43 = vadd.f32 %v234_v60, %v168_v47 }
 0x107   :  { %v305_v46 = vadd.f32 %v304_v0, %v274_v44  ;;  %v236_v48 = vadd.f32 %v235_v43, %v171_v7 }
 0x109   :  { %v237_v49 = vrot.slane %v236_v48, 4  ;;  %v306_v4 = vadd.f32 %v305_v46, %v275_v45 }
 0x10b   :  { %v238_v50 = vadd.f32 %v237_v49, %v236_v48  ;;  %v307_v51 = vrot.slane %v306_v4, 4 }
 0x10d   :  { %v239_v53 = vrot.slane %v238_v50, 2  ;;  %v308_v54 = vadd.f32 %v307_v51, %v306_v4 }
 0x10f   :  { %v240_v18 = vadd.f32 %v239_v53, %v238_v50  ;;  %v309_v57 = vrot.slane %v308_v54, 2 }
 0x111   :  { %v241_v58 = vrot.slane %v240_v18, 1  ;;  %v310_v61 = vadd.f32 %v309_v57, %v308_v54 }
 0x113   :  { %v242_v1 = vadd.f32 %v241_v58, %v240_v18  ;;  %v311_v5 = vrot.slane %v310_v61, 1 }
 0x115   :  { %243 = vst [vmem:[%s747_s3] sm:$0x1] %v242_v1  ;;  %v312_v33 = vadd.f32 %v311_v5, %v310_v61 }
 0x117   :  { %313 = vst [vmem:[%s747_s3 + $0x1] sm:$0x1] %v312_v33 }

// kernel: bottleneck_forward.13
= control target key start
LH: loop header
LB: loop body
LE: loop exit
PB: predicated region body
PF: predicated region fallthrough
CT: control target
= control target key end

     0   :  { %s806_s0 = inlined_call_operand.vmem [shape: f32[256,128], index: 0, kind: input, shape index: {}]   ;;  %s807_s1 = inlined_call_operand.vmem [shape: f32[256,128], index: 1, kind: input, shape index: {}]   ;;  %s808_s2 = inlined_call_operand.vmem [shape: f32[1,128], index: 2, kind: input, shape index: {}]   ;;  %s809_s3 = inlined_call_operand.vmem [shape: f32[1,128], index: 3, kind: input, shape index: {}]   ;;  %s810_s4 = inlined_call_operand.vmem [shape: f32[1,128], index: 4, kind: input, shape index: {}]   ;;  %s811_s5 = inlined_call_operand.vmem [shape: f32[1,128], index: 5, kind: input, shape index: {}]   ;;  %s812_s6 = inlined_call_operand.vmem [shape: f32[256,128], index: 6, kind: output, shape index: {}]  }
   0x1   :  { %v23_v0 = vld [vmem:[%s806_s0] sm:$0xff]  ;;  %v24_v7 = vld [vmem:[%s806_s0 + $0x8] sm:$0xff]  ;;  %v25_v13 = vld [vmem:[%s806_s0 + $0x10] sm:$0xff] }
   0x2   :  { %v376_v1 = vld [vmem:[%s808_s2] ss:$0 sm:$0xff]  ;;  %v128_v8 = vld [vmem:[%s807_s1 + $0x8] sm:$0xff]  ;;  %v129_v14 = vld [vmem:[%s807_s1 + $0x10] sm:$0xff] }
   0x3   :  { %v381_v2 = vld [vmem:[%s809_s3] ss:$0 sm:$0xff]  ;;  %v59_v4 = vmul.f32 %v376_v1, %v23_v0  ;;  %v60_v11 = vmul.f32 %v376_v1, %v24_v7  ;;  %v26_v15 = vld [vmem:[%s806_s0 + $0x18] sm:$0xff]  ;;  %v61_v16 = vmul.f32 %v376_v1, %v25_v13  ;;  %v28_v26 = vld [vmem:[%s806_s0 + $0x28] sm:$0xff] }
   0x4   :  { %v127_v3 = vld [vmem:[%s807_s1] sm:$0xff]  ;;  %v62_v18 = vmul.f32 %v376_v1, %v26_v15  ;;  %v130_v19 = vld [vmem:[%s807_s1 + $0x18] sm:$0xff]  ;;  %v132_v27 = vld [vmem:[%s807_s1 + $0x28] sm:$0xff]  ;;  %v64_v39 = vmul.f32 %v376_v1, %v28_v26 }
   0x5   :  { %v390_v5 = vld [vmem:[%s810_s4] ss:$0 sm:$0xff]  ;;  %v95_v9 = vadd.f32 %v381_v2, %v59_v4  ;;  %v96_v23 = vadd.f32 %v381_v2, %v60_v11  ;;  %v97_v28 = vadd.f32 %v381_v2, %v61_v16  ;;  %v29_v36 = vld [vmem:[%s806_s0 + $0x30] sm:$0xff]  ;;  %v30_v42 = vld [vmem:[%s806_s0 + $0x38] sm:$0xff] }
   0x6   :  { %v395_v6 = vld [vmem:[%s811_s5] ss:$0 sm:$0xff]  ;;  %v163_v10 = vmul.f32 %v390_v5, %v127_v3  ;;  %v164_v12 = vmul.f32 %v390_v5, %v128_v8  ;;  %v165_v17 = vmul.f32 %v390_v5, %v129_v14  ;;  %v166_v25 = vmul.f32 %v390_v5, %v130_v19  ;;  %v133_v41 = vld [vmem:[%s807_s1 + $0x30] sm:$0xff]  ;;  %v134_v47 = vld [vmem:[%s807_s1 + $0x38] sm:$0xff] }
   0x7   :  { %v27_v20 = vld [vmem:[%s806_s0 + $0x20] sm:$0xff]  ;;  %v98_v30 = vadd.f32 %v381_v2, %v62_v18  ;;  %v168_v40 = vmul.f32 %v390_v5, %v132_v27  ;;  %v100_v50 = vadd.f32 %v381_v2, %v64_v39  ;;  %v65_v52 = vmul.f32 %v376_v1, %v29_v36  ;;  %v32_v58 = vld [vmem:[%s806_s0 + $0x48] sm:$0xff]  ;;  %v33_v0 = vld [vmem:[%s806_s0 + $0x50] sm:$0xff] }
   0x8   :  { %v131_v21 = vld [vmem:[%s807_s1 + $0x20] sm:$0xff]  ;;  %v199_v22 = vadd.f32 %v395_v6, %v163_v10  ;;  %v200_v24 = vadd.f32 %v395_v6, %v164_v12  ;;  %v201_v29 = vadd.f32 %v395_v6, %v165_v17  ;;  %v63_v31 = vmul.f32 %v376_v1, %v27_v20  ;;  %v136_v63 = vld [vmem:[%s807_s1 + $0x48] sm:$0xff]  ;;  %v34_v10 = vld [vmem:[%s806_s0 + $0x58] sm:$0xff] }
   0x9   :  { %v202_v34 = vadd.f32 %v395_v6, %v166_v25  ;;  %v167_v35 = vmul.f32 %v390_v5, %v131_v21  ;;  %v31_v48 = vld [vmem:[%s806_s0 + $0x40] sm:$0xff]  ;;  %v204_v51 = vadd.f32 %v395_v6, %v168_v40  ;;  %v169_v56 = vmul.f32 %v390_v5, %v133_v41  ;;  %v138_v19 = vld [vmem:[%s807_s1 + $0x58] sm:$0xff]  ;;  %v37_v36 = vld [vmem:[%s806_s0 + $0x70] sm:$0xff] }
   0xa   :  { %v231_v32 = vadd.f32 %v199_v22, %v95_v9  ;;  %v232_v33 = vadd.f32 %v200_v24, %v96_v23  ;;  %v233_v37 = vadd.f32 %v201_v29, %v97_v28  ;;  %v99_v38 = vadd.f32 %v381_v2, %v63_v31  ;;  %v135_v53 = vld [vmem:[%s807_s1 + $0x40] sm:$0xff]  ;;  %v137_v9 = vld [vmem:[%s807_s1 + $0x50] sm:$0xff]  ;;  %v140_v31 = vld [vmem:[%s807_s1 + $0x68] sm:$0xff] }
   0xb   :  { %v234_v45 = vadd.f32 %v202_v34, %v98_v30  ;;  %v203_v46 = vadd.f32 %v395_v6, %v167_v35  ;;  %v66_v57 = vmul.f32 %v376_v1, %v30_v42  ;;  %v236_v59 = vadd.f32 %v204_v51, %v100_v50  ;;  %v35_v24 = vld [vmem:[%s806_s0 + $0x60] sm:$0xff]  ;;  %v36_v30 = vld [vmem:[%s806_s0 + $0x68] sm:$0xff]  ;;  %v142_v51 = vld [vmem:[%s807_s1 + $0x78] sm:$0xff] }
   0xc   :  { %v263_v43 = vmax.f32 %v231_v32, 0.0  ;;  %v264_v44 = vmax.f32 %v232_v33, 0.0  ;;  %v265_v49 = vmax.f32 %v233_v37, 0.0  ;;  %v101_v60 = vadd.f32 %v381_v2, %v65_v52  ;;  %v139_v25 = vld [vmem:[%s807_s1 + $0x60] sm:$0xff] }
   0xd   :  { %v266_v54 = vmax.f32 %v234_v45, 0.0  ;;  %v235_v55 = vadd.f32 %v203_v46, %v99_v38  ;;  %v170_v61 = vmul.f32 %v390_v5, %v134_v47  ;;  %v67_v62 = vmul.f32 %v376_v1, %v31_v48  ;;  %v141_v45 = vld [vmem:[%s807_s1 + $0x70] sm:$0xff]  ;;  %v38_v46 = vld [vmem:[%s806_s0 + $0x78] sm:$0xff]  ;;  %v39_v52 = vld [vmem:[%s806_s0 + $0x80] sm:$0xff] }
   0xe   :  { %295 = vst [vmem:[%s812_s6] sm:$0xff] %v263_v43  ;;  %v205_v4 = vadd.f32 %v395_v6, %v169_v56  ;;  %v102_v7 = vadd.f32 %v381_v2, %v66_v57  ;;  %v171_v8 = vmul.f32 %v390_v5, %v135_v53  ;;  %v268_v11 = vmax.f32 %v236_v59, 0.0  ;;  %v143_v57 = vld [vmem:[%s807_s1 + $0x80] sm:$0xff] }
   0xf   :  { %296 = vst [vmem:[%s812_s6 + $0x8] sm:$0xff] %v264_v44  ;;  %v267_v3 = vmax.f32 %v235_v55, 0.0  ;;  %v206_v12 = vadd.f32 %v395_v6, %v170_v61  ;;  %v103_v13 = vadd.f32 %v381_v2, %v67_v62  ;;  %v68_v14 = vmul.f32 %v376_v1, %v32_v58  ;;  %v40_v62 = vld [vmem:[%s806_s0 + $0x88] sm:$0xff] }
  0x10   :  { %297 = vst [vmem:[%s812_s6 + $0x10] sm:$0xff] %v265_v49  ;;  %v237_v15 = vadd.f32 %v205_v4, %v101_v60  ;;  %v207_v16 = vadd.f32 %v395_v6, %v171_v8  ;;  %v172_v17 = vmul.f32 %v390_v5, %v136_v63  ;;  %v69_v18 = vmul.f32 %v376_v1, %v33_v0  ;;  %v41_v8 = vld [vmem:[%s806_s0 + $0x90] sm:$0xff] }
  0x11   :  { %298 = vst [vmem:[%s812_s6 + $0x18] sm:$0xff] %v266_v54  ;;  %v238_v20 = vadd.f32 %v206_v12, %v102_v7  ;;  %v104_v21 = vadd.f32 %v381_v2, %v68_v14  ;;  %v173_v22 = vmul.f32 %v390_v5, %v137_v9  ;;  %v70_v23 = vmul.f32 %v376_v1, %v34_v10  ;;  %v144_v7 = vld [vmem:[%s807_s1 + $0x88] sm:$0xff]  ;;  %v42_v14 = vld [vmem:[%s806_s0 + $0x98] sm:$0xff] }
  0x12   :  { %299 = vst [vmem:[%s812_s6 + $0x20] sm:$0xff] %v267_v3  ;;  %v269_v26 = vmax.f32 %v237_v15, 0.0  ;;  %v239_v27 = vadd.f32 %v207_v16, %v103_v13  ;;  %v208_v28 = vadd.f32 %v395_v6, %v172_v17  ;;  %v105_v29 = vadd.f32 %v381_v2, %v69_v18  ;;  %v145_v13 = vld [vmem:[%s807_s1 + $0x90] sm:$0xff] }
  0x13   :  { %300 = vst [vmem:[%s812_s6 + $0x28] sm:$0xff] %v268_v11  ;;  %v270_v32 = vmax.f32 %v238_v20, 0.0  ;;  %v209_v33 = vadd.f32 %v395_v6, %v173_v22  ;;  %v106_v34 = vadd.f32 %v381_v2, %v70_v23  ;;  %v174_v35 = vmul.f32 %v390_v5, %v138_v19  ;;  %v146_v23 = vld [vmem:[%s807_s1 + $0x98] sm:$0xff] }
  0x14   :  { %301 = vst [vmem:[%s812_s6 + $0x30] sm:$0xff] %v269_v26  ;;  %v271_v37 = vmax.f32 %v239_v27, 0.0  ;;  %v240_v38 = vadd.f32 %v208_v28, %v104_v21  ;;  %v71_v39 = vmul.f32 %v376_v1, %v35_v24  ;;  %v175_v40 = vmul.f32 %v390_v5, %v139_v25  ;;  %v43_v28 = vld [vmem:[%s806_s0 + $0xa0] sm:$0xff] }
  0x15   :  { %302 = vst [vmem:[%s812_s6 + $0x38] sm:$0xff] %v270_v32  ;;  %v241_v41 = vadd.f32 %v209_v33, %v105_v29  ;;  %v210_v42 = vadd.f32 %v395_v6, %v174_v35  ;;  %v72_v43 = vmul.f32 %v376_v1, %v36_v30  ;;  %v176_v44 = vmul.f32 %v390_v5, %v140_v31  ;;  %v147_v29 = vld [vmem:[%s807_s1 + $0xa0] sm:$0xff]  ;;  %v148_v35 = vld [vmem:[%s807_s1 + $0xa8] sm:$0xff] }
  0x16   :  { %303 = vst [vmem:[%s812_s6 + $0x40] sm:$0xff] %v271_v37  ;;  %v272_v47 = vmax.f32 %v240_v38, 0.0  ;;  %v107_v48 = vadd.f32 %v381_v2, %v71_v39  ;;  %v211_v49 = vadd.f32 %v395_v6, %v175_v40  ;;  %v73_v50 = vmul.f32 %v376_v1, %v37_v36  ;;  %v45_v40 = vld [vmem:[%s806_s0 + $0xb0] sm:$0xff] }
  0x17   :  { %v273_v53 = vmax.f32 %v241_v41, 0.0  ;;  %v242_v54 = vadd.f32 %v210_v42, %v106_v34  ;;  %v108_v55 = vadd.f32 %v381_v2, %v72_v43  ;;  %v212_v56 = vadd.f32 %v395_v6, %v176_v44  ;;  %v44_v34 = vld [vmem:[%s806_s0 + $0xa8] sm:$0xff] }
  0x18   :  { %304 = vst [vmem:[%s812_s6 + $0x48] sm:$0xff] %v272_v47  ;;  %v243_v58 = vadd.f32 %v211_v49, %v107_v48  ;;  %v109_v59 = vadd.f32 %v381_v2, %v73_v50  ;;  %v177_v60 = vmul.f32 %v390_v5, %v141_v45  ;;  %v74_v61 = vmul.f32 %v376_v1, %v38_v46  ;;  %v149_v49 = vld [vmem:[%s807_s1 + $0xb0] sm:$0xff]  ;;  %v46_v50 = vld [vmem:[%s806_s0 + $0xb8] sm:$0xff] }
  0x19   :  { %305 = vst [vmem:[%s812_s6 + $0x50] sm:$0xff] %v273_v53  ;;  %v274_v63 = vmax.f32 %v242_v54, 0.0  ;;  %v244_v0 = vadd.f32 %v212_v56, %v108_v55  ;;  %v178_v3 = vmul.f32 %v390_v5, %v142_v51  ;;  %v75_v4 = vmul.f32 %v376_v1, %v39_v52  ;;  %v150_v55 = vld [vmem:[%s807_s1 + $0xb8] sm:$0xff]  ;;  %v47_v56 = vld [vmem:[%s806_s0 + $0xc0] sm:$0xff] }
  0x1a   :  { %v275_v9 = vmax.f32 %v243_v58, 0.0  ;;  %v213_v10 = vadd.f32 %v395_v6, %v177_v60  ;;  %v110_v11 = vadd.f32 %v381_v2, %v74_v61  ;;  %v179_v12 = vmul.f32 %v390_v5, %v143_v57  ;;  %v151_v61 = vld [vmem:[%s807_s1 + $0xc0] sm:$0xff] }
  0x1b   :  { %306 = vst [vmem:[%s812_s6 + $0x58] sm:$0xff] %v274_v63  ;;  %v276_v15 = vmax.f32 %v244_v0, 0.0  ;;  %v214_v16 = vadd.f32 %v395_v6, %v178_v3  ;;  %v111_v17 = vadd.f32 %v381_v2, %v75_v4  ;;  %v76_v18 = vmul.f32 %v376_v1, %v40_v62  ;;  %v48_v4 = vld [vmem:[%s806_s0 + $0xc8] sm:$0xff] }
  0x1c   :  { %307 = vst [vmem:[%s812_s6 + $0x60] sm:$0xff] %v275_v9  ;;  %v245_v19 = vadd.f32 %v213_v10, %v109_v59  ;;  %v215_v20 = vadd.f32 %v395_v6, %v179_v12  ;;  %v180_v21 = vmul.f32 %v390_v5, %v144_v7  ;;  %v77_v22 = vmul.f32 %v376_v1, %v41_v8  ;;  %v49_v12 = vld [vmem:[%s806_s0 + $0xd0] sm:$0xff] }
  0x1d   :  { %308 = vst [vmem:[%s812_s6 + $0x68] sm:$0xff] %v276_v15  ;;  %v246_v24 = vadd.f32 %v214_v16, %v110_v11  ;;  %v112_v25 = vadd.f32 %v381_v2, %v76_v18  ;;  %v181_v26 = vmul.f32 %v390_v5, %v145_v13  ;;  %v78_v27 = vmul.f32 %v376_v1, %v42_v14  ;;  %v152_v11 = vld [vmem:[%s807_s1 + $0xc8] sm:$0xff]  ;;  %v50_v18 = vld [vmem:[%s806_s0 + $0xd8] sm:$0xff] }
  0x1e   :  { %v277_v30 = vmax.f32 %v245_v19, 0.0  ;;  %v247_v31 = vadd.f32 %v215_v20, %v111_v17  ;;  %v216_v32 = vadd.f32 %v395_v6, %v180_v21  ;;  %v113_v33 = vadd.f32 %v381_v2, %v77_v22  ;;  %v153_v17 = vld [vmem:[%s807_s1 + $0xd0] sm:$0xff] }
  0x1f   :  { %v278_v36 = vmax.f32 %v246_v24, 0.0  ;;  %v217_v37 = vadd.f32 %v395_v6, %v181_v26  ;;  %v114_v38 = vadd.f32 %v381_v2, %v78_v27  ;;  %v182_v39 = vmul.f32 %v390_v5, %v146_v23  ;;  %v154_v27 = vld [vmem:[%s807_s1 + $0xd8] sm:$0xff] }
  0x20   :  { %309 = vst [vmem:[%s812_s6 + $0x70] sm:$0xff] %v277_v30  ;;  %v279_v41 = vmax.f32 %v247_v31, 0.0  ;;  %v248_v42 = vadd.f32 %v216_v32, %v112_v25  ;;  %v79_v43 = vmul.f32 %v376_v1, %v43_v28  ;;  %v183_v44 = vmul.f32 %v390_v5, %v147_v29  ;;  %v51_v32 = vld [vmem:[%s806_s0 + $0xe0] sm:$0xff] }
  0x21   :  { %310 = vst [vmem:[%s812_s6 + $0x78] sm:$0xff] %v278_v36  ;;  %v249_v45 = vadd.f32 %v217_v37, %v113_v33  ;;  %v218_v46 = vadd.f32 %v395_v6, %v182_v39  ;;  %v80_v47 = vmul.f32 %v376_v1, %v44_v34  ;;  %v184_v48 = vmul.f32 %v390_v5, %v148_v35  ;;  %v155_v33 = vld [vmem:[%s807_s1 + $0xe0] sm:$0xff]  ;;  %v156_v39 = vld [vmem:[%s807_s1 + $0xe8] sm:$0xff] }
  0x22   :  { %311 = vst [vmem:[%s812_s6 + $0x80] sm:$0xff] %v279_v41  ;;  %v280_v51 = vmax.f32 %v248_v42, 0.0  ;;  %v115_v52 = vadd.f32 %v381_v2, %v79_v43  ;;  %v219_v53 = vadd.f32 %v395_v6, %v183_v44  ;;  %v81_v54 = vmul.f32 %v376_v1, %v45_v40  ;;  %v53_v44 = vld [vmem:[%s806_s0 + $0xf0] sm:$0xff] }
  0x23   :  { %v281_v57 = vmax.f32 %v249_v45, 0.0  ;;  %v250_v58 = vadd.f32 %v218_v46, %v114_v38  ;;  %v116_v59 = vadd.f32 %v381_v2, %v80_v47  ;;  %v220_v60 = vadd.f32 %v395_v6, %v184_v48  ;;  %v52_v38 = vld [vmem:[%s806_s0 + $0xe8] sm:$0xff] }
  0x24   :  { %312 = vst [vmem:[%s812_s6 + $0x88] sm:$0xff] %v280_v51  ;;  %v251_v62 = vadd.f32 %v219_v53, %v115_v52  ;;  %v117_v63 = vadd.f32 %v381_v2, %v81_v54  ;;  %v185_v0 = vmul.f32 %v390_v5, %v149_v49  ;;  %v82_v3 = vmul.f32 %v376_v1, %v46_v50  ;;  %v157_v53 = vld [vmem:[%s807_s1 + $0xf0] sm:$0xff]  ;;  %v54_v54 = vld [vmem:[%s806_s0 + $0xf8] sm:$0xff] }
  0x25   :  { %313 = vst [vmem:[%s812_s6 + $0x90] sm:$0xff] %v281_v57  ;;  %v282_v7 = vmax.f32 %v250_v58, 0.0  ;;  %v252_v8 = vadd.f32 %v220_v60, %v116_v59  ;;  %v186_v9 = vmul.f32 %v390_v5, %v150_v55  ;;  %v83_v10 = vmul.f32 %v376_v1, %v47_v56  ;;  %v158_v59 = vld [vmem:[%s807_s1 + $0xf8] sm:$0xff] }
  0x26   :  { %v283_v13 = vmax.f32 %v251_v62, 0.0  ;;  %v221_v14 = vadd.f32 %v395_v6, %v185_v0  ;;  %v118_v15 = vadd.f32 %v381_v2, %v82_v3  ;;  %v187_v16 = vmul.f32 %v390_v5, %v151_v61 }
  0x27   :  { %314 = vst [vmem:[%s812_s6 + $0x98] sm:$0xff] %v282_v7  ;;  %v284_v19 = vmax.f32 %v252_v8, 0.0  ;;  %v222_v20 = vadd.f32 %v395_v6, %v186_v9  ;;  %v119_v21 = vadd.f32 %v381_v2, %v83_v10  ;;  %v84_v22 = vmul.f32 %v376_v1, %v48_v4 }
  0x28   :  { %315 = vst [vmem:[%s812_s6 + $0xa0] sm:$0xff] %v283_v13  ;;  %v253_v23 = vadd.f32 %v221_v14, %v117_v63  ;;  %v223_v24 = vadd.f32 %v395_v6, %v187_v16  ;;  %v188_v25 = vmul.f32 %v390_v5, %v152_v11  ;;  %v85_v26 = vmul.f32 %v376_v1, %v49_v12 }
  0x29   :  { %316 = vst [vmem:[%s812_s6 + $0xa8] sm:$0xff] %v284_v19  ;;  %v254_v28 = vadd.f32 %v222_v20, %v118_v15  ;;  %v120_v29 = vadd.f32 %v381_v2, %v84_v22  ;;  %v189_v30 = vmul.f32 %v390_v5, %v153_v17  ;;  %v86_v31 = vmul.f32 %v376_v1, %v50_v18 }
  0x2a   :  { %v285_v34 = vmax.f32 %v253_v23, 0.0  ;;  %v255_v35 = vadd.f32 %v223_v24, %v119_v21  ;;  %v224_v36 = vadd.f32 %v395_v6, %v188_v25  ;;  %v121_v37 = vadd.f32 %v381_v2, %v85_v26 }
  0x2b   :  { %v286_v40 = vmax.f32 %v254_v28, 0.0  ;;  %v225_v41 = vadd.f32 %v395_v6, %v189_v30  ;;  %v122_v42 = vadd.f32 %v381_v2, %v86_v31  ;;  %v190_v43 = vmul.f32 %v390_v5, %v154_v27 }
  0x2c   :  { %317 = vst [vmem:[%s812_s6 + $0xb0] sm:$0xff] %v285_v34  ;;  %v287_v45 = vmax.f32 %v255_v35, 0.0  ;;  %v256_v46 = vadd.f32 %v224_v36, %v120_v29  ;;  %v87_v47 = vmul.f32 %v376_v1, %v51_v32  ;;  %v191_v48 = vmul.f32 %v390_v5, %v155_v33 }
  0x2d   :  { %318 = vst [vmem:[%s812_s6 + $0xb8] sm:$0xff] %v286_v40  ;;  %v257_v49 = vadd.f32 %v225_v41, %v121_v37  ;;  %v226_v50 = vadd.f32 %v395_v6, %v190_v43  ;;  %v88_v51 = vmul.f32 %v376_v1, %v52_v38  ;;  %v192_v52 = vmul.f32 %v390_v5, %v156_v39 }
  0x2e   :  { %319 = vst [vmem:[%s812_s6 + $0xc0] sm:$0xff] %v287_v45  ;;  %v288_v55 = vmax.f32 %v256_v46, 0.0  ;;  %v123_v56 = vadd.f32 %v381_v2, %v87_v47  ;;  %v227_v57 = vadd.f32 %v395_v6, %v191_v48  ;;  %v89_v58 = vmul.f32 %v376_v1, %v53_v44 }
  0x2f   :  { %v289_v60 = vmax.f32 %v257_v49, 0.0  ;;  %v258_v61 = vadd.f32 %v226_v50, %v122_v42  ;;  %v124_v62 = vadd.f32 %v381_v2, %v88_v51  ;;  %v228_v63 = vadd.f32 %v395_v6, %v192_v52 }
  0x30   :  { %320 = vst [vmem:[%s812_s6 + $0xc8] sm:$0xff] %v288_v55  ;;  %v259_v0 = vadd.f32 %v227_v57, %v123_v56  ;;  %v125_v3 = vadd.f32 %v381_v2, %v89_v58  ;;  %v193_v4 = vmul.f32 %v390_v5, %v157_v53  ;;  %v90_v7 = vmul.f32 %v376_v1, %v54_v54 }
  0x31   :  { %321 = vst [vmem:[%s812_s6 + $0xd0] sm:$0xff] %v289_v60  ;;  %v290_v8 = vmax.f32 %v258_v61, 0.0  ;;  %v260_v9 = vadd.f32 %v228_v63, %v124_v62  ;;  %v194_v10 = vmul.f32 %v390_v5, %v158_v59 }
  0x32   :  { %v291_v11 = vmax.f32 %v259_v0, 0.0  ;;  %v229_v12 = vadd.f32 %v395_v6, %v193_v4  ;;  %v126_v13 = vadd.f32 %v381_v2, %v90_v7 }
  0x33   :  { %322 = vst [vmem:[%s812_s6 + $0xd8] sm:$0xff] %v290_v8  ;;  %v292_v14 = vmax.f32 %v260_v9, 0.0  ;;  %v230_v1 = vadd.f32 %v395_v6, %v194_v10 }
  0x34   :  { %323 = vst [vmem:[%s812_s6 + $0xe0] sm:$0xff] %v291_v11  ;;  %v261_v15 = vadd.f32 %v229_v12, %v125_v3 }
  0x35   :  { %324 = vst [vmem:[%s812_s6 + $0xe8] sm:$0xff] %v292_v14  ;;  %v262_v5 = vadd.f32 %v230_v1, %v126_v13 }
  0x36   :  { %v293_v16 = vmax.f32 %v261_v15, 0.0 }
  0x37   :  { %v294_v17 = vmax.f32 %v262_v5, 0.0 }
  0x38   :  { %325 = vst [vmem:[%s812_s6 + $0xf0] sm:$0xff] %v293_v16 }
  0x39   :  { %326 = vst [vmem:[%s812_s6 + $0xf8] sm:$0xff] %v294_v17 }

</bundles_post_ra>
